<compile_context>
chip_gen: v7x
topology: tpu7x:2x2x1
jax: 0.10.0
libtpu: 0.0.40
codegen_flags: <defaults>
</compile_context>

<pallas_src>
import numpy as np
import jax
import jax.numpy as jnp
from jax.experimental import pallas as pl
from jax.experimental.pallas import tpu as pltpu


# Tap / offset order shared by the kernel and the wrapper-side weight packing.
_OFFS = tuple((dy, dx) for dy in (-1, 0, 1) for dx in (-1, 0, 1))


# ---------------------------------------------------------------------------
# Fused kernel
# ---------------------------------------------------------------------------
def _make_kernel(C, Cout, H, W):
    HW = H * W

    def kernel(x_ref, w1_ref, b1_ref, w3_ref, b3_ref, w4_ref, b4_ref,
               wu_ref, bu_ref, w6_ref, b6_ref, t_ref, o_ref):
        f32 = jnp.float32
        x = x_ref[0]                                        # (C, HW)

        # Border masks on the H x W grid, computed once and reused by every
        # 3x3 conv in the fused graph (including the polyphase conv6).
        pos = jax.lax.broadcasted_iota(jnp.int32, (1, HW), 1)
        colx = pos % W
        m_l = (colx >= 1).astype(f32)
        m_r = (colx <= W - 2).astype(f32)
        m_t = (pos >= W).astype(f32)
        m_b = (pos < (H - 1) * W).astype(f32)

        def _mask(dy, dx):
            m = None
            if dx == -1:
                m = m_l
            elif dx == 1:
                m = m_r
            if dy == -1:
                m = m_t if m is None else m * m_t
            elif dy == 1:
                m = m_b if m is None else m * m_b
            return m

        masks = {od: _mask(*od) for od in _OFFS}

        def shifted(v, dy, dx):
            # v[:, q] -> v[:, q + dy*W + dx], zeroed outside the H x W border.
            s = dy * W + dx
            out = v if s == 0 else pltpu.roll(v, shift=(-s) % HW, axis=1)
            m = masks[(dy, dx)]
            return out if m is None else out * m

        def conv3x3(v, w9, b, relu):
            # w9: (9, Co, Ci).  Per-tap (Co,Ci)@(Ci,HW) MXU dot; live state
            # stays at (Co, HW) (accumulator starts at the folded-BN bias).
            co = w9.shape[1]
            acc = jnp.broadcast_to(b, (co, HW))
            for k, (dy, dx) in enumerate(_OFFS):
                acc = acc + jnp.dot(w9[k], shifted(v, dy, dx),
                                    preferred_element_type=f32)
            return jnp.maximum(acc, 0.0) if relu else acc

        w1 = w1_ref[...]; b1 = b1_ref[...]
        w3 = w3_ref[...]; b3 = b3_ref[...]
        w4 = w4_ref[...]; b4 = b4_ref[...]

        t = conv3x3(x, w1, b1, True)                        # conv1 + BN + ReLU
        t = conv3x3(t, w3, b3, False)                       # conv3 + BN
        t = jnp.maximum(t + x, 0.0)                         # residual ReLU
        t = conv3x3(t, w4, b4, True)                        # conv4 + BN + ReLU

        # upconv1 (ConvTranspose2d k=2, s=2, groups expanded dense) + BN:
        # all 4 output phases in one dot, stacked on sublanes -> (4C, HW),
        # row = (ky*2+kx)*C + c.
        u = jnp.dot(wu_ref[...], t, preferred_element_type=f32) + bu_ref[...]

        # conv6 + BN on the virtual (2H, 2W) image, polyphase: the routing of
        # upconv phases into the 3x3 taps of each conv6 output phase is baked
        # into w6 wrapper-side, so only 9 shifted taps / 9 dots are needed.
        w6 = w6_ref[...]                                    # (9, 4*Cout, 4*C)
        o_all = jnp.broadcast_to(b6_ref[...], (4 * Cout, HW))
        for k, (dy, dx) in enumerate(_OFFS):
            o_all = o_all + jnp.dot(w6[k], shifted(u, dy, dx),
                                    preferred_element_type=f32)

        # Interleave the 4 conv6 output phases into row-major (2H, 2W) on the
        # lane axis: one-hot scatter matmul (phase (0,0) lane positions) plus a
        # lane roll per remaining phase, then one dense (Cout, 4HW) store.
        scat = t_ref[...]                                   # (HW, 4*HW) one-hot
        final = None
        for op in range(4):
            oy, ox = divmod(op, 2)
            o_ph = o_all[op * Cout:(op + 1) * Cout, :]      # (Cout, HW)
            sc = jnp.dot(o_ph, scat, preferred_element_type=f32)
            sft = oy * 2 * W + ox
            if sft:
                sc = pltpu.roll(sc, shift=sft, axis=1)
            final = sc if final is None else final + sc
        o_ref[0] = final                                    # (Cout, 4*HW)

    return kernel


# ---------------------------------------------------------------------------
# Wrapper-side parameter preparation (BN folding, grouping, phase routing)
# ---------------------------------------------------------------------------
def _expand_grouped_conv(w, groups):
    """Conv2d weight (Cout, Cin//g, kh, kw) -> block-diagonal dense."""
    if groups == 1:
        return w
    co, ci_g, kh, kw = w.shape
    co_g = co // groups
    out = jnp.zeros((co, ci_g * groups, kh, kw), w.dtype)
    for g in range(groups):
        out = out.at[g * co_g:(g + 1) * co_g,
                     g * ci_g:(g + 1) * ci_g].set(w[g * co_g:(g + 1) * co_g])
    return out


def _expand_grouped_convT(w, groups):
    """ConvTranspose2d weight (Cin, Cout//g, kh, kw) -> block-diagonal dense."""
    if groups == 1:
        return w
    ci, co_g, kh, kw = w.shape
    ci_g = ci // groups
    out = jnp.zeros((ci, co_g * groups, kh, kw), w.dtype)
    for g in range(groups):
        out = out.at[g * ci_g:(g + 1) * ci_g,
                     g * co_g:(g + 1) * co_g].set(w[g * ci_g:(g + 1) * ci_g])
    return out


def _bn_fold(bn, eps):
    gamma, beta, mean, var = bn
    scale = (gamma / jnp.sqrt(var + eps)).astype(jnp.float32)
    bias = (beta - mean * scale).astype(jnp.float32)
    return scale, bias


def _fold_conv_bn(w, bn, groups, eps):
    """3x3 conv + eval-BN -> ((9, Cout, Cin), (Cout, 1)), tap = ky*3+kx."""
    scale, bias = _bn_fold(bn, eps)
    wd = _expand_grouped_conv(w, groups).astype(jnp.float32)
    wd = wd * scale[:, None, None, None]
    co, ci = wd.shape[0], wd.shape[1]
    w9 = jnp.transpose(wd, (2, 3, 0, 1)).reshape(9, co, ci)
    return w9, bias.reshape(co, 1)


def _fold_convT_bn(w, bn, groups, eps):
    """ConvTranspose2d(k=2,s=2)+BN -> ((4*Cout, Cin), (4*Cout, 1)),
    output rows ordered (ky*2+kx)*Cout + c."""
    scale, bias = _bn_fold(bn, eps)
    wd = _expand_grouped_convT(w, groups).astype(jnp.float32)   # (Cin, Cout, 2, 2)
    wd = wd * scale[None, :, None, None]
    ci, co = wd.shape[0], wd.shape[1]
    wstack = jnp.transpose(wd, (2, 3, 1, 0)).reshape(4 * co, ci)
    bstack = jnp.tile(bias.reshape(co, 1), (4, 1))
    return wstack, bstack


def _fold_conv6_routed(w, bn, eps):
    """conv6 + eval-BN, routed for polyphase evaluation on the 4 upconv phase
    tensors -> ((9, 4*Cout, 4*Cin), (4*Cout, 1)).
    dim1 row = out_phase*Cout + co, dim2 col = src_phase*Cin + ci, and the
    leading index is the (offy, offx) shift on the H x W phase grid."""
    scale, bias = _bn_fold(bn, eps)
    wf = w.astype(jnp.float32) * scale[:, None, None, None]    # (Cout, Cin, 3, 3)
    co, ci = wf.shape[0], wf.shape[1]
    wr = jnp.zeros((9, 4, co, 4, ci), jnp.float32)
    for oy in range(2):
        for ox in range(2):
            for dy in (-1, 0, 1):
                for dx in (-1, 0, 1):
                    sy = (oy + dy) % 2
                    offy = (oy + dy - sy) // 2
                    sx = (ox + dx) % 2
                    offx = (ox + dx - sx) // 2
                    k = (offy + 1) * 3 + (offx + 1)
                    wr = wr.at[k, oy * 2 + ox, :, sy * 2 + sx, :].set(
                        wf[:, :, dy + 1, dx + 1])
    wr = wr.reshape(9, 4 * co, 4 * ci)
    br = jnp.tile(bias.reshape(co, 1), (4, 1))
    return wr, br


def _phase_scatter(H, W):
    """One-hot (HW, 4HW): source (y, x) -> target (2y, 2x) of the 2Hx2W image."""
    HW = H * W
    q = np.arange(HW)
    p = 4 * W * (q // W) + 2 * (q % W)
    m = np.zeros((HW, 4 * HW), np.float32)
    m[q, p] = 1.0
    return jnp.asarray(m)


# ---------------------------------------------------------------------------
# Forward pass (one fused pallas_call)
# ---------------------------------------------------------------------------
def resdiv_forward(x, w1, bn1, w3, bn3, w4, bn4, wu, bnu, w6, bn6, eps=1e-5):
    N, C, H, W = x.shape
    Cout = w6.shape[0]
    HW = H * W

    w1k, b1k = _fold_conv_bn(w1, bn1, 2, eps)
    w3k, b3k = _fold_conv_bn(w3, bn3, 1, eps)
    w4k, b4k = _fold_conv_bn(w4, bn4, 2, eps)
    wuk, buk = _fold_convT_bn(wu, bnu, 2, eps)
    w6k, b6k = _fold_conv6_routed(w6, bn6, eps)
    scat = _phase_scatter(H, W)

    x_flat = x.astype(jnp.float32).reshape(N, C, HW)

    def _w(shape):
        return pl.BlockSpec(shape, lambda n: (0,) * len(shape))

    out = pl.pallas_call(
        _make_kernel(C, Cout, H, W),
        out_shape=jax.ShapeDtypeStruct((N, Cout, 4 * HW), jnp.float32),
        grid=(N,),
        in_specs=[
            pl.BlockSpec((1, C, HW), lambda n: (n, 0, 0)),
            _w((9, C, C)), _w((C, 1)),
            _w((9, C, C)), _w((C, 1)),
            _w((9, C, C)), _w((C, 1)),
            _w((4 * C, C)), _w((4 * C, 1)),
            _w((9, 4 * Cout, 4 * C)), _w((4 * Cout, 1)),
            _w((HW, 4 * HW)),
        ],
        out_specs=pl.BlockSpec((1, Cout, 4 * HW), lambda n: (n, 0, 0)),
        compiler_params=pltpu.CompilerParams(
            dimension_semantics=("parallel",)),
    )(x_flat, w1k, b1k, w3k, b3k, w4k, b4k, wuk, buk, w6k, b6k, scat)

    # Pure metadata reshape: kernel output is already row-major (2H, 2W).
    return out.reshape(N, Cout, 2 * H, 2 * W)


# ---------------------------------------------------------------------------
# Pure-JAX reference (eval-mode BN), independent of the kernel's math
# ---------------------------------------------------------------------------
def resdiv_reference(x, w1, bn1, w3, bn3, w4, bn4, wu, bnu, w6, bn6, eps=1e-5):
    def bn(t, p):
        g, b, m, v = p
        inv = g / jnp.sqrt(v + eps)
        return t * inv[None, :, None, None] + (b - m * inv)[None, :, None, None]

    def conv3(t, w, groups=1):
        return jax.lax.conv_general_dilated(
            t, w, window_strides=(1, 1), padding=((1, 1), (1, 1)),
            dimension_numbers=('NCHW', 'OIHW', 'NCHW'),
            feature_group_count=groups,
            precision=jax.lax.Precision.HIGHEST)

    identity = x
    t = jnp.maximum(bn(conv3(x, w1, 2), bn1), 0.0)
    t = bn(conv3(t, w3), bn3)
    t = jnp.maximum(t + identity, 0.0)
    t = jnp.maximum(bn(conv3(t, w4, 2), bn4), 0.0)

    # ConvTranspose2d(k=2, s=2, groups=2) == lhs-dilated conv with the
    # spatially flipped, channel-swapped kernel.
    groups = 2
    ci, co_g, k, _ = wu.shape
    ci_g = ci // groups
    wt = wu.reshape(groups, ci_g, co_g, k, k)
    wt = jnp.flip(wt, axis=(-2, -1))
    wt = jnp.transpose(wt, (0, 2, 1, 3, 4)).reshape(groups * co_g, ci_g, k, k)
    t = jax.lax.conv_general_dilated(
        t, wt, window_strides=(1, 1),
        padding=((k - 1, k - 1), (k - 1, k - 1)),
        lhs_dilation=(2, 2),
        dimension_numbers=('NCHW', 'OIHW', 'NCHW'),
        feature_group_count=groups,
        precision=jax.lax.Precision.HIGHEST)
    t = bn(t, bnu)
    t = bn(conv3(t, w6), bn6)
    return t


if __name__ == "__main__":
    N, C, COUT, H, W = 2, 4, 8, 16, 16
    eps = 1e-5

    key = jax.random.PRNGKey(0)
    ks = jax.random.split(key, 12)

    def bn_params(k, c):
        k1, k2, k3, k4 = jax.random.split(k, 4)
        gamma = 1.0 + 0.1 * jax.random.normal(k1, (c,), jnp.float32)
        beta = 0.1 * jax.random.normal(k2, (c,), jnp.float32)
        mean = 0.1 * jax.random.normal(k3, (c,), jnp.float32)
        var = 1.0 + 0.1 * jax.random.uniform(k4, (c,), jnp.float32)
        return gamma, beta, mean, var

    x = jax.random.normal(ks[0], (N, C, H, W), jnp.float32)

    w1 = 0.1 * jax.random.normal(ks[1], (C, C // 2, 3, 3), jnp.float32)   # groups=2
    bn1 = bn_params(ks[2], C)
    w3 = 0.1 * jax.random.normal(ks[3], (C, C, 3, 3), jnp.float32)
    bn3 = bn_params(ks[4], C)
    w4 = 0.1 * jax.random.normal(ks[5], (C, C // 2, 3, 3), jnp.float32)   # groups=2
    bn4 = bn_params(ks[6], C)
    wu = 0.1 * jax.random.normal(ks[7], (C, C // 2, 2, 2), jnp.float32)   # ConvT groups=2
    bnu = bn_params(ks[8], C)
    w6 = 0.1 * jax.random.normal(ks[9], (COUT, C, 3, 3), jnp.float32)
    bn6 = bn_params(ks[10], COUT)

    fwd = jax.jit(resdiv_forward)
    out = fwd(x, w1, bn1, w3, bn3, w4, bn4, wu, bnu, w6, bn6)
    out = jax.block_until_ready(out)

    ref = resdiv_reference(x, w1, bn1, w3, bn3, w4, bn4, wu, bnu, w6, bn6)
    ref = jax.block_until_ready(ref)

    assert out.shape == (N, COUT, 2 * H, 2 * W), out.shape
    # Tolerance accounts for the MXU channel-mix (f32 matmuls may run as bf16
    # passes); the reference uses HIGHEST-precision f32 convolutions.
    max_err = float(jnp.max(jnp.abs(out - ref)))
    assert jnp.allclose(out, ref, rtol=2e-2, atol=2e-2), max_err

    print("KERNEL_OK")
</pallas_src>

<mosaic_0001>
module attributes {stable_mosaic.version = 11 : i64} {
  func.func @kernel(%arg0: i32, %arg1: memref<1x4x256xf32, #tpu.memory_space<vmem>>, %arg2: memref<9x4x4xf32, #tpu.memory_space<vmem>>, %arg3: memref<4x1xf32, #tpu.memory_space<vmem>>, %arg4: memref<9x4x4xf32, #tpu.memory_space<vmem>>, %arg5: memref<4x1xf32, #tpu.memory_space<vmem>>, %arg6: memref<9x4x4xf32, #tpu.memory_space<vmem>>, %arg7: memref<4x1xf32, #tpu.memory_space<vmem>>, %arg8: memref<16x4xf32, #tpu.memory_space<vmem>>, %arg9: memref<16x1xf32, #tpu.memory_space<vmem>>, %arg10: memref<9x32x16xf32, #tpu.memory_space<vmem>>, %arg11: memref<32x1xf32, #tpu.memory_space<vmem>>, %arg12: memref<256x1024xf32, #tpu.memory_space<vmem>>, %arg13: memref<1x8x1024xf32, #tpu.memory_space<vmem>>) attributes {dimension_semantics = [#tpu.dimension_semantics<parallel>], iteration_bounds = array<i64: 2>, scalar_prefetch = 0 : i64, scratch_operands = 0 : i64, tpu.core_type = #tpu.core_type<tc>, window_params = [{transform_indices = @transform_0, window_bounds = array<i64: 1, 4, 256>}, {pipeline_mode = #tpu.pipeline_mode<synchronous>, transform_indices = @transform_1, window_bounds = array<i64: 9, 4, 4>}, {pipeline_mode = #tpu.pipeline_mode<synchronous>, transform_indices = @transform_2, window_bounds = array<i64: 4, 1>}, {pipeline_mode = #tpu.pipeline_mode<synchronous>, transform_indices = @transform_3, window_bounds = array<i64: 9, 4, 4>}, {pipeline_mode = #tpu.pipeline_mode<synchronous>, transform_indices = @transform_4, window_bounds = array<i64: 4, 1>}, {pipeline_mode = #tpu.pipeline_mode<synchronous>, transform_indices = @transform_5, window_bounds = array<i64: 9, 4, 4>}, {pipeline_mode = #tpu.pipeline_mode<synchronous>, transform_indices = @transform_6, window_bounds = array<i64: 4, 1>}, {pipeline_mode = #tpu.pipeline_mode<synchronous>, transform_indices = @transform_7, window_bounds = array<i64: 16, 4>}, {pipeline_mode = #tpu.pipeline_mode<synchronous>, transform_indices = @transform_8, window_bounds = array<i64: 16, 1>}, {pipeline_mode = #tpu.pipeline_mode<synchronous>, transform_indices = @transform_9, window_bounds = array<i64: 9, 32, 16>}, {pipeline_mode = #tpu.pipeline_mode<synchronous>, transform_indices = @transform_10, window_bounds = array<i64: 32, 1>}, {pipeline_mode = #tpu.pipeline_mode<synchronous>, transform_indices = @transform_11, window_bounds = array<i64: 256, 1024>}, {transform_indices = @transform_12, window_bounds = array<i64: 1, 8, 1024>}]} {
    %c0 = arith.constant 0 : index
    %c0_0 = arith.constant 0 : index
    %c0_1 = arith.constant 0 : index
    %0 = vector.load %arg1[%c0, %c0_0, %c0_1] : memref<1x4x256xf32, #tpu.memory_space<vmem>>, vector<1x4x256xf32>
    %1 = vector.shape_cast %0 : vector<1x4x256xf32> to vector<4x256xf32>
    %2 = tpu.iota {dimensions = array<i32: 1>} : vector<1x256xi32>
    %c16_i32 = arith.constant 16 : i32
    %c0_i32 = arith.constant 0 : i32
    %3 = arith.cmpi eq, %c16_i32, %c0_i32 : i32
    %c1_i32 = arith.constant 1 : i32
    %4 = arith.select %3, %c1_i32, %c16_i32 : i32
    %5 = vector.broadcast %4 : i32 to vector<1x256xi32>
    %6 = arith.remsi %2, %5 : vector<1x256xi32>
    %c0_i32_2 = arith.constant 0 : i32
    %7 = vector.broadcast %c0_i32_2 : i32 to vector<1x256xi32>
    %8 = arith.cmpi ne, %6, %7 : vector<1x256xi32>
    %c0_i32_3 = arith.constant 0 : i32
    %9 = vector.broadcast %c0_i32_3 : i32 to vector<1x256xi32>
    %10 = arith.cmpi slt, %6, %9 : vector<1x256xi32>
    %c0_i32_4 = arith.constant 0 : i32
    %11 = arith.cmpi slt, %4, %c0_i32_4 : i32
    %12 = vector.broadcast %11 : i1 to vector<1x256xi1>
    %13 = vector.broadcast %12 : vector<1x256xi1> to vector<1x256xi1>
    %14 = arith.xori %10, %13 : vector<1x256xi1>
    %15 = arith.andi %14, %8 : vector<1x256xi1>
    %16 = vector.broadcast %4 : i32 to vector<1x256xi32>
    %17 = arith.addi %6, %16 : vector<1x256xi32>
    %18 = arith.select %15, %17, %6 : vector<1x256xi1>, vector<1x256xi32>
    %c1_i32_5 = arith.constant 1 : i32
    %19 = vector.broadcast %c1_i32_5 : i32 to vector<1x256xi32>
    %20 = arith.cmpi sge, %18, %19 : vector<1x256xi32>
    %21 = arith.extui %20 : vector<1x256xi1> to vector<1x256xi32>
    %22 = arith.sitofp %21 : vector<1x256xi32> to vector<1x256xf32>
    %c14_i32 = arith.constant 14 : i32
    %23 = vector.broadcast %c14_i32 : i32 to vector<1x256xi32>
    %24 = arith.cmpi sle, %18, %23 : vector<1x256xi32>
    %25 = arith.extui %24 : vector<1x256xi1> to vector<1x256xi32>
    %26 = arith.sitofp %25 : vector<1x256xi32> to vector<1x256xf32>
    %c16_i32_6 = arith.constant 16 : i32
    %27 = vector.broadcast %c16_i32_6 : i32 to vector<1x256xi32>
    %28 = arith.cmpi sge, %2, %27 : vector<1x256xi32>
    %29 = arith.extui %28 : vector<1x256xi1> to vector<1x256xi32>
    %30 = arith.sitofp %29 : vector<1x256xi32> to vector<1x256xf32>
    %c240_i32 = arith.constant 240 : i32
    %31 = vector.broadcast %c240_i32 : i32 to vector<1x256xi32>
    %32 = arith.cmpi slt, %2, %31 : vector<1x256xi32>
    %33 = arith.extui %32 : vector<1x256xi1> to vector<1x256xi32>
    %34 = arith.sitofp %33 : vector<1x256xi32> to vector<1x256xf32>
    %35 = arith.mulf %22, %30 : vector<1x256xf32>
    %36 = arith.mulf %26, %30 : vector<1x256xf32>
    %37 = arith.mulf %22, %34 : vector<1x256xf32>
    %38 = arith.mulf %26, %34 : vector<1x256xf32>
    %c0_7 = arith.constant 0 : index
    %c0_8 = arith.constant 0 : index
    %c0_9 = arith.constant 0 : index
    %39 = vector.load %arg2[%c0_7, %c0_8, %c0_9] : memref<9x4x4xf32, #tpu.memory_space<vmem>>, vector<9x4x4xf32>
    %c0_10 = arith.constant 0 : index
    %c0_11 = arith.constant 0 : index
    %40 = vector.load %arg3[%c0_10, %c0_11] : memref<4x1xf32, #tpu.memory_space<vmem>>, vector<4x1xf32>
    %c0_12 = arith.constant 0 : index
    %c0_13 = arith.constant 0 : index
    %c0_14 = arith.constant 0 : index
    %41 = vector.load %arg4[%c0_12, %c0_13, %c0_14] : memref<9x4x4xf32, #tpu.memory_space<vmem>>, vector<9x4x4xf32>
    %c0_15 = arith.constant 0 : index
    %c0_16 = arith.constant 0 : index
    %42 = vector.load %arg5[%c0_15, %c0_16] : memref<4x1xf32, #tpu.memory_space<vmem>>, vector<4x1xf32>
    %c0_17 = arith.constant 0 : index
    %c0_18 = arith.constant 0 : index
    %c0_19 = arith.constant 0 : index
    %43 = vector.load %arg6[%c0_17, %c0_18, %c0_19] : memref<9x4x4xf32, #tpu.memory_space<vmem>>, vector<9x4x4xf32>
    %c0_20 = arith.constant 0 : index
    %c0_21 = arith.constant 0 : index
    %44 = vector.load %arg7[%c0_20, %c0_21] : memref<4x1xf32, #tpu.memory_space<vmem>>, vector<4x1xf32>
    %45 = vector.shape_cast %40 : vector<4x1xf32> to vector<4x1xf32>
    %46 = vector.broadcast %45 : vector<4x1xf32> to vector<4x256xf32>
    %47 = vector.extract_strided_slice %39 {offsets = [0, 0, 0], sizes = [1, 4, 4], strides = [1, 1, 1]} : vector<9x4x4xf32> to vector<1x4x4xf32>
    %48 = vector.shape_cast %47 : vector<1x4x4xf32> to vector<4x4xf32>
    %c17_i32 = arith.constant 17 : i32
    %49 = tpu.dynamic_rotate %1 by %c17_i32 dim 1 : vector<4x256xf32>, i32 -> vector<4x256xf32>
    %50 = vector.broadcast %35 : vector<1x256xf32> to vector<4x256xf32>
    %51 = arith.mulf %49, %50 : vector<4x256xf32>
    %cst = arith.constant dense<0.000000e+00> : vector<4x256xf32>
    %52 = tpu.matmul %48, %51, %cst {dimension_numbers = #tpu.dot_dimension_numbers<[1], [0], [0], [1], [0, 0, 1, 1], [], []>} : vector<4x4xf32>, vector<4x256xf32>, vector<4x256xf32> -> vector<4x256xf32>
    %53 = arith.addf %46, %52 : vector<4x256xf32>
    %54 = vector.extract_strided_slice %39 {offsets = [1, 0, 0], sizes = [1, 4, 4], strides = [1, 1, 1]} : vector<9x4x4xf32> to vector<1x4x4xf32>
    %55 = vector.shape_cast %54 : vector<1x4x4xf32> to vector<4x4xf32>
    %c16_i32_22 = arith.constant 16 : i32
    %56 = tpu.dynamic_rotate %1 by %c16_i32_22 dim 1 : vector<4x256xf32>, i32 -> vector<4x256xf32>
    %57 = vector.broadcast %30 : vector<1x256xf32> to vector<4x256xf32>
    %58 = arith.mulf %56, %57 : vector<4x256xf32>
    %cst_23 = arith.constant dense<0.000000e+00> : vector<4x256xf32>
    %59 = tpu.matmul %55, %58, %cst_23 {dimension_numbers = #tpu.dot_dimension_numbers<[1], [0], [0], [1], [0, 0, 1, 1], [], []>} : vector<4x4xf32>, vector<4x256xf32>, vector<4x256xf32> -> vector<4x256xf32>
    %60 = arith.addf %53, %59 : vector<4x256xf32>
    %61 = vector.extract_strided_slice %39 {offsets = [2, 0, 0], sizes = [1, 4, 4], strides = [1, 1, 1]} : vector<9x4x4xf32> to vector<1x4x4xf32>
    %62 = vector.shape_cast %61 : vector<1x4x4xf32> to vector<4x4xf32>
    %c15_i32 = arith.constant 15 : i32
    %63 = tpu.dynamic_rotate %1 by %c15_i32 dim 1 : vector<4x256xf32>, i32 -> vector<4x256xf32>
    %64 = vector.broadcast %36 : vector<1x256xf32> to vector<4x256xf32>
    %65 = arith.mulf %63, %64 : vector<4x256xf32>
    %cst_24 = arith.constant dense<0.000000e+00> : vector<4x256xf32>
    %66 = tpu.matmul %62, %65, %cst_24 {dimension_numbers = #tpu.dot_dimension_numbers<[1], [0], [0], [1], [0, 0, 1, 1], [], []>} : vector<4x4xf32>, vector<4x256xf32>, vector<4x256xf32> -> vector<4x256xf32>
    %67 = arith.addf %60, %66 : vector<4x256xf32>
    %68 = vector.extract_strided_slice %39 {offsets = [3, 0, 0], sizes = [1, 4, 4], strides = [1, 1, 1]} : vector<9x4x4xf32> to vector<1x4x4xf32>
    %69 = vector.shape_cast %68 : vector<1x4x4xf32> to vector<4x4xf32>
    %c1_i32_25 = arith.constant 1 : i32
    %70 = tpu.dynamic_rotate %1 by %c1_i32_25 dim 1 : vector<4x256xf32>, i32 -> vector<4x256xf32>
    %71 = vector.broadcast %22 : vector<1x256xf32> to vector<4x256xf32>
    %72 = arith.mulf %70, %71 : vector<4x256xf32>
    %cst_26 = arith.constant dense<0.000000e+00> : vector<4x256xf32>
    %73 = tpu.matmul %69, %72, %cst_26 {dimension_numbers = #tpu.dot_dimension_numbers<[1], [0], [0], [1], [0, 0, 1, 1], [], []>} : vector<4x4xf32>, vector<4x256xf32>, vector<4x256xf32> -> vector<4x256xf32>
    %74 = arith.addf %67, %73 : vector<4x256xf32>
    %75 = vector.extract_strided_slice %39 {offsets = [4, 0, 0], sizes = [1, 4, 4], strides = [1, 1, 1]} : vector<9x4x4xf32> to vector<1x4x4xf32>
    %76 = vector.shape_cast %75 : vector<1x4x4xf32> to vector<4x4xf32>
    %cst_27 = arith.constant dense<0.000000e+00> : vector<4x256xf32>
    %77 = tpu.matmul %76, %1, %cst_27 {dimension_numbers = #tpu.dot_dimension_numbers<[1], [0], [0], [1], [0, 0, 1, 1], [], []>} : vector<4x4xf32>, vector<4x256xf32>, vector<4x256xf32> -> vector<4x256xf32>
    %78 = arith.addf %74, %77 : vector<4x256xf32>
    %79 = vector.extract_strided_slice %39 {offsets = [5, 0, 0], sizes = [1, 4, 4], strides = [1, 1, 1]} : vector<9x4x4xf32> to vector<1x4x4xf32>
    %80 = vector.shape_cast %79 : vector<1x4x4xf32> to vector<4x4xf32>
    %c255_i32 = arith.constant 255 : i32
    %81 = tpu.dynamic_rotate %1 by %c255_i32 dim 1 : vector<4x256xf32>, i32 -> vector<4x256xf32>
    %82 = vector.broadcast %26 : vector<1x256xf32> to vector<4x256xf32>
    %83 = arith.mulf %81, %82 : vector<4x256xf32>
    %cst_28 = arith.constant dense<0.000000e+00> : vector<4x256xf32>
    %84 = tpu.matmul %80, %83, %cst_28 {dimension_numbers = #tpu.dot_dimension_numbers<[1], [0], [0], [1], [0, 0, 1, 1], [], []>} : vector<4x4xf32>, vector<4x256xf32>, vector<4x256xf32> -> vector<4x256xf32>
    %85 = arith.addf %78, %84 : vector<4x256xf32>
    %86 = vector.extract_strided_slice %39 {offsets = [6, 0, 0], sizes = [1, 4, 4], strides = [1, 1, 1]} : vector<9x4x4xf32> to vector<1x4x4xf32>
    %87 = vector.shape_cast %86 : vector<1x4x4xf32> to vector<4x4xf32>
    %c241_i32 = arith.constant 241 : i32
    %88 = tpu.dynamic_rotate %1 by %c241_i32 dim 1 : vector<4x256xf32>, i32 -> vector<4x256xf32>
    %89 = vector.broadcast %37 : vector<1x256xf32> to vector<4x256xf32>
    %90 = arith.mulf %88, %89 : vector<4x256xf32>
    %cst_29 = arith.constant dense<0.000000e+00> : vector<4x256xf32>
    %91 = tpu.matmul %87, %90, %cst_29 {dimension_numbers = #tpu.dot_dimension_numbers<[1], [0], [0], [1], [0, 0, 1, 1], [], []>} : vector<4x4xf32>, vector<4x256xf32>, vector<4x256xf32> -> vector<4x256xf32>
    %92 = arith.addf %85, %91 : vector<4x256xf32>
    %93 = vector.extract_strided_slice %39 {offsets = [7, 0, 0], sizes = [1, 4, 4], strides = [1, 1, 1]} : vector<9x4x4xf32> to vector<1x4x4xf32>
    %94 = vector.shape_cast %93 : vector<1x4x4xf32> to vector<4x4xf32>
    %c240_i32_30 = arith.constant 240 : i32
    %95 = tpu.dynamic_rotate %1 by %c240_i32_30 dim 1 : vector<4x256xf32>, i32 -> vector<4x256xf32>
    %96 = vector.broadcast %34 : vector<1x256xf32> to vector<4x256xf32>
    %97 = arith.mulf %95, %96 : vector<4x256xf32>
    %cst_31 = arith.constant dense<0.000000e+00> : vector<4x256xf32>
    %98 = tpu.matmul %94, %97, %cst_31 {dimension_numbers = #tpu.dot_dimension_numbers<[1], [0], [0], [1], [0, 0, 1, 1], [], []>} : vector<4x4xf32>, vector<4x256xf32>, vector<4x256xf32> -> vector<4x256xf32>
    %99 = arith.addf %92, %98 : vector<4x256xf32>
    %100 = vector.extract_strided_slice %39 {offsets = [8, 0, 0], sizes = [1, 4, 4], strides = [1, 1, 1]} : vector<9x4x4xf32> to vector<1x4x4xf32>
    %101 = vector.shape_cast %100 : vector<1x4x4xf32> to vector<4x4xf32>
    %c239_i32 = arith.constant 239 : i32
    %102 = tpu.dynamic_rotate %1 by %c239_i32 dim 1 : vector<4x256xf32>, i32 -> vector<4x256xf32>
    %103 = vector.broadcast %38 : vector<1x256xf32> to vector<4x256xf32>
    %104 = arith.mulf %102, %103 : vector<4x256xf32>
    %cst_32 = arith.constant dense<0.000000e+00> : vector<4x256xf32>
    %105 = tpu.matmul %101, %104, %cst_32 {dimension_numbers = #tpu.dot_dimension_numbers<[1], [0], [0], [1], [0, 0, 1, 1], [], []>} : vector<4x4xf32>, vector<4x256xf32>, vector<4x256xf32> -> vector<4x256xf32>
    %106 = arith.addf %99, %105 : vector<4x256xf32>
    %cst_33 = arith.constant 0.000000e+00 : f32
    %107 = vector.broadcast %cst_33 : f32 to vector<4x256xf32>
    %108 = arith.maximumf %106, %107 : vector<4x256xf32>
    %109 = vector.shape_cast %42 : vector<4x1xf32> to vector<4x1xf32>
    %110 = vector.broadcast %109 : vector<4x1xf32> to vector<4x256xf32>
    %111 = vector.extract_strided_slice %41 {offsets = [0, 0, 0], sizes = [1, 4, 4], strides = [1, 1, 1]} : vector<9x4x4xf32> to vector<1x4x4xf32>
    %112 = vector.shape_cast %111 : vector<1x4x4xf32> to vector<4x4xf32>
    %c17_i32_34 = arith.constant 17 : i32
    %113 = tpu.dynamic_rotate %108 by %c17_i32_34 dim 1 : vector<4x256xf32>, i32 -> vector<4x256xf32>
    %114 = vector.broadcast %35 : vector<1x256xf32> to vector<4x256xf32>
    %115 = arith.mulf %113, %114 : vector<4x256xf32>
    %cst_35 = arith.constant dense<0.000000e+00> : vector<4x256xf32>
    %116 = tpu.matmul %112, %115, %cst_35 {dimension_numbers = #tpu.dot_dimension_numbers<[1], [0], [0], [1], [0, 0, 1, 1], [], []>} : vector<4x4xf32>, vector<4x256xf32>, vector<4x256xf32> -> vector<4x256xf32>
    %117 = arith.addf %110, %116 : vector<4x256xf32>
    %118 = vector.extract_strided_slice %41 {offsets = [1, 0, 0], sizes = [1, 4, 4], strides = [1, 1, 1]} : vector<9x4x4xf32> to vector<1x4x4xf32>
    %119 = vector.shape_cast %118 : vector<1x4x4xf32> to vector<4x4xf32>
    %c16_i32_36 = arith.constant 16 : i32
    %120 = tpu.dynamic_rotate %108 by %c16_i32_36 dim 1 : vector<4x256xf32>, i32 -> vector<4x256xf32>
    %121 = vector.broadcast %30 : vector<1x256xf32> to vector<4x256xf32>
    %122 = arith.mulf %120, %121 : vector<4x256xf32>
    %cst_37 = arith.constant dense<0.000000e+00> : vector<4x256xf32>
    %123 = tpu.matmul %119, %122, %cst_37 {dimension_numbers = #tpu.dot_dimension_numbers<[1], [0], [0], [1], [0, 0, 1, 1], [], []>} : vector<4x4xf32>, vector<4x256xf32>, vector<4x256xf32> -> vector<4x256xf32>
    %124 = arith.addf %117, %123 : vector<4x256xf32>
    %125 = vector.extract_strided_slice %41 {offsets = [2, 0, 0], sizes = [1, 4, 4], strides = [1, 1, 1]} : vector<9x4x4xf32> to vector<1x4x4xf32>
    %126 = vector.shape_cast %125 : vector<1x4x4xf32> to vector<4x4xf32>
    %c15_i32_38 = arith.constant 15 : i32
    %127 = tpu.dynamic_rotate %108 by %c15_i32_38 dim 1 : vector<4x256xf32>, i32 -> vector<4x256xf32>
    %128 = vector.broadcast %36 : vector<1x256xf32> to vector<4x256xf32>
    %129 = arith.mulf %127, %128 : vector<4x256xf32>
    %cst_39 = arith.constant dense<0.000000e+00> : vector<4x256xf32>
    %130 = tpu.matmul %126, %129, %cst_39 {dimension_numbers = #tpu.dot_dimension_numbers<[1], [0], [0], [1], [0, 0, 1, 1], [], []>} : vector<4x4xf32>, vector<4x256xf32>, vector<4x256xf32> -> vector<4x256xf32>
    %131 = arith.addf %124, %130 : vector<4x256xf32>
    %132 = vector.extract_strided_slice %41 {offsets = [3, 0, 0], sizes = [1, 4, 4], strides = [1, 1, 1]} : vector<9x4x4xf32> to vector<1x4x4xf32>
    %133 = vector.shape_cast %132 : vector<1x4x4xf32> to vector<4x4xf32>
    %c1_i32_40 = arith.constant 1 : i32
    %134 = tpu.dynamic_rotate %108 by %c1_i32_40 dim 1 : vector<4x256xf32>, i32 -> vector<4x256xf32>
    %135 = vector.broadcast %22 : vector<1x256xf32> to vector<4x256xf32>
    %136 = arith.mulf %134, %135 : vector<4x256xf32>
    %cst_41 = arith.constant dense<0.000000e+00> : vector<4x256xf32>
    %137 = tpu.matmul %133, %136, %cst_41 {dimension_numbers = #tpu.dot_dimension_numbers<[1], [0], [0], [1], [0, 0, 1, 1], [], []>} : vector<4x4xf32>, vector<4x256xf32>, vector<4x256xf32> -> vector<4x256xf32>
    %138 = arith.addf %131, %137 : vector<4x256xf32>
    %139 = vector.extract_strided_slice %41 {offsets = [4, 0, 0], sizes = [1, 4, 4], strides = [1, 1, 1]} : vector<9x4x4xf32> to vector<1x4x4xf32>
    %140 = vector.shape_cast %139 : vector<1x4x4xf32> to vector<4x4xf32>
    %cst_42 = arith.constant dense<0.000000e+00> : vector<4x256xf32>
    %141 = tpu.matmul %140, %108, %cst_42 {dimension_numbers = #tpu.dot_dimension_numbers<[1], [0], [0], [1], [0, 0, 1, 1], [], []>} : vector<4x4xf32>, vector<4x256xf32>, vector<4x256xf32> -> vector<4x256xf32>
    %142 = arith.addf %138, %141 : vector<4x256xf32>
    %143 = vector.extract_strided_slice %41 {offsets = [5, 0, 0], sizes = [1, 4, 4], strides = [1, 1, 1]} : vector<9x4x4xf32> to vector<1x4x4xf32>
    %144 = vector.shape_cast %143 : vector<1x4x4xf32> to vector<4x4xf32>
    %c255_i32_43 = arith.constant 255 : i32
    %145 = tpu.dynamic_rotate %108 by %c255_i32_43 dim 1 : vector<4x256xf32>, i32 -> vector<4x256xf32>
    %146 = vector.broadcast %26 : vector<1x256xf32> to vector<4x256xf32>
    %147 = arith.mulf %145, %146 : vector<4x256xf32>
    %cst_44 = arith.constant dense<0.000000e+00> : vector<4x256xf32>
    %148 = tpu.matmul %144, %147, %cst_44 {dimension_numbers = #tpu.dot_dimension_numbers<[1], [0], [0], [1], [0, 0, 1, 1], [], []>} : vector<4x4xf32>, vector<4x256xf32>, vector<4x256xf32> -> vector<4x256xf32>
    %149 = arith.addf %142, %148 : vector<4x256xf32>
    %150 = vector.extract_strided_slice %41 {offsets = [6, 0, 0], sizes = [1, 4, 4], strides = [1, 1, 1]} : vector<9x4x4xf32> to vector<1x4x4xf32>
    %151 = vector.shape_cast %150 : vector<1x4x4xf32> to vector<4x4xf32>
    %c241_i32_45 = arith.constant 241 : i32
    %152 = tpu.dynamic_rotate %108 by %c241_i32_45 dim 1 : vector<4x256xf32>, i32 -> vector<4x256xf32>
    %153 = vector.broadcast %37 : vector<1x256xf32> to vector<4x256xf32>
    %154 = arith.mulf %152, %153 : vector<4x256xf32>
    %cst_46 = arith.constant dense<0.000000e+00> : vector<4x256xf32>
    %155 = tpu.matmul %151, %154, %cst_46 {dimension_numbers = #tpu.dot_dimension_numbers<[1], [0], [0], [1], [0, 0, 1, 1], [], []>} : vector<4x4xf32>, vector<4x256xf32>, vector<4x256xf32> -> vector<4x256xf32>
    %156 = arith.addf %149, %155 : vector<4x256xf32>
    %157 = vector.extract_strided_slice %41 {offsets = [7, 0, 0], sizes = [1, 4, 4], strides = [1, 1, 1]} : vector<9x4x4xf32> to vector<1x4x4xf32>
    %158 = vector.shape_cast %157 : vector<1x4x4xf32> to vector<4x4xf32>
    %c240_i32_47 = arith.constant 240 : i32
    %159 = tpu.dynamic_rotate %108 by %c240_i32_47 dim 1 : vector<4x256xf32>, i32 -> vector<4x256xf32>
    %160 = vector.broadcast %34 : vector<1x256xf32> to vector<4x256xf32>
    %161 = arith.mulf %159, %160 : vector<4x256xf32>
    %cst_48 = arith.constant dense<0.000000e+00> : vector<4x256xf32>
    %162 = tpu.matmul %158, %161, %cst_48 {dimension_numbers = #tpu.dot_dimension_numbers<[1], [0], [0], [1], [0, 0, 1, 1], [], []>} : vector<4x4xf32>, vector<4x256xf32>, vector<4x256xf32> -> vector<4x256xf32>
    %163 = arith.addf %156, %162 : vector<4x256xf32>
    %164 = vector.extract_strided_slice %41 {offsets = [8, 0, 0], sizes = [1, 4, 4], strides = [1, 1, 1]} : vector<9x4x4xf32> to vector<1x4x4xf32>
    %165 = vector.shape_cast %164 : vector<1x4x4xf32> to vector<4x4xf32>
    %c239_i32_49 = arith.constant 239 : i32
    %166 = tpu.dynamic_rotate %108 by %c239_i32_49 dim 1 : vector<4x256xf32>, i32 -> vector<4x256xf32>
    %167 = vector.broadcast %38 : vector<1x256xf32> to vector<4x256xf32>
    %168 = arith.mulf %166, %167 : vector<4x256xf32>
    %cst_50 = arith.constant dense<0.000000e+00> : vector<4x256xf32>
    %169 = tpu.matmul %165, %168, %cst_50 {dimension_numbers = #tpu.dot_dimension_numbers<[1], [0], [0], [1], [0, 0, 1, 1], [], []>} : vector<4x4xf32>, vector<4x256xf32>, vector<4x256xf32> -> vector<4x256xf32>
    %170 = arith.addf %163, %169 : vector<4x256xf32>
    %171 = arith.addf %170, %1 : vector<4x256xf32>
    %cst_51 = arith.constant 0.000000e+00 : f32
    %172 = vector.broadcast %cst_51 : f32 to vector<4x256xf32>
    %173 = arith.maximumf %171, %172 : vector<4x256xf32>
    %174 = vector.shape_cast %44 : vector<4x1xf32> to vector<4x1xf32>
    %175 = vector.broadcast %174 : vector<4x1xf32> to vector<4x256xf32>
    %176 = vector.extract_strided_slice %43 {offsets = [0, 0, 0], sizes = [1, 4, 4], strides = [1, 1, 1]} : vector<9x4x4xf32> to vector<1x4x4xf32>
    %177 = vector.shape_cast %176 : vector<1x4x4xf32> to vector<4x4xf32>
    %c17_i32_52 = arith.constant 17 : i32
    %178 = tpu.dynamic_rotate %173 by %c17_i32_52 dim 1 : vector<4x256xf32>, i32 -> vector<4x256xf32>
    %179 = vector.broadcast %35 : vector<1x256xf32> to vector<4x256xf32>
    %180 = arith.mulf %178, %179 : vector<4x256xf32>
    %cst_53 = arith.constant dense<0.000000e+00> : vector<4x256xf32>
    %181 = tpu.matmul %177, %180, %cst_53 {dimension_numbers = #tpu.dot_dimension_numbers<[1], [0], [0], [1], [0, 0, 1, 1], [], []>} : vector<4x4xf32>, vector<4x256xf32>, vector<4x256xf32> -> vector<4x256xf32>
    %182 = arith.addf %175, %181 : vector<4x256xf32>
    %183 = vector.extract_strided_slice %43 {offsets = [1, 0, 0], sizes = [1, 4, 4], strides = [1, 1, 1]} : vector<9x4x4xf32> to vector<1x4x4xf32>
    %184 = vector.shape_cast %183 : vector<1x4x4xf32> to vector<4x4xf32>
    %c16_i32_54 = arith.constant 16 : i32
    %185 = tpu.dynamic_rotate %173 by %c16_i32_54 dim 1 : vector<4x256xf32>, i32 -> vector<4x256xf32>
    %186 = vector.broadcast %30 : vector<1x256xf32> to vector<4x256xf32>
    %187 = arith.mulf %185, %186 : vector<4x256xf32>
    %cst_55 = arith.constant dense<0.000000e+00> : vector<4x256xf32>
    %188 = tpu.matmul %184, %187, %cst_55 {dimension_numbers = #tpu.dot_dimension_numbers<[1], [0], [0], [1], [0, 0, 1, 1], [], []>} : vector<4x4xf32>, vector<4x256xf32>, vector<4x256xf32> -> vector<4x256xf32>
    %189 = arith.addf %182, %188 : vector<4x256xf32>
    %190 = vector.extract_strided_slice %43 {offsets = [2, 0, 0], sizes = [1, 4, 4], strides = [1, 1, 1]} : vector<9x4x4xf32> to vector<1x4x4xf32>
    %191 = vector.shape_cast %190 : vector<1x4x4xf32> to vector<4x4xf32>
    %c15_i32_56 = arith.constant 15 : i32
    %192 = tpu.dynamic_rotate %173 by %c15_i32_56 dim 1 : vector<4x256xf32>, i32 -> vector<4x256xf32>
    %193 = vector.broadcast %36 : vector<1x256xf32> to vector<4x256xf32>
    %194 = arith.mulf %192, %193 : vector<4x256xf32>
    %cst_57 = arith.constant dense<0.000000e+00> : vector<4x256xf32>
    %195 = tpu.matmul %191, %194, %cst_57 {dimension_numbers = #tpu.dot_dimension_numbers<[1], [0], [0], [1], [0, 0, 1, 1], [], []>} : vector<4x4xf32>, vector<4x256xf32>, vector<4x256xf32> -> vector<4x256xf32>
    %196 = arith.addf %189, %195 : vector<4x256xf32>
    %197 = vector.extract_strided_slice %43 {offsets = [3, 0, 0], sizes = [1, 4, 4], strides = [1, 1, 1]} : vector<9x4x4xf32> to vector<1x4x4xf32>
    %198 = vector.shape_cast %197 : vector<1x4x4xf32> to vector<4x4xf32>
    %c1_i32_58 = arith.constant 1 : i32
    %199 = tpu.dynamic_rotate %173 by %c1_i32_58 dim 1 : vector<4x256xf32>, i32 -> vector<4x256xf32>
    %200 = vector.broadcast %22 : vector<1x256xf32> to vector<4x256xf32>
    %201 = arith.mulf %199, %200 : vector<4x256xf32>
    %cst_59 = arith.constant dense<0.000000e+00> : vector<4x256xf32>
    %202 = tpu.matmul %198, %201, %cst_59 {dimension_numbers = #tpu.dot_dimension_numbers<[1], [0], [0], [1], [0, 0, 1, 1], [], []>} : vector<4x4xf32>, vector<4x256xf32>, vector<4x256xf32> -> vector<4x256xf32>
    %203 = arith.addf %196, %202 : vector<4x256xf32>
    %204 = vector.extract_strided_slice %43 {offsets = [4, 0, 0], sizes = [1, 4, 4], strides = [1, 1, 1]} : vector<9x4x4xf32> to vector<1x4x4xf32>
    %205 = vector.shape_cast %204 : vector<1x4x4xf32> to vector<4x4xf32>
    %cst_60 = arith.constant dense<0.000000e+00> : vector<4x256xf32>
    %206 = tpu.matmul %205, %173, %cst_60 {dimension_numbers = #tpu.dot_dimension_numbers<[1], [0], [0], [1], [0, 0, 1, 1], [], []>} : vector<4x4xf32>, vector<4x256xf32>, vector<4x256xf32> -> vector<4x256xf32>
    %207 = arith.addf %203, %206 : vector<4x256xf32>
    %208 = vector.extract_strided_slice %43 {offsets = [5, 0, 0], sizes = [1, 4, 4], strides = [1, 1, 1]} : vector<9x4x4xf32> to vector<1x4x4xf32>
    %209 = vector.shape_cast %208 : vector<1x4x4xf32> to vector<4x4xf32>
    %c255_i32_61 = arith.constant 255 : i32
    %210 = tpu.dynamic_rotate %173 by %c255_i32_61 dim 1 : vector<4x256xf32>, i32 -> vector<4x256xf32>
    %211 = vector.broadcast %26 : vector<1x256xf32> to vector<4x256xf32>
    %212 = arith.mulf %210, %211 : vector<4x256xf32>
    %cst_62 = arith.constant dense<0.000000e+00> : vector<4x256xf32>
    %213 = tpu.matmul %209, %212, %cst_62 {dimension_numbers = #tpu.dot_dimension_numbers<[1], [0], [0], [1], [0, 0, 1, 1], [], []>} : vector<4x4xf32>, vector<4x256xf32>, vector<4x256xf32> -> vector<4x256xf32>
    %214 = arith.addf %207, %213 : vector<4x256xf32>
    %215 = vector.extract_strided_slice %43 {offsets = [6, 0, 0], sizes = [1, 4, 4], strides = [1, 1, 1]} : vector<9x4x4xf32> to vector<1x4x4xf32>
    %216 = vector.shape_cast %215 : vector<1x4x4xf32> to vector<4x4xf32>
    %c241_i32_63 = arith.constant 241 : i32
    %217 = tpu.dynamic_rotate %173 by %c241_i32_63 dim 1 : vector<4x256xf32>, i32 -> vector<4x256xf32>
    %218 = vector.broadcast %37 : vector<1x256xf32> to vector<4x256xf32>
    %219 = arith.mulf %217, %218 : vector<4x256xf32>
    %cst_64 = arith.constant dense<0.000000e+00> : vector<4x256xf32>
    %220 = tpu.matmul %216, %219, %cst_64 {dimension_numbers = #tpu.dot_dimension_numbers<[1], [0], [0], [1], [0, 0, 1, 1], [], []>} : vector<4x4xf32>, vector<4x256xf32>, vector<4x256xf32> -> vector<4x256xf32>
    %221 = arith.addf %214, %220 : vector<4x256xf32>
    %222 = vector.extract_strided_slice %43 {offsets = [7, 0, 0], sizes = [1, 4, 4], strides = [1, 1, 1]} : vector<9x4x4xf32> to vector<1x4x4xf32>
    %223 = vector.shape_cast %222 : vector<1x4x4xf32> to vector<4x4xf32>
    %c240_i32_65 = arith.constant 240 : i32
    %224 = tpu.dynamic_rotate %173 by %c240_i32_65 dim 1 : vector<4x256xf32>, i32 -> vector<4x256xf32>
    %225 = vector.broadcast %34 : vector<1x256xf32> to vector<4x256xf32>
    %226 = arith.mulf %224, %225 : vector<4x256xf32>
    %cst_66 = arith.constant dense<0.000000e+00> : vector<4x256xf32>
    %227 = tpu.matmul %223, %226, %cst_66 {dimension_numbers = #tpu.dot_dimension_numbers<[1], [0], [0], [1], [0, 0, 1, 1], [], []>} : vector<4x4xf32>, vector<4x256xf32>, vector<4x256xf32> -> vector<4x256xf32>
    %228 = arith.addf %221, %227 : vector<4x256xf32>
    %229 = vector.extract_strided_slice %43 {offsets = [8, 0, 0], sizes = [1, 4, 4], strides = [1, 1, 1]} : vector<9x4x4xf32> to vector<1x4x4xf32>
    %230 = vector.shape_cast %229 : vector<1x4x4xf32> to vector<4x4xf32>
    %c239_i32_67 = arith.constant 239 : i32
    %231 = tpu.dynamic_rotate %173 by %c239_i32_67 dim 1 : vector<4x256xf32>, i32 -> vector<4x256xf32>
    %232 = vector.broadcast %38 : vector<1x256xf32> to vector<4x256xf32>
    %233 = arith.mulf %231, %232 : vector<4x256xf32>
    %cst_68 = arith.constant dense<0.000000e+00> : vector<4x256xf32>
    %234 = tpu.matmul %230, %233, %cst_68 {dimension_numbers = #tpu.dot_dimension_numbers<[1], [0], [0], [1], [0, 0, 1, 1], [], []>} : vector<4x4xf32>, vector<4x256xf32>, vector<4x256xf32> -> vector<4x256xf32>
    %235 = arith.addf %228, %234 : vector<4x256xf32>
    %cst_69 = arith.constant 0.000000e+00 : f32
    %236 = vector.broadcast %cst_69 : f32 to vector<4x256xf32>
    %237 = arith.maximumf %235, %236 : vector<4x256xf32>
    %c0_70 = arith.constant 0 : index
    %c0_71 = arith.constant 0 : index
    %238 = vector.load %arg8[%c0_70, %c0_71] : memref<16x4xf32, #tpu.memory_space<vmem>>, vector<16x4xf32>
    %cst_72 = arith.constant dense<0.000000e+00> : vector<16x256xf32>
    %239 = tpu.matmul %238, %237, %cst_72 {dimension_numbers = #tpu.dot_dimension_numbers<[1], [0], [0], [1], [0, 0, 1, 1], [], []>} : vector<16x4xf32>, vector<4x256xf32>, vector<16x256xf32> -> vector<16x256xf32>
    %c0_73 = arith.constant 0 : index
    %c0_74 = arith.constant 0 : index
    %240 = vector.load %arg9[%c0_73, %c0_74] : memref<16x1xf32, #tpu.memory_space<vmem>>, vector<16x1xf32>
    %241 = vector.broadcast %240 : vector<16x1xf32> to vector<16x256xf32>
    %242 = arith.addf %239, %241 : vector<16x256xf32>
    %c0_75 = arith.constant 0 : index
    %c0_76 = arith.constant 0 : index
    %c0_77 = arith.constant 0 : index
    %243 = vector.load %arg10[%c0_75, %c0_76, %c0_77] : memref<9x32x16xf32, #tpu.memory_space<vmem>>, vector<9x32x16xf32>
    %c0_78 = arith.constant 0 : index
    %c0_79 = arith.constant 0 : index
    %244 = vector.load %arg11[%c0_78, %c0_79] : memref<32x1xf32, #tpu.memory_space<vmem>>, vector<32x1xf32>
    %245 = vector.shape_cast %244 : vector<32x1xf32> to vector<32x1xf32>
    %246 = vector.broadcast %245 : vector<32x1xf32> to vector<32x256xf32>
    %247 = vector.extract_strided_slice %243 {offsets = [0, 0, 0], sizes = [1, 32, 16], strides = [1, 1, 1]} : vector<9x32x16xf32> to vector<1x32x16xf32>
    %248 = vector.shape_cast %247 : vector<1x32x16xf32> to vector<32x16xf32>
    %c17_i32_80 = arith.constant 17 : i32
    %249 = tpu.dynamic_rotate %242 by %c17_i32_80 dim 1 : vector<16x256xf32>, i32 -> vector<16x256xf32>
    %250 = vector.broadcast %35 : vector<1x256xf32> to vector<16x256xf32>
    %251 = arith.mulf %249, %250 : vector<16x256xf32>
    %cst_81 = arith.constant dense<0.000000e+00> : vector<32x256xf32>
    %252 = tpu.matmul %248, %251, %cst_81 {dimension_numbers = #tpu.dot_dimension_numbers<[1], [0], [0], [1], [0, 0, 1, 1], [], []>} : vector<32x16xf32>, vector<16x256xf32>, vector<32x256xf32> -> vector<32x256xf32>
    %253 = arith.addf %246, %252 : vector<32x256xf32>
    %254 = vector.extract_strided_slice %243 {offsets = [1, 0, 0], sizes = [1, 32, 16], strides = [1, 1, 1]} : vector<9x32x16xf32> to vector<1x32x16xf32>
    %255 = vector.shape_cast %254 : vector<1x32x16xf32> to vector<32x16xf32>
    %c16_i32_82 = arith.constant 16 : i32
    %256 = tpu.dynamic_rotate %242 by %c16_i32_82 dim 1 : vector<16x256xf32>, i32 -> vector<16x256xf32>
    %257 = vector.broadcast %30 : vector<1x256xf32> to vector<16x256xf32>
    %258 = arith.mulf %256, %257 : vector<16x256xf32>
    %cst_83 = arith.constant dense<0.000000e+00> : vector<32x256xf32>
    %259 = tpu.matmul %255, %258, %cst_83 {dimension_numbers = #tpu.dot_dimension_numbers<[1], [0], [0], [1], [0, 0, 1, 1], [], []>} : vector<32x16xf32>, vector<16x256xf32>, vector<32x256xf32> -> vector<32x256xf32>
    %260 = arith.addf %253, %259 : vector<32x256xf32>
    %261 = vector.extract_strided_slice %243 {offsets = [2, 0, 0], sizes = [1, 32, 16], strides = [1, 1, 1]} : vector<9x32x16xf32> to vector<1x32x16xf32>
    %262 = vector.shape_cast %261 : vector<1x32x16xf32> to vector<32x16xf32>
    %c15_i32_84 = arith.constant 15 : i32
    %263 = tpu.dynamic_rotate %242 by %c15_i32_84 dim 1 : vector<16x256xf32>, i32 -> vector<16x256xf32>
    %264 = vector.broadcast %36 : vector<1x256xf32> to vector<16x256xf32>
    %265 = arith.mulf %263, %264 : vector<16x256xf32>
    %cst_85 = arith.constant dense<0.000000e+00> : vector<32x256xf32>
    %266 = tpu.matmul %262, %265, %cst_85 {dimension_numbers = #tpu.dot_dimension_numbers<[1], [0], [0], [1], [0, 0, 1, 1], [], []>} : vector<32x16xf32>, vector<16x256xf32>, vector<32x256xf32> -> vector<32x256xf32>
    %267 = arith.addf %260, %266 : vector<32x256xf32>
    %268 = vector.extract_strided_slice %243 {offsets = [3, 0, 0], sizes = [1, 32, 16], strides = [1, 1, 1]} : vector<9x32x16xf32> to vector<1x32x16xf32>
    %269 = vector.shape_cast %268 : vector<1x32x16xf32> to vector<32x16xf32>
    %c1_i32_86 = arith.constant 1 : i32
    %270 = tpu.dynamic_rotate %242 by %c1_i32_86 dim 1 : vector<16x256xf32>, i32 -> vector<16x256xf32>
    %271 = vector.broadcast %22 : vector<1x256xf32> to vector<16x256xf32>
    %272 = arith.mulf %270, %271 : vector<16x256xf32>
    %cst_87 = arith.constant dense<0.000000e+00> : vector<32x256xf32>
    %273 = tpu.matmul %269, %272, %cst_87 {dimension_numbers = #tpu.dot_dimension_numbers<[1], [0], [0], [1], [0, 0, 1, 1], [], []>} : vector<32x16xf32>, vector<16x256xf32>, vector<32x256xf32> -> vector<32x256xf32>
    %274 = arith.addf %267, %273 : vector<32x256xf32>
    %275 = vector.extract_strided_slice %243 {offsets = [4, 0, 0], sizes = [1, 32, 16], strides = [1, 1, 1]} : vector<9x32x16xf32> to vector<1x32x16xf32>
    %276 = vector.shape_cast %275 : vector<1x32x16xf32> to vector<32x16xf32>
    %cst_88 = arith.constant dense<0.000000e+00> : vector<32x256xf32>
    %277 = tpu.matmul %276, %242, %cst_88 {dimension_numbers = #tpu.dot_dimension_numbers<[1], [0], [0], [1], [0, 0, 1, 1], [], []>} : vector<32x16xf32>, vector<16x256xf32>, vector<32x256xf32> -> vector<32x256xf32>
    %278 = arith.addf %274, %277 : vector<32x256xf32>
    %279 = vector.extract_strided_slice %243 {offsets = [5, 0, 0], sizes = [1, 32, 16], strides = [1, 1, 1]} : vector<9x32x16xf32> to vector<1x32x16xf32>
    %280 = vector.shape_cast %279 : vector<1x32x16xf32> to vector<32x16xf32>
    %c255_i32_89 = arith.constant 255 : i32
    %281 = tpu.dynamic_rotate %242 by %c255_i32_89 dim 1 : vector<16x256xf32>, i32 -> vector<16x256xf32>
    %282 = vector.broadcast %26 : vector<1x256xf32> to vector<16x256xf32>
    %283 = arith.mulf %281, %282 : vector<16x256xf32>
    %cst_90 = arith.constant dense<0.000000e+00> : vector<32x256xf32>
    %284 = tpu.matmul %280, %283, %cst_90 {dimension_numbers = #tpu.dot_dimension_numbers<[1], [0], [0], [1], [0, 0, 1, 1], [], []>} : vector<32x16xf32>, vector<16x256xf32>, vector<32x256xf32> -> vector<32x256xf32>
    %285 = arith.addf %278, %284 : vector<32x256xf32>
    %286 = vector.extract_strided_slice %243 {offsets = [6, 0, 0], sizes = [1, 32, 16], strides = [1, 1, 1]} : vector<9x32x16xf32> to vector<1x32x16xf32>
    %287 = vector.shape_cast %286 : vector<1x32x16xf32> to vector<32x16xf32>
    %c241_i32_91 = arith.constant 241 : i32
    %288 = tpu.dynamic_rotate %242 by %c241_i32_91 dim 1 : vector<16x256xf32>, i32 -> vector<16x256xf32>
    %289 = vector.broadcast %37 : vector<1x256xf32> to vector<16x256xf32>
    %290 = arith.mulf %288, %289 : vector<16x256xf32>
    %cst_92 = arith.constant dense<0.000000e+00> : vector<32x256xf32>
    %291 = tpu.matmul %287, %290, %cst_92 {dimension_numbers = #tpu.dot_dimension_numbers<[1], [0], [0], [1], [0, 0, 1, 1], [], []>} : vector<32x16xf32>, vector<16x256xf32>, vector<32x256xf32> -> vector<32x256xf32>
    %292 = arith.addf %285, %291 : vector<32x256xf32>
    %293 = vector.extract_strided_slice %243 {offsets = [7, 0, 0], sizes = [1, 32, 16], strides = [1, 1, 1]} : vector<9x32x16xf32> to vector<1x32x16xf32>
    %294 = vector.shape_cast %293 : vector<1x32x16xf32> to vector<32x16xf32>
    %c240_i32_93 = arith.constant 240 : i32
    %295 = tpu.dynamic_rotate %242 by %c240_i32_93 dim 1 : vector<16x256xf32>, i32 -> vector<16x256xf32>
    %296 = vector.broadcast %34 : vector<1x256xf32> to vector<16x256xf32>
    %297 = arith.mulf %295, %296 : vector<16x256xf32>
    %cst_94 = arith.constant dense<0.000000e+00> : vector<32x256xf32>
    %298 = tpu.matmul %294, %297, %cst_94 {dimension_numbers = #tpu.dot_dimension_numbers<[1], [0], [0], [1], [0, 0, 1, 1], [], []>} : vector<32x16xf32>, vector<16x256xf32>, vector<32x256xf32> -> vector<32x256xf32>
    %299 = arith.addf %292, %298 : vector<32x256xf32>
    %300 = vector.extract_strided_slice %243 {offsets = [8, 0, 0], sizes = [1, 32, 16], strides = [1, 1, 1]} : vector<9x32x16xf32> to vector<1x32x16xf32>
    %301 = vector.shape_cast %300 : vector<1x32x16xf32> to vector<32x16xf32>
    %c239_i32_95 = arith.constant 239 : i32
    %302 = tpu.dynamic_rotate %242 by %c239_i32_95 dim 1 : vector<16x256xf32>, i32 -> vector<16x256xf32>
    %303 = vector.broadcast %38 : vector<1x256xf32> to vector<16x256xf32>
    %304 = arith.mulf %302, %303 : vector<16x256xf32>
    %cst_96 = arith.constant dense<0.000000e+00> : vector<32x256xf32>
    %305 = tpu.matmul %301, %304, %cst_96 {dimension_numbers = #tpu.dot_dimension_numbers<[1], [0], [0], [1], [0, 0, 1, 1], [], []>} : vector<32x16xf32>, vector<16x256xf32>, vector<32x256xf32> -> vector<32x256xf32>
    %306 = arith.addf %299, %305 : vector<32x256xf32>
    %c0_97 = arith.constant 0 : index
    %c0_98 = arith.constant 0 : index
    %307 = vector.load %arg12[%c0_97, %c0_98] : memref<256x1024xf32, #tpu.memory_space<vmem>>, vector<256x1024xf32>
    %308 = vector.extract_strided_slice %306 {offsets = [0, 0], sizes = [8, 256], strides = [1, 1]} : vector<32x256xf32> to vector<8x256xf32>
    %cst_99 = arith.constant dense<0.000000e+00> : vector<8x1024xf32>
    %309 = tpu.matmul %308, %307, %cst_99 {dimension_numbers = #tpu.dot_dimension_numbers<[1], [0], [0], [1], [0, 0, 1, 1], [], []>} : vector<8x256xf32>, vector<256x1024xf32>, vector<8x1024xf32> -> vector<8x1024xf32>
    %310 = vector.extract_strided_slice %306 {offsets = [8, 0], sizes = [8, 256], strides = [1, 1]} : vector<32x256xf32> to vector<8x256xf32>
    %cst_100 = arith.constant dense<0.000000e+00> : vector<8x1024xf32>
    %311 = tpu.matmul %310, %307, %cst_100 {dimension_numbers = #tpu.dot_dimension_numbers<[1], [0], [0], [1], [0, 0, 1, 1], [], []>} : vector<8x256xf32>, vector<256x1024xf32>, vector<8x1024xf32> -> vector<8x1024xf32>
    %c1_i32_101 = arith.constant 1 : i32
    %312 = tpu.dynamic_rotate %311 by %c1_i32_101 dim 1 : vector<8x1024xf32>, i32 -> vector<8x1024xf32>
    %313 = arith.addf %309, %312 : vector<8x1024xf32>
    %314 = vector.extract_strided_slice %306 {offsets = [16, 0], sizes = [8, 256], strides = [1, 1]} : vector<32x256xf32> to vector<8x256xf32>
    %cst_102 = arith.constant dense<0.000000e+00> : vector<8x1024xf32>
    %315 = tpu.matmul %314, %307, %cst_102 {dimension_numbers = #tpu.dot_dimension_numbers<[1], [0], [0], [1], [0, 0, 1, 1], [], []>} : vector<8x256xf32>, vector<256x1024xf32>, vector<8x1024xf32> -> vector<8x1024xf32>
    %c32_i32 = arith.constant 32 : i32
    %316 = tpu.dynamic_rotate %315 by %c32_i32 dim 1 : vector<8x1024xf32>, i32 -> vector<8x1024xf32>
    %317 = arith.addf %313, %316 : vector<8x1024xf32>
    %318 = vector.extract_strided_slice %306 {offsets = [24, 0], sizes = [8, 256], strides = [1, 1]} : vector<32x256xf32> to vector<8x256xf32>
    %cst_103 = arith.constant dense<0.000000e+00> : vector<8x1024xf32>
    %319 = tpu.matmul %318, %307, %cst_103 {dimension_numbers = #tpu.dot_dimension_numbers<[1], [0], [0], [1], [0, 0, 1, 1], [], []>} : vector<8x256xf32>, vector<256x1024xf32>, vector<8x1024xf32> -> vector<8x1024xf32>
    %c33_i32 = arith.constant 33 : i32
    %320 = tpu.dynamic_rotate %319 by %c33_i32 dim 1 : vector<8x1024xf32>, i32 -> vector<8x1024xf32>
    %321 = arith.addf %317, %320 : vector<8x1024xf32>
    %c0_104 = arith.constant 0 : index
    %c0_105 = arith.constant 0 : index
    %c0_106 = arith.constant 0 : index
    %322 = vector.load %arg13[%c0_104, %c0_105, %c0_106] : memref<1x8x1024xf32, #tpu.memory_space<vmem>>, vector<1x8x1024xf32>
    %323 = vector.shape_cast %322 : vector<1x8x1024xf32> to vector<8x1024xf32>
    %324 = vector.shape_cast %321 : vector<8x1024xf32> to vector<1x8x1024xf32>
    tpu.vector_store %arg13[%c0_104, %c0_105, %c0_106], %324 {strides = array<i32>} : memref<1x8x1024xf32, #tpu.memory_space<vmem>>, vector<1x8x1024xf32>,
    return
  }
  func.func @transform_0(%arg0: i32) -> (i32, i32, i32) {
    %c0_i32 = arith.constant 0 : i32
    %c0_i32_0 = arith.constant 0 : i32
    %c0_i32_1 = arith.constant 0 : i32
    return %arg0, %c0_i32, %c0_i32_0 : i32, i32, i32
  }
  func.func @transform_1(%arg0: i32) -> (i32, i32, i32) {
    %c0_i32 = arith.constant 0 : i32
    %c0_i32_0 = arith.constant 0 : i32
    %c0_i32_1 = arith.constant 0 : i32
    %c0_i32_2 = arith.constant 0 : i32
    return %c0_i32, %c0_i32_0, %c0_i32_1 : i32, i32, i32
  }
  func.func @transform_2(%arg0: i32) -> (i32, i32) {
    %c0_i32 = arith.constant 0 : i32
    %c0_i32_0 = arith.constant 0 : i32
    %c0_i32_1 = arith.constant 0 : i32
    return %c0_i32, %c0_i32_0 : i32, i32
  }
  func.func @transform_3(%arg0: i32) -> (i32, i32, i32) {
    %c0_i32 = arith.constant 0 : i32
    %c0_i32_0 = arith.constant 0 : i32
    %c0_i32_1 = arith.constant 0 : i32
    %c0_i32_2 = arith.constant 0 : i32
    return %c0_i32, %c0_i32_0, %c0_i32_1 : i32, i32, i32
  }
  func.func @transform_4(%arg0: i32) -> (i32, i32) {
    %c0_i32 = arith.constant 0 : i32
    %c0_i32_0 = arith.constant 0 : i32
    %c0_i32_1 = arith.constant 0 : i32
    return %c0_i32, %c0_i32_0 : i32, i32
  }
  func.func @transform_5(%arg0: i32) -> (i32, i32, i32) {
    %c0_i32 = arith.constant 0 : i32
    %c0_i32_0 = arith.constant 0 : i32
    %c0_i32_1 = arith.constant 0 : i32
    %c0_i32_2 = arith.constant 0 : i32
    return %c0_i32, %c0_i32_0, %c0_i32_1 : i32, i32, i32
  }
  func.func @transform_6(%arg0: i32) -> (i32, i32) {
    %c0_i32 = arith.constant 0 : i32
    %c0_i32_0 = arith.constant 0 : i32
    %c0_i32_1 = arith.constant 0 : i32
    return %c0_i32, %c0_i32_0 : i32, i32
  }
  func.func @transform_7(%arg0: i32) -> (i32, i32) {
    %c0_i32 = arith.constant 0 : i32
    %c0_i32_0 = arith.constant 0 : i32
    %c0_i32_1 = arith.constant 0 : i32
    return %c0_i32, %c0_i32_0 : i32, i32
  }
  func.func @transform_8(%arg0: i32) -> (i32, i32) {
    %c0_i32 = arith.constant 0 : i32
    %c0_i32_0 = arith.constant 0 : i32
    %c0_i32_1 = arith.constant 0 : i32
    return %c0_i32, %c0_i32_0 : i32, i32
  }
  func.func @transform_9(%arg0: i32) -> (i32, i32, i32) {
    %c0_i32 = arith.constant 0 : i32
    %c0_i32_0 = arith.constant 0 : i32
    %c0_i32_1 = arith.constant 0 : i32
    %c0_i32_2 = arith.constant 0 : i32
    return %c0_i32, %c0_i32_0, %c0_i32_1 : i32, i32, i32
  }
  func.func @transform_10(%arg0: i32) -> (i32, i32) {
    %c0_i32 = arith.constant 0 : i32
    %c0_i32_0 = arith.constant 0 : i32
    %c0_i32_1 = arith.constant 0 : i32
    return %c0_i32, %c0_i32_0 : i32, i32
  }
  func.func @transform_11(%arg0: i32) -> (i32, i32) {
    %c0_i32 = arith.constant 0 : i32
    %c0_i32_0 = arith.constant 0 : i32
    %c0_i32_1 = arith.constant 0 : i32
    return %c0_i32, %c0_i32_0 : i32, i32
  }
  func.func @transform_12(%arg0: i32) -> (i32, i32, i32) {
    %c0_i32 = arith.constant 0 : i32
    %c0_i32_0 = arith.constant 0 : i32
    %c0_i32_1 = arith.constant 0 : i32
    return %arg0, %c0_i32, %c0_i32_0 : i32, i32, i32
  }
}

</mosaic_0001>

<bundles_post_ra>
// kernel: resdiv_forward.1
= control target key start
LH: loop header
LB: loop body
LE: loop exit
PB: predicated region body
PF: predicated region fallthrough
CT: control target
= control target key end

     0   :  { %s7196_s21 = smov 0   ;;  %s9860_s0 = inlined_call_operand.vmem [shape: f32[2,4,256], index: 0, kind: input, shape index: {}]   ;;  %s9861_s1 = inlined_call_operand.vmem [shape: f32[9,4,4], index: 1, kind: input, shape index: {}]   ;;  %s9862_s2 = inlined_call_operand.vmem [shape: f32[4,1], index: 2, kind: input, shape index: {}]   ;;  %s9863_s3 = inlined_call_operand.vmem [shape: f32[9,4,4], index: 3, kind: input, shape index: {}]   ;;  %s9864_s4 = inlined_call_operand.vmem [shape: f32[4,1], index: 4, kind: input, shape index: {}]   ;;  %s9865_s5 = inlined_call_operand.vmem [shape: f32[9,4,4], index: 5, kind: input, shape index: {}]   ;;  %s9866_s6 = inlined_call_operand.vmem [shape: f32[4,1], index: 6, kind: input, shape index: {}]   ;;  %s9867_s7 = inlined_call_operand.vmem [shape: f32[16,4], index: 7, kind: input, shape index: {}]   ;;  %s9868_s8 = inlined_call_operand.vmem [shape: f32[16,1], index: 8, kind: input, shape index: {}]   ;;  %s9869_s9 = inlined_call_operand.vmem [shape: f32[9,32,16], index: 9, kind: input, shape index: {}]   ;;  %s9870_s10 = inlined_call_operand.vmem [shape: f32[32,1], index: 10, kind: input, shape index: {}]   ;;  %s9871_s11 = inlined_call_operand.vmem [shape: f32[256,1024], index: 11, kind: input, shape index: {}]   ;;  %s9872_s12 = inlined_call_operand.vmem [shape: f32[2,8,1024], index: 12, kind: output, shape index: {}]  }
   0x1 LB: > { %s5762_s22 = sadd.s32 4294967295, %s7117_s21   ;;  %p5766_p0 = scmp.ge.s32.totalorder %s7117_s21, 1  ;;  %s7117_s21 = sphi %s7196_s21, %s22_s21  }
   0x2   : > { %p362_p1 = scmp.lt.s32.totalorder %s7117_s21, 3 }
   0x4   : > { %p363_p2 = pnand %p5766_p0, %p362_p1 }
   0x6   : > { %366 = sbr.rel (%p363_p2) target bundleno = 2747 (0xabb), region = 68 }
   0xd   : > { %p404_p3 = scmp.lt.s32.totalorder %s5762_s22, 1  ;;  %v7119_v0 = vmov 0.0   ;;  %s7120_s27 = smov 1   ;;  %v483_v3 = vld [vmem:[%s9862_s2] sm:$0xf]  ;;  %v7128_v4 = vmov 0   ;;  %v415_v5 = vlaneseq }
   0xe   : > { %869 = vmatprep.mubr.f32.mxu0 %v7119_v0  ;;  %596 = vmatprep.mubr.f32.mxu1 %v7119_v0  ;;  %s7121_s28 = smov 127   ;;  %s7122_s29 = smov 17   ;;  %vm525_vm6 = vcmask 1043456   ;;  %v477_v24 = vld [vmem:[%s9861_s1 + $0xc] sm:$0xf]  ;;  %vm521_vm9 = vcmask 31744  }
   0xf   : > { %s10425_s22 = smov (!%p404_p3, %s5762_s22), 1  ;;  %s7123_s30 = smov 113   ;;  %7108 = vset.pattern.permute.xlu0 %v7128_v4  ;;  %7109 = vset.pattern.permute.xlu1 %v7128_v4  ;;  %v7253_v6 = vand.u32 127, %v415_v5  ;;  %v474_v33 = vld [vmem:[%s9861_s1] sm:$0xf] }
  0x10   : > { %s5900_s23 = sshll.u32 %s10425_s22, 3  ;;  %s7124_s13 = smov 16   ;;  %v478_v41 = vld [vmem:[%s9861_s1 + $0x10] sm:$0xf]  ;;  %v475_v48 = vld [vmem:[%s9861_s1 + $0x4] sm:$0xf] }
  0x11   : > { %s408_s26 = scalar_lea.vmem %s9860_s0, %s5900_s23  ;;  %s7125_s14 = smov 112   ;;  %10111 = vst [vmem:[#allocation2_spill] sm:$0xff] %v7253_v6  ;;  %v417_v7 = vadd.s32 128, %v7253_v6  ;;  %v422_v8 = vand.u32 15, %v7253_v6  ;;  %vm454_vm2 = vcmp.ge.s32.totalorder %v7253_v6, 16  ;;  %vm791_vm3 = vcmp.lt.s32.totalorder %v7253_v6, 1 }
  0x12   : > { %v7212_v1 = vld [vmem:[%s408_s26] sm:$0xff]  ;;  %s7126_s15 = smov 15   ;;  %s7127_s16 = smov 111   ;;  %vm962_vm5 = vcmp.lt.s32.totalorder %v7253_v6, 127  ;;  %v7267_v14 = vsel %vm454_vm2, 1.0, %v7119_v0  ;;  %vm516_vm7 = vcmp.lt.s32.totalorder %v7253_v6, 17 }
  0x13   : > { %787 = vrot.lane.b32.xlu0 %v7212_v1, %s7120_s27  ;;  %958 = vrot.lane.b32.xlu1 %v7212_v1, %s7121_s28  ;;  %v7220_v2 = vcombine.high %v7212_v1, %v7212_v1  ;;  %v429_v9 = vand.u32 15, %v417_v7  ;;  %vm442_vm1 = vcmp.ge.s32.totalorder %v422_v8, 1  ;;  %vm461_vm8 = vcmp.lt.s32.totalorder %v417_v7, 240  ;;  %v479_v55 = vld [vmem:[%s9861_s1 + $0x14] sm:$0xf]  ;;  %s7130_s24 = smov 33  }
  0x14   : > { %v7264_v13 = vsel %vm442_vm1, 1.0, %v7119_v0  ;;  %vm448_vm10 = vcmp.le.s32.totalorder %v422_v8, 14  ;;  %v7296_v30 = vsel %vm461_vm8, 1.0, %v7119_v0  ;;  %vm1053_vm11 = vcmp.lt.s32.totalorder %v7253_v6, 113  ;;  %v476_v63 = vld [vmem:[%s9861_s1 + $0x8] sm:$0xf] }
  0x15   : > { %vm443_vm0 = vcmp.ge.s32.totalorder %v429_v9, 1  ;;  %vm449_vm4 = vcmp.le.s32.totalorder %v429_v9, 14  ;;  %v7283_v23 = vmul.f32 %v7267_v14, %v7264_v13  ;;  %v7311_v34 = vsel %vm448_vm10, 1.0, %v7119_v0  ;;  %v480_v8 = vld [vmem:[%s9861_s1 + $0x18] sm:$0xf] }
  0x16   : > { %v7261_v12 = vsel %vm443_vm0, 1.0, %v7119_v0  ;;  %v7273_v18 = vsel %vm449_vm4, 1.0, %v7119_v0  ;;  %vm609_vm12 = vcmp.lt.s32.totalorder %v7253_v6, 16  ;;  %vm1144_vm13 = vcmp.lt.s32.totalorder %v7253_v6, 112 }
  0x17   : > { %789 = vrot.lane.b32.xlu0 %v7220_v2, %s7120_s27  ;;  %960 = vrot.lane.b32.xlu1 %v7220_v2, %s7121_s28  ;;  %v7318_v37 = vmul.f32 %v7296_v30, %v7261_v12  ;;  %v7354_v53 = vmul.f32 %v7267_v14, %v7311_v34  ;;  %vm700_vm14 = vcmp.lt.s32.totalorder %v7253_v6, 15  ;;  %vm1235_vm15 = vcmp.lt.s32.totalorder %v7253_v6, 111 }
  0x18   : > { %v7380_v4 = vmul.f32 %v7296_v30, %v7273_v18  ;;  %vm3123_vm0 = vcmask 130048  }
  0x1b   : > { %514 = vrot.lane.b32.xlu1 %v7220_v2, %s7122_s29  ;;  %512 = vrot.lane.b32.xlu0 %v7212_v1, %s7122_s29 }
  0x1f   : > { %1051 = vrot.lane.b32.xlu1 %v7220_v2, %s7123_s30  ;;  %1049 = vrot.lane.b32.xlu0 %v7212_v1, %s7123_s30 }
  0x23   : > { %607 = vrot.lane.b32.xlu1 %v7220_v2, %s7124_s13  ;;  %605 = vrot.lane.b32.xlu0 %v7212_v1, %s7124_s13 }
  0x27   : > { %1142 = vrot.lane.b32.xlu1 %v7220_v2, %s7125_s14  ;;  %1140 = vrot.lane.b32.xlu0 %v7212_v1, %s7125_s14 }
  0x2b   : > { %698 = vrot.lane.b32.xlu1 %v7220_v2, %s7126_s15  ;;  %696 = vrot.lane.b32.xlu0 %v7212_v1, %s7126_s15 }
  0x2f   : > { %1233 = vrot.lane.b32.xlu1 %v7220_v2, %s7127_s16  ;;  %1231 = vrot.lane.b32.xlu0 %v7212_v1, %s7127_s16 }
  0x33   : > { %506 = vperm.xlu0 %7108, %v483_v3  }
  0x85   : > { %v788_v10 = vpop.permute.xlu0 %787  ;;  %v959_v11 = vpop.permute.xlu1 %958 }
  0x89   : > { %v790_v15 = vpop.permute.xlu0 %789  ;;  %v961_v16 = vpop.permute.xlu1 %960 }
  0x8a   : > { %v793_v17 = vsel %vm791_vm3, %v790_v15, %v788_v10  ;;  %v964_v19 = vsel %vm962_vm5, %v961_v16, %v959_v11  ;;  %v792_v20 = vsel %vm791_vm3, %v788_v10, %v790_v15  ;;  %v963_v35 = vsel %vm962_vm5, %v959_v11, %v961_v16  ;;  %v481_v16 = vld [vmem:[%s9861_s1 + $0x1c] sm:$0xf] }
  0x8b   : > { %v795_v21 = vmul.f32 %v7261_v12, %v792_v20  ;;  %v794_v22 = vmul.f32 %v7264_v13, %v793_v17  ;;  %v966_v25 = vmul.f32 %v7273_v18, %v964_v19  ;;  %v965_v40 = vmul.f32 %v7311_v34, %v963_v35  ;;  %v482_v17 = vld [vmem:[%s9861_s1 + $0x20] sm:$0xf] }
  0x8d   : > { %5786 = vmatprep.subr.msk.mxu0 %vm525_vm6, %v795_v21  ;;  %v515_v26 = vpop.permute.xlu1 %514  ;;  %v513_v27 = vpop.permute.xlu0 %512 }
  0x8e   : > { %5787 = vmatpush1.msk.msra.mxu0 %vm525_vm6, %v794_v22  ;;  %v518_v28 = vsel %vm516_vm7, %v515_v26, %v513_v27  ;;  %v517_v29 = vsel %vm516_vm7, %v513_v27, %v515_v26 }
  0x8f   : > { %5788 = vmatmul.mubr.msk.f32.vlgmr.msra.gmra.mrb[0].mxu0 %vm521_vm9, %v477_v24  ;;  %v520_v31 = vmul.f32 %v7261_v12, %v517_v29  ;;  %v519_v32 = vmul.f32 %v518_v28, %v7283_v23  ;;  %5789 = vmatprep.subr.msk.mxu0 %vm525_vm6, %v7220_v2 }
  0x90   : > { %5790 = vmatpush1.msk.msra.mxu0 %vm525_vm6, %v7212_v1  ;;  %949 = vmatprep.mubr.f32.mxu0 %v7119_v0 }
  0x91   : > { %v1052_v36 = vpop.permute.xlu1 %1051  ;;  %5777 = vmatprep.subr.msk.mxu1 %vm525_vm6, %v520_v31  ;;  %v1050_v38 = vpop.permute.xlu0 %1049  ;;  %5792 = vmatprep.subr.msk.mxu0 %vm525_vm6, %v966_v25 }
  0x92   : > { %v1055_v39 = vsel %vm1053_vm11, %v1052_v36, %v1050_v38  ;;  %5778 = vmatpush1.msk.msra.mxu1 %vm525_vm6, %v519_v32  ;;  %v1054_v49 = vsel %vm1053_vm11, %v1050_v38, %v1052_v36  ;;  %v493_v32 = vld [vmem:[%s9864_s4] sm:$0xf] }
  0x93   : > { %5779 = vmatmul.mubr.msk.f32.vlgmr.msra.gmra.mrb[0].mxu1 %vm521_vm9, %v474_v33  ;;  %v1057_v42 = vmul.f32 %v1055_v39, %v7318_v37  ;;  %v1056_v54 = vmul.f32 %v7264_v13, %v1054_v49 }
  0x94   : > { %687 = vmatprep.mubr.f32.mxu1 %v7119_v0 }
  0x95   : > { %v608_v43 = vpop.permute.xlu1 %607  ;;  %v606_v44 = vpop.permute.xlu0 %605 }
  0x96   : > { %v611_v45 = vsel %vm609_vm12, %v608_v43, %v606_v44  ;;  %v610_v46 = vsel %vm609_vm12, %v606_v44, %v608_v43 }
  0x97   : > { %v612_v47 = vmul.f32 %v7267_v14, %v611_v45  ;;  %5791 = vmatmul.mubr.msk.f32.vlgmr.msra.gmra.mrb[0].mxu0 %vm521_vm9, %v478_v41  ;;  %5780 = vmatprep.subr.msk.mxu1 %vm525_vm6, %v610_v46 }
  0x98   : > { %5793 = vmatpush1.msk.msra.mxu0 %vm525_vm6, %v965_v40  ;;  %1040 = vmatprep.mubr.f32.mxu0 %v7119_v0 }
  0x99   : > { %v1143_v50 = vpop.permute.xlu1 %1142  ;;  %v1141_v51 = vpop.permute.xlu0 %1140  ;;  %5781 = vmatpush1.msk.msra.mxu1 %vm525_vm6, %v612_v47  ;;  %5795 = vmatprep.subr.msk.mxu0 %vm525_vm6, %v1057_v42  ;;  %v484_v42 = vld [vmem:[%s9863_s3] sm:$0xf] }
  0x9a   : > { %v1146_v52 = vsel %vm1144_vm13, %v1143_v50, %v1141_v51  ;;  %v1145_v9 = vsel %vm1144_vm13, %v1141_v51, %v1143_v50 }
  0x9b   : > { %5782 = vmatmul.mubr.msk.f32.vlgmr.msra.gmra.mrb[0].mxu1 %vm521_vm9, %v475_v48  ;;  %v1148_v56 = vmul.f32 %v7296_v30, %v1146_v52  ;;  %v485_v52 = vld [vmem:[%s9863_s3 + $0x4] sm:$0xf] }
  0x9c   : > { %778 = vmatprep.mubr.f32.mxu1 %v7119_v0 }
  0x9d   : > { %v699_v57 = vpop.permute.xlu1 %698  ;;  %v697_v58 = vpop.permute.xlu0 %696 }
  0x9e   : > { %v701_v59 = vsel %vm700_vm14, %v697_v58, %v699_v57  ;;  %v702_v60 = vsel %vm700_vm14, %v699_v57, %v697_v58 }
  0x9f   : > { %v703_v61 = vmul.f32 %v702_v60, %v7354_v53  ;;  %v704_v62 = vmul.f32 %v7273_v18, %v701_v59  ;;  %5794 = vmatmul.mubr.msk.f32.vlgmr.msra.gmra.mrb[0].mxu0 %vm521_vm9, %v479_v55  ;;  %v486_v60 = vld [vmem:[%s9863_s3 + $0x8] sm:$0xf] }
  0xa0   : > { %5796 = vmatpush1.msk.msra.mxu0 %vm525_vm6, %v1056_v54  ;;  %1131 = vmatprep.mubr.f32.mxu0 %v7119_v0 }
  0xa1   : > { %5783 = vmatprep.subr.msk.mxu1 %vm525_vm6, %v704_v62  ;;  %5798 = vmatprep.subr.msk.mxu0 %vm525_vm6, %v1148_v56  ;;  %v1234_v3 = vpop.permute.xlu1 %1233  ;;  %v1232_v5 = vpop.permute.xlu0 %1231 }
  0xa2   : > { %5784 = vmatpush1.msk.msra.mxu1 %vm525_vm6, %v703_v61  ;;  %v1237_v7 = vsel %vm1235_vm15, %v1234_v3, %v1232_v5  ;;  %v1236_v11 = vsel %vm1235_vm15, %v1232_v5, %v1234_v3  ;;  %v487_v5 = vld [vmem:[%s9863_s3 + $0xc] sm:$0xf] }
  0xa3   : > { %5785 = vmatmul.mubr.msk.f32.vlgmr.msra.gmra.mrb[0].mxu1 %vm521_vm9, %v476_v63  ;;  %v1239_v10 = vmul.f32 %v1237_v7, %v7380_v4  ;;  %v1238_v15 = vmul.f32 %v7311_v34, %v1236_v11 }
  0xa4   : > { %1410 = vmatprep.mubr.f32.mxu1 %v7119_v0 }
  0xa7   : > { %5797 = vmatmul.mubr.msk.f32.vlgmr.msra.gmra.mrb[0].mxu0 %vm521_vm9, %v480_v8 }
  0xa8   : > { %5799 = vmatpush1.msk.msra.mxu0 %vm525_vm6, %v1145_v9  ;;  %1222 = vmatprep.mubr.f32.mxu0 %v7119_v0 }
  0xa9   : > { %5801 = vmatprep.subr.msk.mxu0 %vm525_vm6, %v1239_v10 }
  0xaf   : > { %5800 = vmatmul.mubr.msk.f32.vlgmr.msra.gmra.mrb[0].mxu0 %vm521_vm9, %v481_v16 }
  0xb0   : > { %5802 = vmatpush1.msk.msra.mxu0 %vm525_vm6, %v1238_v15  ;;  %1313 = vmatprep.mubr.f32.mxu0 %v7119_v0  ;;  %v488_v15 = vld [vmem:[%s9863_s3 + $0x10] sm:$0xf] }
  0xb2   : > { %v507_v21 = vpop.permute.xlu0 %506 }
  0xb7   : > { %5803 = vmatmul.mubr.msk.f32.vlgmr.msra.gmra.mrb[0].mxu0 %vm521_vm9, %v482_v17 }
  0xb8   : > { %2221 = vmatprep.mubr.f32.mxu0 %v7119_v0 }
 0x176   : > { %v780_v19 = vpop.f32.mrb[0].mxu1 }
 0x177   : > { %v782_v20 = vpop.f32.mrb[1].mxu1  ;;  %v6962_v22 = vadd.f32 %v780_v19, %v507_v21 }
 0x178   : > { %v6964_v24 = vadd.f32 %v782_v20, %v507_v21 }
 0x18a   : > { %v1315_v25 = vpop.f32.mrb[0].mxu0 }
 0x18b   : > { %v6963_v26 = vadd.f32 %v6962_v22, %v1315_v25  ;;  %v1317_v27 = vpop.f32.mrb[1].mxu0 }
 0x18c   : > { %v6965_v28 = vadd.f32 %v6964_v24, %v1317_v27  ;;  %v489_v24 = vld [vmem:[%s9863_s3 + $0x14] sm:$0xf] }
 0x18d   : > { %v7411_v29 = vmax.f32 %v6963_v26, 0.0 }
 0x18e   : > { %v1323_v31 = vmax.f32 %v6965_v28, 0.0 }
 0x18f   : > { %1419 = vrot.lane.b32.xlu0 %v7411_v29, %s7124_s13  ;;  %1329 = vrot.lane.b32.xlu1 %v7411_v29, %s7122_s29 }
 0x193   : > { %1509 = vrot.lane.b32.xlu0 %v7411_v29, %s7126_s15  ;;  %1331 = vrot.lane.b32.xlu1 %v1323_v31, %s7122_s29 }
 0x197   : > { %1599 = vrot.lane.b32.xlu0 %v7411_v29, %s7120_s27  ;;  %1421 = vrot.lane.b32.xlu1 %v1323_v31, %s7124_s13 }
 0x19b   : > { %1771 = vrot.lane.b32.xlu0 %v7411_v29, %s7121_s28  ;;  %1511 = vrot.lane.b32.xlu1 %v1323_v31, %s7126_s15 }
 0x19f   : > { %1861 = vrot.lane.b32.xlu0 %v7411_v29, %s7123_s30  ;;  %1601 = vrot.lane.b32.xlu1 %v1323_v31, %s7120_s27 }
 0x1a3   : > { %1951 = vrot.lane.b32.xlu0 %v7411_v29, %s7125_s14  ;;  %1773 = vrot.lane.b32.xlu1 %v1323_v31, %s7121_s28 }
 0x1a7   : > { %2041 = vrot.lane.b32.xlu0 %v7411_v29, %s7127_s16  ;;  %1863 = vrot.lane.b32.xlu1 %v1323_v31, %s7123_s30 }
 0x1ab   : > { %1326 = vperm.xlu0 %7108, %v493_v32   ;;  %1953 = vrot.lane.b32.xlu1 %v1323_v31, %s7125_s14 }
 0x1af   : > { %2043 = vrot.lane.b32.xlu1 %v1323_v31, %s7127_s16 }
 0x201   : > { %v1330_v33 = vpop.permute.xlu1 %1329  ;;  %v1420_v35 = vpop.permute.xlu0 %1419 }
 0x205   : > { %v1332_v36 = vpop.permute.xlu1 %1331  ;;  %v1510_v46 = vpop.permute.xlu0 %1509 }
 0x206   : > { %v1333_v38 = vsel %vm516_vm7, %v1330_v33, %v1332_v36  ;;  %v1334_v39 = vsel %vm516_vm7, %v1332_v36, %v1330_v33  ;;  %v491_v36 = vld [vmem:[%s9863_s3 + $0x1c] sm:$0xf] }
 0x207   : > { %v1335_v40 = vmul.f32 %v1334_v39, %v7283_v23  ;;  %v1336_v41 = vmul.f32 %v7261_v12, %v1333_v38  ;;  %v492_v39 = vld [vmem:[%s9863_s3 + $0x20] sm:$0xf] }
 0x209   : > { %5804 = vmatprep.subr.msk.mxu1 %vm525_vm6, %v1336_v41  ;;  %v1422_v43 = vpop.permute.xlu1 %1421  ;;  %v1600_v54 = vpop.permute.xlu0 %1599 }
 0x20a   : > { %v1423_v44 = vsel %vm609_vm12, %v1420_v35, %v1422_v43  ;;  %v1424_v45 = vsel %vm609_vm12, %v1422_v43, %v1420_v35  ;;  %5805 = vmatpush1.msk.msra.mxu1 %vm525_vm6, %v1335_v40 }
 0x20b   : > { %v1425_v47 = vmul.f32 %v7267_v14, %v1424_v45  ;;  %5806 = vmatmul.mubr.msk.f32.vlgmr.msra.gmra.mrb[2].mxu1 %vm521_vm9, %v484_v42  ;;  %5807 = vmatprep.subr.msk.mxu1 %vm525_vm6, %v1423_v44 }
 0x20c   : > { %1500 = vmatprep.mubr.f32.mxu1 %v7119_v0 }
 0x20d   : > { %5808 = vmatpush1.msk.msra.mxu1 %vm525_vm6, %v1425_v47  ;;  %v1512_v48 = vpop.permute.xlu1 %1511  ;;  %v1772_v63 = vpop.permute.xlu0 %1771 }
 0x20e   : > { %v1513_v49 = vsel %vm700_vm14, %v1510_v46, %v1512_v48  ;;  %v1514_v50 = vsel %vm700_vm14, %v1512_v48, %v1510_v46 }
 0x20f   : > { %v1516_v51 = vmul.f32 %v7273_v18, %v1513_v49  ;;  %v1515_v56 = vmul.f32 %v1514_v50, %v7354_v53  ;;  %v2947_v49 = vld [vmem:[%s9868_s8 + $0x8] sm:$0xff] }
 0x211   : > { %5810 = vmatprep.subr.msk.mxu1 %vm525_vm6, %v1516_v51  ;;  %v1602_v55 = vpop.permute.xlu1 %1601  ;;  %v1862_v9 = vpop.permute.xlu0 %1861 }
 0x212   : > { %v1603_v57 = vsel %vm791_vm3, %v1600_v54, %v1602_v55  ;;  %v1604_v59 = vsel %vm791_vm3, %v1602_v55, %v1600_v54 }
 0x213   : > { %v1606_v58 = vmul.f32 %v7261_v12, %v1603_v57  ;;  %5809 = vmatmul.mubr.msk.f32.vlgmr.msra.gmra.mrb[2].mxu1 %vm521_vm9, %v485_v52  ;;  %v1605_v61 = vmul.f32 %v7264_v13, %v1604_v59 }
 0x214   : > { %5811 = vmatpush1.msk.msra.mxu1 %vm525_vm6, %v1515_v56  ;;  %1590 = vmatprep.mubr.f32.mxu1 %v7119_v0 }
 0x215   : > { %5813 = vmatprep.subr.msk.mxu1 %vm525_vm6, %v1606_v58  ;;  %v1774_v62 = vpop.permute.xlu1 %1773  ;;  %v1952_v20 = vpop.permute.xlu0 %1951  ;;  %v494_v58 = vld [vmem:[%s9865_s5] sm:$0xf] }
 0x216   : > { %v1776_v3 = vsel %vm962_vm5, %v1774_v62, %v1772_v63  ;;  %v1775_v10 = vsel %vm962_vm5, %v1772_v63, %v1774_v62 }
 0x217   : > { %v1778_v7 = vmul.f32 %v7273_v18, %v1776_v3  ;;  %v1777_v16 = vmul.f32 %v7311_v34, %v1775_v10  ;;  %v495_v10 = vld [vmem:[%s9865_s5 + $0x4] sm:$0xf] }
 0x219   : > { %v1864_v8 = vpop.permute.xlu1 %1863  ;;  %v2042_v28 = vpop.permute.xlu0 %2041 }
 0x21a   : > { %v1866_v11 = vsel %vm1053_vm11, %v1864_v8, %v1862_v9  ;;  %v1865_v21 = vsel %vm1053_vm11, %v1862_v9, %v1864_v8 }
 0x21b   : > { %5812 = vmatmul.mubr.msk.f32.vlgmr.msra.gmra.mrb[2].mxu1 %vm521_vm9, %v486_v60  ;;  %v1868_v17 = vmul.f32 %v1866_v11, %v7318_v37  ;;  %v1867_v25 = vmul.f32 %v7264_v13, %v1865_v21 }
 0x21c   : > { %5814 = vmatpush1.msk.msra.mxu1 %vm525_vm6, %v1605_v61  ;;  %1680 = vmatprep.mubr.f32.mxu1 %v7119_v0 }
 0x21d   : > { %5816 = vmatprep.subr.msk.mxu1 %vm525_vm6, %v1323_v31  ;;  %v1954_v19 = vpop.permute.xlu1 %1953  ;;  %v490_v31 = vld [vmem:[%s9863_s3 + $0x18] sm:$0xf] }
 0x21e   : > { %v1956_v22 = vsel %vm1144_vm13, %v1954_v19, %v1952_v20  ;;  %v1955_v32 = vsel %vm1144_vm13, %v1952_v20, %v1954_v19  ;;  %v496_v20 = vld [vmem:[%s9865_s5 + $0x8] sm:$0xf] }
 0x21f   : > { %v1958_v26 = vmul.f32 %v7296_v30, %v1956_v22 }
 0x221   : > { %v2044_v27 = vpop.permute.xlu1 %2043 }
 0x222   : > { %v2045_v35 = vsel %vm1235_vm15, %v2042_v28, %v2044_v27 }
 0x223   : > { %5815 = vmatmul.mubr.msk.f32.vlgmr.msra.gmra.mrb[2].mxu1 %vm521_vm9, %v487_v5  ;;  %v2047_v38 = vmul.f32 %v7311_v34, %v2045_v35 }
 0x224   : > { %5817 = vmatpush1.msk.msra.mxu1 %vm525_vm6, %v7411_v29  ;;  %1762 = vmatprep.mubr.f32.mxu1 %v7119_v0  ;;  %v2046_v29 = vsel %vm1235_vm15, %v2044_v27, %v2042_v28 }
 0x225   : > { %5819 = vmatprep.subr.msk.mxu1 %vm525_vm6, %v1778_v7  ;;  %v2048_v33 = vmul.f32 %v2046_v29, %v7380_v4 }
 0x22a   : > { %v1327_v40 = vpop.permute.xlu0 %1326 }
 0x22b   : > { %5818 = vmatmul.mubr.msk.f32.vlgmr.msra.gmra.mrb[2].mxu1 %vm521_vm9, %v488_v15 }
 0x22c   : > { %5820 = vmatpush1.msk.msra.mxu1 %vm525_vm6, %v1777_v16  ;;  %1852 = vmatprep.mubr.f32.mxu1 %v7119_v0 }
 0x22d   : > { %5822 = vmatprep.subr.msk.mxu1 %vm525_vm6, %v1868_v17 }
 0x233   : > { %5821 = vmatmul.mubr.msk.f32.vlgmr.msra.gmra.mrb[2].mxu1 %vm521_vm9, %v489_v24 }
 0x234   : > { %5823 = vmatpush1.msk.msra.mxu1 %vm525_vm6, %v1867_v25  ;;  %1942 = vmatprep.mubr.f32.mxu1 %v7119_v0 }
 0x235   : > { %5825 = vmatprep.subr.msk.mxu1 %vm525_vm6, %v1958_v26  ;;  %v497_v26 = vld [vmem:[%s9865_s5 + $0xc] sm:$0xf] }
 0x23b   : > { %5824 = vmatmul.mubr.msk.f32.vlgmr.msra.gmra.mrb[2].mxu1 %vm521_vm9, %v490_v31 }
 0x23c   : > { %5826 = vmatpush1.msk.msra.mxu1 %vm525_vm6, %v1955_v32  ;;  %2032 = vmatprep.mubr.f32.mxu1 %v7119_v0 }
 0x23d   : > { %5828 = vmatprep.subr.msk.mxu1 %vm525_vm6, %v2048_v33  ;;  %v498_v33 = vld [vmem:[%s9865_s5 + $0x10] sm:$0xf] }
 0x243   : > { %5827 = vmatmul.mubr.msk.f32.vlgmr.msra.gmra.mrb[2].mxu1 %vm521_vm9, %v491_v36 }
 0x244   : > { %5829 = vmatpush1.msk.msra.mxu1 %vm525_vm6, %v2047_v38  ;;  %2122 = vmatprep.mubr.f32.mxu1 %v7119_v0 }
 0x24b   : > { %5830 = vmatmul.mubr.msk.f32.vlgmr.msra.gmra.mrb[2].mxu1 %vm521_vm9, %v492_v39 }
 0x24c   : > { %3034 = vmatprep.mubr.f32.mxu1 %v7119_v0 }
 0x31e   : > { %v2124_v41 = vpop.f32.mrb[2].mxu1 }
 0x31f   : > { %v6966_v42 = vadd.f32 %v2124_v41, %v1327_v40  ;;  %v2126_v43 = vpop.f32.mrb[3].mxu1 }
 0x320   : > { %v6967_v44 = vadd.f32 %v2126_v43, %v1327_v40 }
 0x321   : > { %v2131_v45 = vadd.f32 %v6966_v42, %v7212_v1  ;;  %v2946_v1 = vld [vmem:[%s9868_s8] sm:$0xff]  ;;  %v499_v42 = vld [vmem:[%s9865_s5 + $0x14] sm:$0xf] }
 0x322   : > { %v2132_v46 = vadd.f32 %v6967_v44, %v7220_v2  ;;  %v503_v2 = vld [vmem:[%s9866_s6] sm:$0xf] }
 0x323   : > { %v7552_v47 = vmax.f32 %v2131_v45, 0.0 }
 0x324   : > { %v7554_v48 = vmax.f32 %v2132_v46, 0.0 }
 0x325   : > { %2140 = vrot.lane.b32.xlu1 %v7552_v47, %s7122_s29 }
 0x326   : > { %2142 = vrot.lane.b32.xlu0 %v7554_v48, %s7122_s29 }
 0x329   : > { %2230 = vrot.lane.b32.xlu1 %v7552_v47, %s7124_s13 }
 0x32a   : > { %2232 = vrot.lane.b32.xlu0 %v7554_v48, %s7124_s13 }
 0x32d   : > { %2320 = vrot.lane.b32.xlu1 %v7552_v47, %s7126_s15 }
 0x32e   : > { %2322 = vrot.lane.b32.xlu0 %v7554_v48, %s7126_s15 }
 0x331   : > { %2410 = vrot.lane.b32.xlu1 %v7552_v47, %s7120_s27 }
 0x332   : > { %2412 = vrot.lane.b32.xlu0 %v7554_v48, %s7120_s27 }
 0x335   : > { %2582 = vrot.lane.b32.xlu1 %v7552_v47, %s7121_s28 }
 0x336   : > { %2584 = vrot.lane.b32.xlu0 %v7554_v48, %s7121_s28 }
 0x339   : > { %2672 = vrot.lane.b32.xlu1 %v7552_v47, %s7123_s30 }
 0x33a   : > { %2674 = vrot.lane.b32.xlu0 %v7554_v48, %s7123_s30 }
 0x33d   : > { %2762 = vrot.lane.b32.xlu1 %v7552_v47, %s7125_s14 }
 0x33e   : > { %2764 = vrot.lane.b32.xlu0 %v7554_v48, %s7125_s14 }
 0x341   : > { %2852 = vrot.lane.b32.xlu1 %v7552_v47, %s7127_s16 }
 0x342   : > { %2854 = vrot.lane.b32.xlu0 %v7554_v48, %s7127_s16 }
 0x345   : > { %2137 = vperm.xlu1 %7109, %v503_v2  }
 0x346   : > { %2950 = vperm.xlu0 %7108, %v2946_v1  }
 0x349   : > { %2955 = vperm.xlu1 %7109, %v2947_v49  }
 0x397   : > { %v2141_v50 = vpop.permute.xlu1 %2140 }
 0x398   : > { %v2143_v51 = vpop.permute.xlu0 %2142 }
 0x399   : > { %v2144_v52 = vsel %vm516_vm7, %v2141_v50, %v2143_v51  ;;  %v2145_v54 = vsel %vm516_vm7, %v2143_v51, %v2141_v50  ;;  %v501_v50 = vld [vmem:[%s9865_s5 + $0x1c] sm:$0xf] }
 0x39a   : > { %v2146_v55 = vmul.f32 %v2145_v54, %v7283_v23  ;;  %v2147_v56 = vmul.f32 %v7261_v12, %v2144_v52  ;;  %v502_v52 = vld [vmem:[%s9865_s5 + $0x20] sm:$0xf] }
 0x39b   : > { %v2231_v57 = vpop.permute.xlu1 %2230 }
 0x39c   : > { %5831 = vmatprep.subr.msk.mxu0 %vm525_vm6, %v2147_v56  ;;  %v2233_v59 = vpop.permute.xlu0 %2232 }
 0x39d   : > { %v2234_v60 = vsel %vm609_vm12, %v2231_v57, %v2233_v59  ;;  %v2235_v61 = vsel %vm609_vm12, %v2233_v59, %v2231_v57  ;;  %5832 = vmatpush1.msk.msra.mxu0 %vm525_vm6, %v2146_v55 }
 0x39e   : > { %v2236_v62 = vmul.f32 %v7267_v14, %v2235_v61  ;;  %5833 = vmatmul.mubr.msk.f32.vlgmr.msra.gmra.mrb[2].mxu0 %vm521_vm9, %v494_v58  ;;  %5834 = vmatprep.subr.msk.mxu0 %vm525_vm6, %v2234_v60  ;;  %v2944_v61 = vld [vmem:[%s9867_s7] sm:$0xff] }
 0x39f   : > { %v2321_v63 = vpop.permute.xlu1 %2320  ;;  %2311 = vmatprep.mubr.f32.mxu0 %v7119_v0 }
 0x3a0   : > { %5835 = vmatpush1.msk.msra.mxu0 %vm525_vm6, %v2236_v62  ;;  %v2323_v3 = vpop.permute.xlu0 %2322  ;;  %v2945_v62 = vld [vmem:[%s9867_s7 + $0x8] sm:$0xff] }
 0x3a1   : > { %v2324_v5 = vsel %vm700_vm14, %v2321_v63, %v2323_v3  ;;  %v2325_v7 = vsel %vm700_vm14, %v2323_v3, %v2321_v63 }
 0x3a2   : > { %v2327_v8 = vmul.f32 %v7273_v18, %v2324_v5  ;;  %v2326_v15 = vmul.f32 %v2325_v7, %v7354_v53 }
 0x3a3   : > { %v2411_v9 = vpop.permute.xlu1 %2410 }
 0x3a4   : > { %5837 = vmatprep.subr.msk.mxu0 %vm525_vm6, %v2327_v8  ;;  %v2413_v11 = vpop.permute.xlu0 %2412 }
 0x3a5   : > { %v2414_v16 = vsel %vm791_vm3, %v2411_v9, %v2413_v11  ;;  %v2415_v19 = vsel %vm791_vm3, %v2413_v11, %v2411_v9 }
 0x3a6   : > { %v2417_v17 = vmul.f32 %v7261_v12, %v2414_v16  ;;  %5836 = vmatmul.mubr.msk.f32.vlgmr.msra.gmra.mrb[2].mxu0 %vm521_vm9, %v495_v10  ;;  %v2416_v21 = vmul.f32 %v7264_v13, %v2415_v19 }
 0x3a7   : > { %5838 = vmatpush1.msk.msra.mxu0 %vm525_vm6, %v2326_v15  ;;  %2401 = vmatprep.mubr.f32.mxu0 %v7119_v0  ;;  %v2583_v22 = vpop.permute.xlu1 %2582 }
 0x3a8   : > { %5840 = vmatprep.subr.msk.mxu0 %vm525_vm6, %v2417_v17  ;;  %v2585_v24 = vpop.permute.xlu0 %2584 }
 0x3a9   : > { %v2587_v25 = vsel %vm962_vm5, %v2585_v24, %v2583_v22  ;;  %v2586_v31 = vsel %vm962_vm5, %v2583_v22, %v2585_v24  ;;  %v3085_v22 = vld [vmem:[%s9870_s10 + $0x10] sm:$0xff]  ;;  %v3086_v24 = vld [vmem:[%s9870_s10 + $0x18] sm:$0xff] }
 0x3aa   : > { %v2589_v27 = vmul.f32 %v7273_v18, %v2587_v25  ;;  %v2588_v35 = vmul.f32 %v7311_v34, %v2586_v31 }
 0x3ab   : > { %v2673_v28 = vpop.permute.xlu1 %2672 }
 0x3ac   : > { %v2675_v29 = vpop.permute.xlu0 %2674 }
 0x3ad   : > { %v2677_v32 = vsel %vm1053_vm11, %v2675_v29, %v2673_v28  ;;  %v2676_v40 = vsel %vm1053_vm11, %v2673_v28, %v2675_v29 }
 0x3ae   : > { %5839 = vmatmul.mubr.msk.f32.vlgmr.msra.gmra.mrb[2].mxu0 %vm521_vm9, %v496_v20  ;;  %v2679_v36 = vmul.f32 %v2677_v32, %v7318_v37  ;;  %v2678_v43 = vmul.f32 %v7264_v13, %v2676_v40  ;;  %v3084_v20 = vld [vmem:[%s9870_s10 + $0x8] sm:$0xff] }
 0x3af   : > { %5841 = vmatpush1.msk.msra.mxu0 %vm525_vm6, %v2416_v21  ;;  %2491 = vmatprep.mubr.f32.mxu0 %v7119_v0  ;;  %v2763_v38 = vpop.permute.xlu1 %2762  ;;  %v3083_v21 = vld [vmem:[%s9870_s10] sm:$0xff] }
 0x3b0   : > { %5843 = vmatprep.subr.msk.mxu0 %vm525_vm6, %v7554_v48  ;;  %v2765_v39 = vpop.permute.xlu0 %2764  ;;  %v500_v48 = vld [vmem:[%s9865_s5 + $0x18] sm:$0xf] }
 0x3b1   : > { %v2767_v41 = vsel %vm1144_vm13, %v2765_v39, %v2763_v38  ;;  %v2766_v1 = vsel %vm1144_vm13, %v2763_v38, %v2765_v39 }
 0x3b2   : > { %v2769_v44 = vmul.f32 %v7296_v30, %v2767_v41 }
 0x3b3   : > { %v2853_v45 = vpop.permute.xlu1 %2852 }
 0x3b4   : > { %v2855_v46 = vpop.permute.xlu0 %2854 }
 0x3b5   : > { %v2856_v49 = vsel %vm1235_vm15, %v2853_v45, %v2855_v46 }
 0x3b6   : > { %5842 = vmatmul.mubr.msk.f32.vlgmr.msra.gmra.mrb[2].mxu0 %vm521_vm9, %v497_v26  ;;  %v2858_v51 = vmul.f32 %v7311_v34, %v2856_v49 }
 0x3b7   : > { %5844 = vmatpush1.msk.msra.mxu0 %vm525_vm6, %v7552_v47  ;;  %2573 = vmatprep.mubr.f32.mxu0 %v7119_v0  ;;  %v2857_v47 = vsel %vm1235_vm15, %v2855_v46, %v2853_v45  ;;  %v3047_v46 = vld [vmem:[%s9869_s9] sm:$0xff] }
 0x3b8   : > { %5846 = vmatprep.subr.msk.mxu0 %vm525_vm6, %v2589_v27  ;;  %v2859_v2 = vmul.f32 %v2857_v47, %v7380_v4 }
 0x3be   : > { %5845 = vmatmul.mubr.msk.f32.vlgmr.msra.gmra.mrb[2].mxu0 %vm521_vm9, %v498_v33 }
 0x3bf   : > { %5847 = vmatpush1.msk.msra.mxu0 %vm525_vm6, %v2588_v35  ;;  %2663 = vmatprep.mubr.f32.mxu0 %v7119_v0 }
 0x3c0   : > { %5849 = vmatprep.subr.msk.mxu0 %vm525_vm6, %v2679_v36 }
 0x3c4   : > { %v2138_v54 = vpop.permute.xlu1 %2137 }
 0x3c5   : > { %v2951_v63 = vpop.permute.xlu0 %2950 }
 0x3c6   : > { %5848 = vmatmul.mubr.msk.f32.vlgmr.msra.gmra.mrb[2].mxu0 %vm521_vm9, %v499_v42 }
 0x3c7   : > { %5850 = vmatpush1.msk.msra.mxu0 %vm525_vm6, %v2678_v43  ;;  %2753 = vmatprep.mubr.f32.mxu0 %v7119_v0 }
 0x3c8   : > { %5852 = vmatprep.subr.msk.mxu0 %vm525_vm6, %v2769_v44  ;;  %v2956_v8 = vpop.permute.xlu1 %2955 }
 0x3ce   : > { %5851 = vmatmul.mubr.msk.f32.vlgmr.msra.gmra.mrb[2].mxu0 %vm521_vm9, %v500_v48 }
 0x3cf   : > { %5853 = vmatpush1.msk.msra.mxu0 %vm525_vm6, %v2766_v1  ;;  %2843 = vmatprep.mubr.f32.mxu0 %v7119_v0 }
 0x3d0   : > { %5855 = vmatprep.subr.msk.mxu0 %vm525_vm6, %v2859_v2 }
 0x3d6   : > { %5854 = vmatmul.mubr.msk.f32.vlgmr.msra.gmra.mrb[2].mxu0 %vm521_vm9, %v501_v50 }
 0x3d7   : > { %5856 = vmatpush1.msk.msra.mxu0 %vm525_vm6, %v2858_v51  ;;  %2933 = vmatprep.mubr.f32.mxu0 %v7119_v0 }
 0x3de   : > { %5857 = vmatmul.mubr.msk.f32.vlgmr.msra.gmra.mrb[2].mxu0 %vm521_vm9, %v502_v52  ;;  %v3048_v52 = vld [vmem:[%s9869_s9 + $0x8] sm:$0xff] }
 0x4b1   : > { %v2935_v55 = vpop.f32.mrb[2].mxu0 }
 0x4b2   : > { %v6968_v56 = vadd.f32 %v2935_v55, %v2138_v54  ;;  %v2937_v57 = vpop.f32.mrb[3].mxu0 }
 0x4b3   : > { %v6969_v58 = vadd.f32 %v2937_v57, %v2138_v54 }
 0x4b4   : > { %v2942_v60 = vmax.f32 %v6968_v56, 0.0 }
 0x4b5   : > { %v2943_v59 = vmax.f32 %v6969_v58, 0.0 }
 0x4b7   : > { %5858 = vmatprep.subr.msk.mxu1 %vm525_vm6, %v2943_v59 }
 0x4b8   : > { %5859 = vmatpush1.msk.msra.mxu1 %vm525_vm6, %v2942_v60 }
 0x4b9   : > { %5860 = vmatmul.mubr.msk.f32.vlgmr.msra.gmra.mrb[4].mxu1 %vm521_vm9, %v2944_v61 }
 0x4ba   : > { %3040 = vmatprep.mubr.f32.mxu1 %v7119_v0 }
 0x4bd   : > { %5861 = vmatmul.mubr.msk.f32.gmra.mrb[6].mxu1 %vm521_vm9, %v2945_v62 }
 0x4be   : > { %3200 = vmatprep.mubr.f32.mxu1 %v7119_v0 }
 0x58c   : > { %v3036_v3 = vpop.f32.mrb[4].mxu1 }
 0x58d   : > { %v7719_v5 = vadd.f32 %v3036_v3, %v2951_v63  ;;  %v3038_v7 = vpop.f32.mrb[5].mxu1  ;;  %v3050_v3 = vld [vmem:[%s9869_s9 + $0x18] sm:$0xff] }
 0x58e   : > { %v7723_v10 = vadd.f32 %v3038_v7, %v2951_v63 }
 0x58f   : > { %3107 = vrot.lane.b32.xlu0 %v7719_v5, %s7122_s29 }
 0x590   : > { %v3042_v9 = vpop.f32.mrb[6].mxu1 }
 0x591   : > { %v7725_v11 = vadd.f32 %v3042_v9, %v2956_v8  ;;  %v3044_v15 = vpop.f32.mrb[7].mxu1 }
 0x592   : > { %v7727_v16 = vadd.f32 %v3044_v15, %v2956_v8 }
 0x593   : > { %3109 = vrot.lane.b32.xlu1 %v7725_v11, %s7122_s29  ;;  %3111 = vrot.lane.b32.xlu0 %v7723_v10, %s7122_s29  ;;  %v5920_v17 = vpack.c.bf16 %v7725_v11, %v7719_v5 }
 0x594   : > { %v5918_v19 = vpack.c.bf16 %v7727_v16, %v7723_v10 }
 0x597   : > { %3113 = vrot.lane.b32.xlu1 %v7727_v16, %s7122_s29  ;;  %3233 = vrot.lane.b32.xlu0 %v7719_v5, %s7124_s13 }
 0x59b   : > { %3235 = vrot.lane.b32.xlu1 %v7725_v11, %s7124_s13  ;;  %3237 = vrot.lane.b32.xlu0 %v7723_v10, %s7124_s13 }
 0x59f   : > { %3239 = vrot.lane.b32.xlu1 %v7727_v16, %s7124_s13  ;;  %3358 = vrot.lane.b32.xlu0 %v7719_v5, %s7126_s15 }
 0x5a3   : > { %3360 = vrot.lane.b32.xlu1 %v7725_v11, %s7126_s15  ;;  %3362 = vrot.lane.b32.xlu0 %v7723_v10, %s7126_s15 }
 0x5a7   : > { %3364 = vrot.lane.b32.xlu1 %v7727_v16, %s7126_s15  ;;  %3483 = vrot.lane.b32.xlu0 %v7719_v5, %s7120_s27 }
 0x5ab   : > { %3485 = vrot.lane.b32.xlu1 %v7725_v11, %s7120_s27  ;;  %3487 = vrot.lane.b32.xlu0 %v7723_v10, %s7120_s27 }
 0x5af   : > { %3489 = vrot.lane.b32.xlu1 %v7727_v16, %s7120_s27  ;;  %3717 = vrot.lane.b32.xlu0 %v7719_v5, %s7121_s28 }
 0x5b3   : > { %3719 = vrot.lane.b32.xlu1 %v7725_v11, %s7121_s28  ;;  %3721 = vrot.lane.b32.xlu0 %v7723_v10, %s7121_s28 }
 0x5b7   : > { %3723 = vrot.lane.b32.xlu1 %v7727_v16, %s7121_s28  ;;  %3842 = vrot.lane.b32.xlu0 %v7719_v5, %s7123_s30 }
 0x5bb   : > { %3844 = vrot.lane.b32.xlu1 %v7725_v11, %s7123_s30  ;;  %3846 = vrot.lane.b32.xlu0 %v7723_v10, %s7123_s30 }
 0x5bf   : > { %3848 = vrot.lane.b32.xlu1 %v7727_v16, %s7123_s30  ;;  %3967 = vrot.lane.b32.xlu0 %v7719_v5, %s7125_s14 }
 0x5c3   : > { %3969 = vrot.lane.b32.xlu1 %v7725_v11, %s7125_s14  ;;  %3971 = vrot.lane.b32.xlu0 %v7723_v10, %s7125_s14 }
 0x5c7   : > { %3973 = vrot.lane.b32.xlu1 %v7727_v16, %s7125_s14  ;;  %4092 = vrot.lane.b32.xlu0 %v7719_v5, %s7127_s16  ;;  %v4377_v5 = vld [vmem:[%s9871_s11 + $0x500] sm:$0xff] }
 0x5cb   : > { %4094 = vrot.lane.b32.xlu1 %v7725_v11, %s7127_s16  ;;  %4096 = vrot.lane.b32.xlu0 %v7723_v10, %s7127_s16  ;;  %v4330_v10 = vld [vmem:[%s9871_s11 + $0x388] sm:$0xff]  ;;  %v4385_v11 = vld [vmem:[%s9871_s11 + $0x540] sm:$0xff] }
 0x5cf   : > { %4098 = vrot.lane.b32.xlu1 %v7727_v16, %s7127_s16  ;;  %3094 = vperm.xlu0 %7108, %v3084_v20   ;;  %v4338_v16 = vld [vmem:[%s9871_s11 + $0x3c8] sm:$0xff]  ;;  %s5901_s16 = sshll.u32 %s10425_s22, 6 }
 0x5d0   : > { %s9818_s17 = scalar_lea.vmem %s9872_s12, %s5901_s16 }
 0x5d3   : > { %3089 = vperm.xlu1 %7109, %v3083_v21   ;;  %3099 = vperm.xlu0 %7108, %v3085_v22   ;;  %v4218_v21 = vld [vmem:[%s9871_s11 + $0x8] sm:$0xff] }
 0x5d4   : > { %v4226_v22 = vld [vmem:[%s9871_s11 + $0x48] sm:$0xff] }
 0x5d7   : > { %3104 = vperm.xlu1 %7109, %v3086_v24  }
 0x601   : > { %v3108_v25 = vpop.permute.xlu0 %3107 }
 0x605   : > { %v3110_v26 = vpop.permute.xlu1 %3109  ;;  %v3112_v27 = vpop.permute.xlu0 %3111 }
 0x606   : > { %v3115_v28 = vsel %vm516_vm7, %v3108_v25, %v3112_v27  ;;  %v3117_v29 = vsel %vm516_vm7, %v3112_v27, %v3108_v25  ;;  %v7875_v27 = vpack.c.bf16 %v4226_v22, %v4218_v21  ;;  %v4297_v22 = vld [vmem:[%s9871_s11 + $0x280] sm:$0xff] }
 0x607   : > { %v3119_v36 = vmul.f32 %v3117_v29, %v7283_v23  ;;  %v3120_v38 = vmul.f32 %v7261_v12, %v3115_v28  ;;  %v4217_v28 = vld [vmem:[%s9871_s11] sm:$0xff] }
 0x608   : > { %10112 = vst [vmem:[#allocation3_spill] sm:$0xff] %v7875_v27  ;;  %5939 = vmatprep.subr.bf16.mxu0 %v7875_v27 }
 0x609   : > { %v3114_v31 = vpop.permute.xlu1 %3113  ;;  %v3234_v32 = vpop.permute.xlu0 %3233 }
 0x60a   : > { %v3116_v33 = vsel %vm516_vm7, %v3110_v26, %v3114_v31  ;;  %v3118_v35 = vsel %vm516_vm7, %v3114_v31, %v3110_v26  ;;  %v3051_v26 = vld [vmem:[%s9869_s9 + $0x20] sm:$0xff] }
 0x60b   : > { %v3121_v39 = vmul.f32 %v3118_v35, %v7283_v23  ;;  %v3122_v40 = vmul.f32 %v7261_v12, %v3116_v33 }
 0x60d   : > { %v5904_v41 = vpack.c.bf16 %v3121_v39, %v3119_v36  ;;  %v3236_v42 = vpop.permute.xlu1 %3235  ;;  %v3238_v43 = vpop.permute.xlu0 %3237  ;;  %v5902_v44 = vpack.c.bf16 %v3122_v40, %v3120_v38  ;;  %v4242_v36 = vld [vmem:[%s9871_s11 + $0xc8] sm:$0xff] }
 0x60e   : > { %v3243_v45 = vsel %vm609_vm12, %v3238_v43, %v3234_v32  ;;  %v3241_v23 = vsel %vm609_vm12, %v3234_v32, %v3238_v43  ;;  %v4234_v32 = vld [vmem:[%s9871_s11 + $0x88] sm:$0xff] }
 0x60f   : > { %5903 = vmatprep.subr.bf16.mxu1 %v5902_v44  ;;  %v3245_v49 = vmul.f32 %v7267_v14, %v3243_v45  ;;  %v7898_v40 = vpack.c.bf16 %v4242_v36, %v4234_v32  ;;  %v4250_v44 = vld [vmem:[%s9871_s11 + $0x108] sm:$0xff]  ;;  %v4321_v36 = vld [vmem:[%s9871_s11 + $0x340] sm:$0xff] }
 0x610   : > { %5905 = vmatpush1.bf16.msra.mxu1 %v5904_v41  ;;  %v4233_v41 = vld [vmem:[%s9871_s11 + $0x80] sm:$0xff]  ;;  %v4258_v45 = vld [vmem:[%s9871_s11 + $0x148] sm:$0xff] }
 0x611   : > { %v3240_v47 = vpop.permute.xlu1 %3239  ;;  %v3359_v48 = vpop.permute.xlu0 %3358  ;;  %10114 = vst [vmem:[#allocation5_spill] sm:$0xff] %v7898_v40 }
 0x612   : > { %v3242_v1 = vsel %vm609_vm12, %v3236_v42, %v3240_v47  ;;  %v3244_v2 = vsel %vm609_vm12, %v3240_v47, %v3236_v42  ;;  %v4241_v42 = vld [vmem:[%s9871_s11 + $0xc0] sm:$0xff]  ;;  %v7919_v47 = vpack.c.bf16 %v4258_v45, %v4250_v44  ;;  %v4346_v45 = vld [vmem:[%s9871_s11 + $0x408] sm:$0xff] }
 0x613   : > { %v3247_v50 = vmul.f32 %v7267_v14, %v3244_v2  ;;  %v5906_v51 = vpack.c.bf16 %v3242_v1, %v3241_v23  ;;  %5862 = vmatmul.mubr.msk.f32.vlgmr.msra.gmra.mrb[8].mxu1 %vm3123_vm0, %v3047_v46  ;;  %v3049_v14 = vld [vmem:[%s9869_s9 + $0x10] sm:$0xff]  ;;  %v7910_v43 = vpack.c.bf16 %v4241_v42, %v4233_v41  ;;  %v4257_v23 = vld [vmem:[%s9871_s11 + $0x140] sm:$0xff]  ;;  %v4266_v1 = vld [vmem:[%s9871_s11 + $0x188] sm:$0xff]  ;;  %v8050_v41 = vpack.c.bf16 %v4338_v16, %v4330_v10 }
 0x614   : > { %3206 = vmatprep.mubr.f32.mxu1 %v7119_v0  ;;  %10116 = vst [vmem:[#allocation7_spill] sm:$0xff] %v7919_v47  ;;  %v4274_v2 = vld [vmem:[%s9871_s11 + $0x1c8] sm:$0xff]  ;;  %v4329_v42 = vld [vmem:[%s9871_s11 + $0x380] sm:$0xff] }
 0x615   : > { %v5908_v54 = vpack.c.bf16 %v3247_v50, %v3245_v49  ;;  %v3361_v55 = vpop.permute.xlu1 %3360  ;;  %5907 = vmatprep.subr.bf16.mxu1 %v5906_v51  ;;  %v3363_v56 = vpop.permute.xlu0 %3362  ;;  %10115 = vst [vmem:[#allocation6_spill] sm:$0xff] %v7910_v43  ;;  %v3053_v49 = vld [vmem:[%s9869_s9 + $0x30] sm:$0xff]  ;;  %v7942_v51 = vpack.c.bf16 %v4274_v2, %v4266_v1  ;;  %10126 = vst [vmem:[#allocation17_spill] sm:$0xff] %v8050_v41  ;;  %v4393_v16 = vld [vmem:[%s9871_s11 + $0x580] sm:$0xff] }
 0x616   : > { %v3366_v57 = vsel %vm700_vm14, %v3359_v48, %v3363_v56  ;;  %v3368_v7 = vsel %vm700_vm14, %v3363_v56, %v3359_v48  ;;  %v4249_v48 = vld [vmem:[%s9871_s11 + $0x100] sm:$0xff]  ;;  %v4290_v56 = vld [vmem:[%s9871_s11 + $0x248] sm:$0xff] }
 0x617   : > { %5863 = vmatmul.mubr.msk.f32.gmra.mrb[10].mxu1 %vm3123_vm0, %v3048_v52  ;;  %v3371_v61 = vmul.f32 %v7273_v18, %v3366_v57  ;;  %v3370_v24 = vmul.f32 %v3368_v7, %v7354_v53  ;;  %v7939_v50 = vpack.c.bf16 %v4257_v23, %v4249_v48  ;;  %10118 = vst [vmem:[#allocation9_spill] sm:$0xff] %v7942_v51  ;;  %v4265_v52 = vld [vmem:[%s9871_s11 + $0x180] sm:$0xff]  ;;  %v4306_v7 = vld [vmem:[%s9871_s11 + $0x2c8] sm:$0xff]  ;;  %v3058_v23 = vld [vmem:[%s9869_s9 + $0x58] sm:$0xff] }
 0x618   : > { %5909 = vmatpush1.bf16.msra.mxu1 %v5908_v54  ;;  %3212 = vmatprep.mubr.f32.mxu1 %v7119_v0  ;;  %v4273_v54 = vld [vmem:[%s9871_s11 + $0x1c0] sm:$0xff] }
 0x619   : > { %v3365_v58 = vpop.permute.xlu1 %3364  ;;  %v7844_v59 = vpop.permute.xlu0 %3483  ;;  %10117 = vst [vmem:[#allocation8_spill] sm:$0xff] %v7939_v50 }
 0x61a   : > { %v3367_v60 = vsel %vm700_vm14, %v3361_v55, %v3365_v58  ;;  %v3369_v62 = vsel %vm700_vm14, %v3365_v58, %v3361_v55  ;;  %v4282_v55 = vld [vmem:[%s9871_s11 + $0x208] sm:$0xff]  ;;  %v7964_v58 = vpack.c.bf16 %v4273_v54, %v4265_v52  ;;  %v4345_v52 = vld [vmem:[%s9871_s11 + $0x400] sm:$0xff] }
 0x61b   : > { %v3373_v63 = vmul.f32 %v7273_v18, %v3367_v60  ;;  %5864 = vmatmul.mubr.msk.f32.gmra.mrb[12].mxu1 %vm3123_vm0, %v3049_v14  ;;  %v3372_v20 = vmul.f32 %v3369_v62, %v7354_v53  ;;  %v4225_v53 = vld [vmem:[%s9871_s11 + $0x40] sm:$0xff]  ;;  %v3054_v14 = vld [vmem:[%s9869_s9 + $0x38] sm:$0xff] }
 0x61c   : > { %3218 = vmatprep.mubr.f32.mxu1 %v7119_v0  ;;  %v7883_v31 = vpack.c.bf16 %v4225_v53, %v4217_v28  ;;  %10119 = vst [vmem:[#allocation10_spill] sm:$0xff] %v7964_v58  ;;  %v4322_v28 = vld [vmem:[%s9871_s11 + $0x348] sm:$0xff]  ;;  %v4353_v54 = vld [vmem:[%s9871_s11 + $0x440] sm:$0xff] }
 0x61d   : > { %v3486_v8 = vpop.permute.xlu1 %3485  ;;  %v3488_v9 = vpop.permute.xlu0 %3487  ;;  %v5910_v15 = vpack.c.bf16 %v3373_v63, %v3371_v61  ;;  %v5912_v33 = vpack.c.bf16 %v3372_v20, %v3370_v24  ;;  %v7970_v61 = vpack.c.bf16 %v4290_v56, %v4282_v55  ;;  %v4281_v63 = vld [vmem:[%s9871_s11 + $0x200] sm:$0xff]  ;;  %v3056_v53 = vld [vmem:[%s9869_s9 + $0x48] sm:$0xff] }
 0x61e   : > { %v3491_v25 = vsel %vm791_vm3, %v7844_v59, %v3488_v9  ;;  %10113 = vst [vmem:[#allocation4_spill] sm:$0xff] %v7883_v31  ;;  %5941 = vmatpush1.bf16.msra.mxu0 %v7883_v31  ;;  %v3493_v60 = vsel %vm791_vm3, %v3488_v9, %v7844_v59  ;;  %v4298_v59 = vld [vmem:[%s9871_s11 + $0x288] sm:$0xff]  ;;  %v3055_v9 = vld [vmem:[%s9869_s9 + $0x40] sm:$0xff] }
 0x61f   : > { %5865 = vmatmul.mubr.msk.f32.gmra.mrb[14].mxu1 %vm3123_vm0, %v3050_v3  ;;  %5911 = vmatprep.subr.bf16.mxu1 %v5910_v15  ;;  %v3496_v38 = vmul.f32 %v7261_v12, %v3491_v25  ;;  %10120 = vst [vmem:[#allocation11_spill] sm:$0xff] %v7970_v61  ;;  %v4289_v3 = vld [vmem:[%s9871_s11 + $0x240] sm:$0xff]  ;;  %v7995_v21 = vpack.c.bf16 %v4306_v7, %v4298_v59  ;;  %v4362_v56 = vld [vmem:[%s9871_s11 + $0x488] sm:$0xff] }
 0x620   : > { %3325 = vmatprep.mubr.f32.mxu1 %v7119_v0  ;;  %5943 = vmatprep.subr.bf16.mxu0 %v7898_v40  ;;  %v7993_v15 = vpack.c.bf16 %v4289_v3, %v4281_v63  ;;  %v4305_v24 = vld [vmem:[%s9871_s11 + $0x2c0] sm:$0xff] }
 0x621   : > { %v3490_v29 = vpop.permute.xlu1 %3489  ;;  %10122 = vst [vmem:[#allocation13_spill] sm:$0xff] %v7995_v21  ;;  %v8022_v32 = vpack.c.bf16 %v4305_v24, %v4297_v22  ;;  %v4361_v3 = vld [vmem:[%s9871_s11 + $0x480] sm:$0xff] }
 0x622   : > { %v3492_v35 = vsel %vm791_vm3, %v3486_v8, %v3490_v29  ;;  %5945 = vmatpush1.bf16.msra.mxu0 %v7910_v43  ;;  %v3494_v57 = vsel %vm791_vm3, %v3490_v29, %v3486_v8  ;;  %v3495_v8 = vmul.f32 %v7264_v13, %v3493_v60  ;;  %10121 = vst [vmem:[#allocation12_spill] sm:$0xff] %v7993_v15  ;;  %v8016_v29 = vpop.permute.xlu0 %3717  ;;  %v4369_v59 = vld [vmem:[%s9871_s11 + $0x4c0] sm:$0xff] }
 0x623   : > { %v3498_v39 = vmul.f32 %v7261_v12, %v3492_v35  ;;  %5866 = vmatmul.mubr.msk.f32.vlgmr.msra.gmra.mrb[8].mxu1 %vm3123_vm0, %v3051_v26  ;;  %v3052_v12 = vld [vmem:[%s9869_s9 + $0x28] sm:$0xff]  ;;  %5947 = vmatprep.subr.bf16.mxu0 %v7919_v47  ;;  %v3497_v62 = vmul.f32 %v7264_v13, %v3494_v57  ;;  %10123 = vst [vmem:[#allocation14_spill] sm:$0xff] %v8022_v32  ;;  %v4313_v35 = vld [vmem:[%s9871_s11 + $0x300] sm:$0xff] }
 0x624   : > { %5913 = vmatpush1.bf16.msra.mxu1 %v5912_v33  ;;  %3331 = vmatprep.mubr.f32.mxu1 %v7119_v0  ;;  %v4314_v26 = vld [vmem:[%s9871_s11 + $0x308] sm:$0xff]  ;;  %v8135_v24 = vpack.c.bf16 %v4369_v59, %v4361_v3 }
 0x625   : > { %v5914_v46 = vpack.c.bf16 %v3498_v39, %v3496_v38  ;;  %v5916_v20 = vpack.c.bf16 %v3497_v62, %v3495_v8  ;;  %v8003_v25 = vpop.permute.xlu1 %3719  ;;  %v8025_v33 = vpack.c.bf16 %v4322_v28, %v4314_v26  ;;  %v8047_v39 = vpack.c.bf16 %v4321_v36, %v4313_v35  ;;  %v4370_v57 = vld [vmem:[%s9871_s11 + $0x4c8] sm:$0xff] }
 0x626   : > { %5949 = vmatpush1.bf16.msra.mxu0 %v7939_v50  ;;  %v8058_v44 = vpop.permute.xlu0 %3721  ;;  %v8105_v62 = vpack.c.bf16 %v4353_v54, %v4345_v52  ;;  %v8108_v63 = vpack.c.bf16 %v4370_v57, %v4362_v56  ;;  %v4378_v8 = vld [vmem:[%s9871_s11 + $0x508] sm:$0xff]  ;;  %10131 = vst [vmem:[#allocation22_spill] sm:$0xff] %v8135_v24  ;;  %v8158_v36 = vpack.c.bf16 %v4385_v11, %v4377_v5 }
 0x627   : > { %5867 = vmatmul.mubr.msk.f32.gmra.mrb[10].mxu1 %vm3123_vm0, %v3052_v12  ;;  %5915 = vmatprep.subr.bf16.mxu1 %v5914_v46  ;;  %10124 = vst [vmem:[#allocation15_spill] sm:$0xff] %v8025_v33  ;;  %10125 = vst [vmem:[#allocation16_spill] sm:$0xff] %v8047_v39  ;;  %v4337_v12 = vld [vmem:[%s9871_s11 + $0x3c0] sm:$0xff]  ;;  %v4354_v46 = vld [vmem:[%s9871_s11 + $0x448] sm:$0xff]  ;;  %v3727_v2 = vsel %vm962_vm5, %v8058_v44, %v8016_v29 }
 0x628   : > { %3337 = vmatprep.mubr.f32.mxu1 %v7119_v0  ;;  %5951 = vmatprep.subr.bf16.mxu0 %v7942_v51  ;;  %v8076_v1 = vpack.c.bf16 %v4337_v12, %v4329_v42  ;;  %v3730_v60 = vmul.f32 %v7273_v18, %v3727_v2  ;;  %10129 = vst [vmem:[#allocation20_spill] sm:$0xff] %v8105_v62  ;;  %10130 = vst [vmem:[#allocation21_spill] sm:$0xff] %v8108_v63  ;;  %v4402_v28 = vld [vmem:[%s9871_s11 + $0x5c8] sm:$0xff] }
 0x629   : > { %v8044_v38 = vpop.permute.xlu1 %3723  ;;  %10133 = vst [vmem:[#allocation24_spill] sm:$0xff] %v8158_v36  ;;  %v4426_v56 = vld [vmem:[%s9871_s11 + $0x688] sm:$0xff] }
 0x62a   : > { %5953 = vmatpush1.bf16.msra.mxu0 %v7964_v58  ;;  %v3728_v48 = vsel %vm962_vm5, %v8044_v38, %v8003_v25  ;;  %10127 = vst [vmem:[#allocation18_spill] sm:$0xff] %v8076_v1  ;;  %v8132_v22 = vpop.permute.xlu0 %3842  ;;  %v3726_v42 = vsel %vm962_vm5, %v8003_v25, %v8044_v38  ;;  %v3062_v25 = vld [vmem:[%s9869_s9 + $0x78] sm:$0xff]  ;;  %v3725_v38 = vsel %vm962_vm5, %v8016_v29, %v8058_v44  ;;  %v4417_v29 = vld [vmem:[%s9871_s11 + $0x640] sm:$0xff]  ;;  %v4434_v57 = vld [vmem:[%s9871_s11 + $0x6c8] sm:$0xff] }
 0x62b   : > { %5868 = vmatmul.mubr.msk.f32.gmra.mrb[12].mxu1 %vm3123_vm0, %v3053_v49  ;;  %5955 = vmatprep.subr.bf16.mxu0 %v7970_v61  ;;  %v8083_v49 = vpack.c.bf16 %v4354_v46, %v4346_v45  ;;  %v3732_v55 = vmul.f32 %v7273_v18, %v3728_v48  ;;  %v4410_v45 = vld [vmem:[%s9871_s11 + $0x608] sm:$0xff]  ;;  %v3731_v2 = vmul.f32 %v7311_v34, %v3726_v42 }
 0x62c   : > { %3343 = vmatprep.mubr.f32.mxu1 %v7119_v0  ;;  %v4418_v46 = vld [vmem:[%s9871_s11 + $0x648] sm:$0xff] }
 0x62d   : > { %10128 = vst [vmem:[#allocation19_spill] sm:$0xff] %v8083_v49  ;;  %v8116_v7 = vpop.permute.xlu1 %3844  ;;  %v5922_v18 = vpack.c.bf16 %v3732_v55, %v3730_v60  ;;  %v8199_v54 = vpack.c.bf16 %v4418_v46, %v4410_v45  ;;  %v4409_v55 = vld [vmem:[%s9871_s11 + $0x600] sm:$0xff]  ;;  %v3064_v11 = vld [vmem:[%s9869_s9 + $0x88] sm:$0xff]  ;;  %v3066_v46 = vld [vmem:[%s9869_s9 + $0x98] sm:$0xff] }
 0x62e   : > { %5957 = vmatpush1.bf16.msra.mxu0 %v7993_v15  ;;  %v3847_v12 = vpop.permute.xlu0 %3846  ;;  %v3063_v60 = vld [vmem:[%s9869_s9 + $0x80] sm:$0xff]  ;;  %v8222_v59 = vpack.c.bf16 %v4417_v29, %v4409_v55 }
 0x62f   : > { %5869 = vmatmul.mubr.msk.f32.gmra.mrb[14].mxu1 %vm3123_vm0, %v3054_v14  ;;  %5959 = vmatprep.subr.bf16.mxu0 %v7995_v21  ;;  %v3059_v14 = vld [vmem:[%s9869_s9 + $0x60] sm:$0xff]  ;;  %v3852_v52 = vsel %vm1053_vm11, %v3847_v12, %v8132_v22  ;;  %10136 = vst [vmem:[#allocation27_spill] sm:$0xff] %v8199_v54 }
 0x630   : > { %3450 = vmatprep.mubr.f32.mxu1 %v7119_v0  ;;  %v3855_v3 = vmul.f32 %v3852_v52, %v7318_v37  ;;  %10137 = vst [vmem:[#allocation28_spill] sm:$0xff] %v8222_v59 }
 0x631   : > { %v3849_v35 = vpop.permute.xlu1 %3848 }
 0x632   : > { %5961 = vmatpush1.bf16.msra.mxu0 %v8022_v32  ;;  %v3853_v48 = vsel %vm1053_vm11, %v3849_v35, %v8116_v7 }
 0x633   : > { %5870 = vmatmul.mubr.msk.f32.vlgmr.msra.gmra.mrb[8].mxu1 %vm3123_vm0, %v3055_v9  ;;  %5963 = vmatprep.subr.bf16.mxu0 %v8025_v33  ;;  %v4386_v9 = vld [vmem:[%s9871_s11 + $0x548] sm:$0xff]  ;;  %v3857_v44 = vmul.f32 %v3853_v48, %v7318_v37  ;;  %v3850_v48 = vsel %vm1053_vm11, %v8132_v22, %v3847_v12 }
 0x634   : > { %5917 = vmatpush1.bf16.msra.mxu1 %v5916_v20  ;;  %3456 = vmatprep.mubr.f32.mxu1 %v7119_v0  ;;  %v3060_v20 = vld [vmem:[%s9869_s9 + $0x68] sm:$0xff]  ;;  %v8138_v26 = vpack.c.bf16 %v4386_v9, %v4378_v8  ;;  %v8225_v8 = vpack.c.bf16 %v4434_v57, %v4426_v56  ;;  %v4425_v9 = vld [vmem:[%s9871_s11 + $0x680] sm:$0xff] }
 0x635   : > { %5919 = vmatprep.subr.bf16.mxu1 %v5918_v19  ;;  %v3057_v19 = vld [vmem:[%s9869_s9 + $0x50] sm:$0xff]  ;;  %v3970_v5 = vpop.permute.xlu1 %3969  ;;  %v5926_v37 = vpack.c.bf16 %v3857_v44, %v3855_v3 }
 0x636   : > { %5965 = vmatpush1.bf16.msra.mxu0 %v8047_v39  ;;  %10132 = vst [vmem:[#allocation23_spill] sm:$0xff] %v8138_v26  ;;  %10138 = vst [vmem:[#allocation29_spill] sm:$0xff] %v8225_v8 }
 0x637   : > { %5871 = vmatmul.mubr.msk.f32.gmra.mrb[10].mxu1 %vm3123_vm0, %v3056_v53  ;;  %5967 = vmatprep.subr.bf16.mxu0 %v8050_v41  ;;  %v3061_v53 = vld [vmem:[%s9869_s9 + $0x70] sm:$0xff] }
 0x638   : > { %3462 = vmatprep.mubr.f32.mxu1 %v7119_v0 }
 0x63a   : > { %5969 = vmatpush1.bf16.msra.mxu0 %v8076_v1 }
 0x63b   : > { %5872 = vmatmul.mubr.msk.f32.gmra.mrb[12].mxu1 %vm3123_vm0, %v3057_v19  ;;  %5971 = vmatprep.subr.bf16.mxu0 %v8083_v49  ;;  %v4401_v19 = vld [vmem:[%s9871_s11 + $0x5c0] sm:$0xff] }
 0x63c   : > { %3468 = vmatprep.mubr.f32.mxu1 %v7119_v0 }
 0x63e   : > { %5973 = vmatpush1.bf16.msra.mxu0 %v8105_v62 }
 0x63f   : > { %5873 = vmatmul.mubr.msk.f32.gmra.mrb[14].mxu1 %vm3123_vm0, %v3058_v23  ;;  %5975 = vmatprep.subr.bf16.mxu0 %v8108_v63  ;;  %v8192_v23 = vpack.c.bf16 %v4401_v19, %v4393_v16  ;;  %v3974_v16 = vpop.permute.xlu1 %3973  ;;  %v3851_v19 = vsel %vm1053_vm11, %v8116_v7, %v3849_v35 }
 0x640   : > { %3575 = vmatprep.mubr.f32.mxu1 %v7119_v0  ;;  %v3978_v45 = vsel %vm1144_vm13, %v3974_v16, %v3970_v5  ;;  %v3976_v3 = vsel %vm1144_vm13, %v3970_v5, %v3974_v16  ;;  %v3072_v5 = vld [vmem:[%s9869_s9 + $0xc8] sm:$0xff]  ;;  %v3074_v16 = vld [vmem:[%s9869_s9 + $0xd8] sm:$0xff] }
 0x641   : > { %10135 = vst [vmem:[#allocation26_spill] sm:$0xff] %v8192_v23  ;;  %v3982_v35 = vmul.f32 %v7296_v30, %v3978_v45  ;;  %v4222_v45 = vld [vmem:[%s9871_s11 + $0x28] sm:$0xff] }
 0x642   : > { %5977 = vmatpush1.bf16.msra.mxu0 %v8135_v24 }
 0x643   : > { %5874 = vmatmul.mubr.msk.f32.vlgmr.msra.gmra.mrb[8].mxu1 %vm3123_vm0, %v3059_v14  ;;  %5979 = vmatprep.subr.bf16.mxu0 %v8138_v26  ;;  %v3729_v14 = vmul.f32 %v7311_v34, %v3725_v38  ;;  %v3854_v38 = vmul.f32 %v7264_v13, %v3850_v48  ;;  %v4095_v12 = vpop.permute.xlu1 %4094 }
 0x644   : > { %5921 = vmatpush1.bf16.msra.mxu1 %v5920_v17  ;;  %3581 = vmatprep.mubr.f32.mxu1 %v7119_v0  ;;  %v4394_v17 = vld [vmem:[%s9871_s11 + $0x588] sm:$0xff] }
 0x645   : > { %5923 = vmatprep.subr.bf16.mxu1 %v5922_v18  ;;  %v8161_v10 = vpack.c.bf16 %v4402_v28, %v4394_v17  ;;  %v5924_v18 = vpack.c.bf16 %v3731_v2, %v3729_v14  ;;  %v3968_v17 = vpop.permute.xlu0 %3967  ;;  %v3067_v2 = vld [vmem:[%s9869_s9 + $0xa0] sm:$0xff]  ;;  %v3070_v14 = vld [vmem:[%s9869_s9 + $0xb8] sm:$0xff] }
 0x646   : > { %5981 = vmatpush1.bf16.msra.mxu0 %v8158_v36 }
 0x647   : > { %5875 = vmatmul.mubr.msk.f32.gmra.mrb[10].mxu1 %vm3123_vm0, %v3060_v20  ;;  %10134 = vst [vmem:[#allocation25_spill] sm:$0xff] %v8161_v10  ;;  %5983 = vmatprep.subr.bf16.mxu0 %v8161_v10  ;;  %v4433_v20 = vld [vmem:[%s9871_s11 + $0x6c0] sm:$0xff]  ;;  %v4099_v44 = vpop.permute.xlu1 %4098 }
 0x648   : > { %3587 = vmatprep.mubr.f32.mxu1 %v7119_v0  ;;  %v8239_v28 = vpack.c.bf16 %v4433_v20, %v4425_v9  ;;  %v4103_v57 = vsel %vm1235_vm15, %v4099_v44, %v4095_v12  ;;  %v3071_v9 = vld [vmem:[%s9869_s9 + $0xc0] sm:$0xff] }
 0x649   : > { %v3972_v42 = vpop.permute.xlu0 %3971 }
 0x64a   : > { %5985 = vmatpush1.bf16.msra.mxu0 %v8192_v23  ;;  %10139 = vst [vmem:[#allocation30_spill] sm:$0xff] %v8239_v28  ;;  %v3977_v7 = vsel %vm1144_vm13, %v3972_v42, %v3968_v17  ;;  %v3975_v20 = vsel %vm1144_vm13, %v3968_v17, %v3972_v42  ;;  %v4101_v17 = vsel %vm1235_vm15, %v4095_v12, %v4099_v44  ;;  %v4238_v12 = vld [vmem:[%s9871_s11 + $0xa8] sm:$0xff]  ;;  %v4237_v44 = vld [vmem:[%s9871_s11 + $0xa0] sm:$0xff] }
 0x64b   : > { %5876 = vmatmul.mubr.msk.f32.gmra.mrb[12].mxu1 %vm3123_vm0, %v3061_v53  ;;  %5987 = vmatprep.subr.bf16.mxu0 %v8199_v54  ;;  %v3065_v53 = vld [vmem:[%s9869_s9 + $0x90] sm:$0xff]  ;;  %v3980_v52 = vmul.f32 %v7296_v30, %v3977_v7  ;;  %v4106_v42 = vmul.f32 %v7311_v34, %v4101_v17  ;;  %v4269_v17 = vld [vmem:[%s9871_s11 + $0x1a0] sm:$0xff] }
 0x64c   : > { %3593 = vmatprep.mubr.f32.mxu1 %v7119_v0  ;;  %v3069_v30 = vld [vmem:[%s9869_s9 + $0xb0] sm:$0xff] }
 0x64d   : > { %v5930_v55 = vpack.c.bf16 %v3982_v35, %v3980_v52  ;;  %v4093_v29 = vpop.permute.xlu0 %4092  ;;  %v4221_v52 = vld [vmem:[%s9871_s11 + $0x20] sm:$0xff] }
 0x64e   : > { %5989 = vmatpush1.bf16.msra.mxu0 %v8222_v59 }
 0x64f   : > { %5877 = vmatmul.mubr.msk.f32.gmra.mrb[14].mxu1 %vm3123_vm0, %v3062_v25  ;;  %5991 = vmatprep.subr.bf16.mxu0 %v8225_v8  ;;  %v3856_v25 = vmul.f32 %v7264_v13, %v3851_v19  ;;  %v3068_v13 = vld [vmem:[%s9869_s9 + $0xa8] sm:$0xff] }
 0x650   : > { %3684 = vmatprep.mubr.f32.mxu1 %v7119_v0 }
 0x651   : > { %v5928_v22 = vpack.c.bf16 %v3856_v25, %v3854_v38  ;;  %v4097_v56 = vpop.permute.xlu0 %4096  ;;  %v3075_v25 = vld [vmem:[%s9869_s9 + $0xe0] sm:$0xff]  ;;  %v3076_v38 = vld [vmem:[%s9869_s9 + $0xe8] sm:$0xff] }
 0x652   : > { %5993 = vmatpush1.bf16.msra.mxu0 %v8239_v28  ;;  %v4100_v19 = vsel %vm1235_vm15, %v4093_v29, %v4097_v56 }
 0x653   : > { %5878 = vmatmul.mubr.msk.f32.vlgmr.msra.gmra.mrb[8].mxu1 %vm3123_vm0, %v3063_v60  ;;  %v4102_v60 = vsel %vm1235_vm15, %v4097_v56, %v4093_v29  ;;  %v4104_v48 = vmul.f32 %v7311_v34, %v4100_v19  ;;  %v3077_v34 = vld [vmem:[%s9869_s9 + $0xf0] sm:$0xff]  ;;  %v4245_v56 = vld [vmem:[%s9871_s11 + $0xe0] sm:$0xff]  ;;  %v4286_v19 = vld [vmem:[%s9871_s11 + $0x228] sm:$0xff] }
 0x654   : > { %5925 = vmatpush1.bf16.msra.mxu1 %v5924_v18  ;;  %3690 = vmatprep.mubr.f32.mxu1 %v7119_v0  ;;  %v4107_v18 = vmul.f32 %v4103_v57, %v7380_v4  ;;  %v4254_v57 = vld [vmem:[%s9871_s11 + $0x128] sm:$0xff] }
 0x655   : > { %5927 = vmatprep.subr.bf16.mxu1 %v5926_v37  ;;  %v4105_v37 = vmul.f32 %v4102_v60, %v7380_v4  ;;  %v3073_v4 = vld [vmem:[%s9869_s9 + $0xd0] sm:$0xff]  ;;  %v5936_v35 = vpack.c.bf16 %v4106_v42, %v4104_v48  ;;  %v3080_v60 = vld [vmem:[%s9869_s9 + $0x108] sm:$0xff] }
 0x656   : > { %v4294_v42 = vld [vmem:[%s9871_s11 + $0x268] sm:$0xff] }
 0x657   : > { %5879 = vmatmul.mubr.msk.f32.gmra.mrb[10].mxu1 %vm3123_vm0, %v3064_v11  ;;  %v5932_v11 = vpack.c.bf16 %v3976_v3, %v3975_v20  ;;  %v8391_v3 = vpack.c.bf16 %v4245_v56, %v4237_v44  ;;  %v4261_v20 = vld [vmem:[%s9871_s11 + $0x160] sm:$0xff]  ;;  %v8440_v48 = vpack.c.bf16 %v4294_v42, %v4286_v19 }
 0x658   : > { %3696 = vmatprep.mubr.f32.mxu1 %v7119_v0  ;;  %v4317_v56 = vld [vmem:[%s9871_s11 + $0x320] sm:$0xff] }
 0x659   : > { %10145 = vst [vmem:[#allocation36_spill] sm:$0xff] %v8440_v48  ;;  %v4349_v42 = vld [vmem:[%s9871_s11 + $0x420] sm:$0xff] }
 0x65b   : > { %5880 = vmatmul.mubr.msk.f32.gmra.mrb[12].mxu1 %vm3123_vm0, %v3065_v53  ;;  %v5934_v53 = vpack.c.bf16 %v4107_v18, %v4105_v37  ;;  %v4270_v37 = vld [vmem:[%s9871_s11 + $0x1a8] sm:$0xff] }
 0x65c   : > { %3702 = vmatprep.mubr.f32.mxu1 %v7119_v0 }
 0x65f   : > { %5881 = vmatmul.mubr.msk.f32.gmra.mrb[14].mxu1 %vm3123_vm0, %v3066_v46  ;;  %v4230_v46 = vld [vmem:[%s9871_s11 + $0x68] sm:$0xff] }
 0x660   : > { %3809 = vmatprep.mubr.f32.mxu1 %v7119_v0  ;;  %v8334_v7 = vpack.c.bf16 %v4230_v46, %v4222_v45  ;;  %v3082_v45 = vld [vmem:[%s9869_s9 + $0x118] sm:$0xff] }
 0x663   : > { %5882 = vmatmul.mubr.msk.f32.vlgmr.msra.gmra.mrb[8].mxu1 %vm3123_vm0, %v3067_v2  ;;  %v3078_v2 = vld [vmem:[%s9869_s9 + $0xf8] sm:$0xff] }
 0x664   : > { %5929 = vmatpush1.bf16.msra.mxu1 %v5928_v22  ;;  %3815 = vmatprep.mubr.f32.mxu1 %v7119_v0  ;;  %v4229_v22 = vld [vmem:[%s9871_s11 + $0x60] sm:$0xff] }
 0x665   : > { %5931 = vmatprep.subr.bf16.mxu1 %v5930_v55  ;;  %v4246_v55 = vld [vmem:[%s9871_s11 + $0xe8] sm:$0xff]  ;;  %v8369_v29 = vpack.c.bf16 %v4229_v22, %v4221_v52  ;;  %v4301_v52 = vld [vmem:[%s9871_s11 + $0x2a0] sm:$0xff] }
 0x666   : > { %v4309_v22 = vld [vmem:[%s9871_s11 + $0x2e0] sm:$0xff] }
 0x667   : > { %5883 = vmatmul.mubr.msk.f32.gmra.mrb[10].mxu1 %vm3123_vm0, %v3068_v13  ;;  %v3079_v13 = vld [vmem:[%s9869_s9 + $0x100] sm:$0xff]  ;;  %10140 = vst [vmem:[#allocation31_spill] sm:$0xff] %v8369_v29 }
 0x668   : > { %3821 = vmatprep.mubr.f32.mxu1 %v7119_v0 }
 0x66b   : > { %5884 = vmatmul.mubr.msk.f32.gmra.mrb[12].mxu1 %vm3123_vm0, %v3069_v30  ;;  %v8371_v30 = vpack.c.bf16 %v4246_v55, %v4238_v12  ;;  %v4318_v12 = vld [vmem:[%s9871_s11 + $0x328] sm:$0xff] }
 0x66c   : > { %3827 = vmatprep.mubr.f32.mxu1 %v7119_v0  ;;  %v4326_v55 = vld [vmem:[%s9871_s11 + $0x368] sm:$0xff] }
 0x66d   : > { %10141 = vst [vmem:[#allocation32_spill] sm:$0xff] %v8371_v30  ;;  %v8477_v44 = vpack.c.bf16 %v4326_v55, %v4318_v12  ;;  %v4382_v12 = vld [vmem:[%s9871_s11 + $0x528] sm:$0xff] }
 0x66e   : > { %v4390_v55 = vld [vmem:[%s9871_s11 + $0x568] sm:$0xff] }
 0x66f   : > { %5885 = vmatmul.mubr.msk.f32.gmra.mrb[14].mxu1 %vm3123_vm0, %v3070_v14  ;;  %v4262_v14 = vld [vmem:[%s9871_s11 + $0x168] sm:$0xff]  ;;  %10148 = vst [vmem:[#allocation39_spill] sm:$0xff] %v8477_v44 }
 0x670   : > { %3934 = vmatprep.mubr.f32.mxu1 %v7119_v0  ;;  %v8394_v18 = vpack.c.bf16 %v4262_v14, %v4254_v57  ;;  %v4325_v57 = vld [vmem:[%s9871_s11 + $0x360] sm:$0xff]  ;;  %v4334_v14 = vld [vmem:[%s9871_s11 + $0x3a8] sm:$0xff] }
 0x672   : > { %10142 = vst [vmem:[#allocation33_spill] sm:$0xff] %v8394_v18 }
 0x673   : > { %5886 = vmatmul.mubr.msk.f32.vlgmr.msra.gmra.mrb[8].mxu1 %vm3123_vm0, %v3071_v9  ;;  %v4253_v9 = vld [vmem:[%s9871_s11 + $0x120] sm:$0xff] }
 0x674   : > { %5933 = vmatpush1.bf16.msra.mxu1 %v5932_v11  ;;  %3940 = vmatprep.mubr.f32.mxu1 %v7119_v0  ;;  %v4278_v11 = vld [vmem:[%s9871_s11 + $0x1e8] sm:$0xff] }
 0x675   : > { %5935 = vmatprep.subr.bf16.mxu1 %v5934_v53  ;;  %v3081_v53 = vld [vmem:[%s9869_s9 + $0x110] sm:$0xff] }
 0x677   : > { %5887 = vmatmul.mubr.msk.f32.gmra.mrb[10].mxu1 %vm3123_vm0, %v3072_v5  ;;  %v8414_v5 = vpack.c.bf16 %v4261_v20, %v4253_v9  ;;  %v8492_v9 = vpack.c.bf16 %v4325_v57, %v4317_v56  ;;  %v8549_v57 = vpack.c.bf16 %v4390_v55, %v4382_v12  ;;  %v4413_v12 = vld [vmem:[%s9871_s11 + $0x620] sm:$0xff] }
 0x678   : > { %3946 = vmatprep.mubr.f32.mxu1 %v7119_v0  ;;  %v4421_v55 = vld [vmem:[%s9871_s11 + $0x660] sm:$0xff] }
 0x679   : > { %10143 = vst [vmem:[#allocation34_spill] sm:$0xff] %v8414_v5  ;;  %10149 = vst [vmem:[#allocation40_spill] sm:$0xff] %v8492_v9 }
 0x67a   : > { %10156 = vst [vmem:[#allocation47_spill] sm:$0xff] %v8549_v57 }
 0x67b   : > { %5888 = vmatmul.mubr.msk.f32.gmra.mrb[12].mxu1 %vm3123_vm0, %v3073_v4  ;;  %v8417_v4 = vpack.c.bf16 %v4278_v11, %v4270_v37  ;;  %v4333_v37 = vld [vmem:[%s9871_s11 + $0x3a0] sm:$0xff] }
 0x67c   : > { %3952 = vmatprep.mubr.f32.mxu1 %v7119_v0  ;;  %v4341_v11 = vld [vmem:[%s9871_s11 + $0x3e0] sm:$0xff] }
 0x67d   : > { %10144 = vst [vmem:[#allocation35_spill] sm:$0xff] %v8417_v4 }
 0x67f   : > { %5889 = vmatmul.mubr.msk.f32.gmra.mrb[14].mxu1 %vm3123_vm0, %v3074_v16  ;;  %v4277_v16 = vld [vmem:[%s9871_s11 + $0x1e0] sm:$0xff] }
 0x680   : > { %4059 = vmatprep.mubr.f32.mxu1 %v7119_v0  ;;  %v8437_v46 = vpack.c.bf16 %v4277_v16, %v4269_v17  ;;  %v4358_v17 = vld [vmem:[%s9871_s11 + $0x468] sm:$0xff]  ;;  %v8510_v16 = vpack.c.bf16 %v4341_v11, %v4333_v37 }
 0x681   : > { %v4398_v37 = vld [vmem:[%s9871_s11 + $0x5a8] sm:$0xff] }
 0x682   : > { %10151 = vst [vmem:[#allocation42_spill] sm:$0xff] %v8510_v16  ;;  %v4406_v11 = vld [vmem:[%s9871_s11 + $0x5e8] sm:$0xff] }
 0x683   : > { %5890 = vmatmul.mubr.msk.f32.vlgmr.msra.gmra.mrb[8].mxu1 %vm3123_vm0, %v3075_v25  ;;  %v4285_v25 = vld [vmem:[%s9871_s11 + $0x220] sm:$0xff] }
 0x684   : > { %5937 = vmatpush1.bf16.msra.mxu1 %v5936_v35  ;;  %4065 = vmatprep.mubr.f32.mxu1 %v7119_v0  ;;  %v4302_v35 = vld [vmem:[%s9871_s11 + $0x2a8] sm:$0xff] }
 0x685   : > { %6067 = vmatprep.subr.bf16.mxu1 %v8334_v7 }
 0x687   : > { %5891 = vmatmul.mubr.msk.f32.gmra.mrb[10].mxu1 %vm3123_vm0, %v3076_v38  ;;  %v4310_v38 = vld [vmem:[%s9871_s11 + $0x2e8] sm:$0xff] }
 0x688   : > { %4071 = vmatprep.mubr.f32.mxu1 %v7119_v0 }
 0x68b   : > { %5892 = vmatmul.mubr.msk.f32.gmra.mrb[12].mxu1 %vm3123_vm0, %v3077_v34 }
 0x68c   : > { %4077 = vmatprep.mubr.f32.mxu1 %v7119_v0 }
 0x68f   : > { %5893 = vmatmul.mubr.msk.f32.gmra.mrb[14].mxu1 %vm3123_vm0, %v3078_v2  ;;  %v8459_v2 = vpack.c.bf16 %v4310_v38, %v4302_v35 }
 0x690   : > { %4184 = vmatprep.mubr.f32.mxu1 %v7119_v0 }
 0x691   : > { %10146 = vst [vmem:[#allocation37_spill] sm:$0xff] %v8459_v2 }
 0x693   : > { %5894 = vmatmul.mubr.msk.f32.vlgmr.msra.gmra.mrb[8].mxu1 %vm3123_vm0, %v3079_v13  ;;  %v8474_v13 = vpack.c.bf16 %v4309_v22, %v4301_v52  ;;  %v4365_v52 = vld [vmem:[%s9871_s11 + $0x4a0] sm:$0xff] }
 0x694   : > { %4190 = vmatprep.mubr.f32.mxu1 %v7119_v0  ;;  %6069 = vmatpush1.bf16.msra.mxu1 %v8369_v29  ;;  %v4373_v22 = vld [vmem:[%s9871_s11 + $0x4e0] sm:$0xff] }
 0x695   : > { %6071 = vmatprep.subr.bf16.mxu1 %v8371_v30  ;;  %10147 = vst [vmem:[#allocation38_spill] sm:$0xff] %v8474_v13  ;;  %v8546_v56 = vpack.c.bf16 %v4373_v22, %v4365_v52 }
 0x697   : > { %5895 = vmatmul.mubr.msk.f32.gmra.mrb[10].mxu1 %vm3123_vm0, %v3080_v60  ;;  %v4342_v60 = vld [vmem:[%s9871_s11 + $0x3e8] sm:$0xff]  ;;  %10155 = vst [vmem:[#allocation46_spill] sm:$0xff] %v8546_v56 }
 0x698   : > { %4196 = vmatprep.mubr.f32.mxu1 %v7119_v0  ;;  %6073 = vmatpush1.bf16.msra.mxu1 %v8391_v3  ;;  %v8495_v20 = vpack.c.bf16 %v4342_v60, %v4334_v14  ;;  %v4381_v14 = vld [vmem:[%s9871_s11 + $0x520] sm:$0xff] }
 0x699   : > { %6075 = vmatprep.subr.bf16.mxu1 %v8394_v18  ;;  %v4389_v60 = vld [vmem:[%s9871_s11 + $0x560] sm:$0xff] }
 0x69a   : > { %10150 = vst [vmem:[#allocation41_spill] sm:$0xff] %v8495_v20 }
 0x69b   : > { %5896 = vmatmul.mubr.msk.f32.gmra.mrb[12].mxu1 %vm3123_vm0, %v3081_v53  ;;  %v4350_v53 = vld [vmem:[%s9871_s11 + $0x428] sm:$0xff] }
 0x69c   : > { %4202 = vmatprep.mubr.f32.mxu1 %v7119_v0  ;;  %6077 = vmatpush1.bf16.msra.mxu1 %v8414_v5  ;;  %v4293_v0 = vld [vmem:[%s9871_s11 + $0x260] sm:$0xff]  ;;  %v8513_v19 = vpack.c.bf16 %v4358_v17, %v4350_v53  ;;  %v8564_v53 = vpack.c.bf16 %v4389_v60, %v4381_v14  ;;  %v8567_v17 = vpack.c.bf16 %v4406_v11, %v4398_v37  ;;  %v4430_v14 = vld [vmem:[%s9871_s11 + $0x6a8] sm:$0xff] }
 0x69d   : > { %6079 = vmatprep.subr.bf16.mxu1 %v8417_v4  ;;  %v8456_v34 = vpack.c.bf16 %v4293_v0, %v4285_v25  ;;  %v4366_v25 = vld [vmem:[%s9871_s11 + $0x4a8] sm:$0xff]  ;;  %v8600_v37 = vpack.c.bf16 %v4421_v55, %v4413_v12 }
 0x69e   : > { %10152 = vst [vmem:[#allocation43_spill] sm:$0xff] %v8513_v19  ;;  %v4374_v0 = vld [vmem:[%s9871_s11 + $0x4e8] sm:$0xff]  ;;  %10157 = vst [vmem:[#allocation48_spill] sm:$0xff] %v8564_v53 }
 0x69f   : > { %5897 = vmatmul.mubr.msk.f32.gmra.mrb[14].mxu1 %vm3123_vm0, %v3082_v45  ;;  %v4357_v45 = vld [vmem:[%s9871_s11 + $0x460] sm:$0xff]  ;;  %v8531_v38 = vpack.c.bf16 %v4374_v0, %v4366_v25  ;;  %10158 = vst [vmem:[#allocation49_spill] sm:$0xff] %v8567_v17  ;;  %v4414_v25 = vld [vmem:[%s9871_s11 + $0x628] sm:$0xff]  ;;  %10161 = vst [vmem:[#allocation52_spill] sm:$0xff] %v8600_v37 }
 0x6a0   : > { %6081 = vmatpush1.bf16.msra.mxu1 %v8437_v46  ;;  %v8528_v35 = vpack.c.bf16 %v4357_v45, %v4349_v42  ;;  %v4397_v42 = vld [vmem:[%s9871_s11 + $0x5a0] sm:$0xff]  ;;  %v4422_v0 = vld [vmem:[%s9871_s11 + $0x668] sm:$0xff] }
 0x6a1   : > { %6083 = vmatprep.subr.bf16.mxu1 %v8440_v48  ;;  %10154 = vst [vmem:[#allocation45_spill] sm:$0xff] %v8531_v38  ;;  %v4405_v45 = vld [vmem:[%s9871_s11 + $0x5e0] sm:$0xff]  ;;  %v8585_v22 = vpack.c.bf16 %v4422_v0, %v4414_v25  ;;  %v4438_v60 = vld [vmem:[%s9871_s11 + $0x6e8] sm:$0xff] }
 0x6a2   : > { %10153 = vst [vmem:[#allocation44_spill] sm:$0xff] %v8528_v35  ;;  %v8582_v52 = vpack.c.bf16 %v4405_v45, %v4397_v42  ;;  %v8603_v11 = vpack.c.bf16 %v4438_v60, %v4430_v14  ;;  %v4429_v42 = vld [vmem:[%s9871_s11 + $0x6a0] sm:$0xff]  ;;  %v4442_v0 = vld [vmem:[%s9871_s11 + $0x708] sm:$0xff] }
 0x6a3   : > { %10160 = vst [vmem:[#allocation51_spill] sm:$0xff] %v8585_v22  ;;  %v4437_v45 = vld [vmem:[%s9871_s11 + $0x6e0] sm:$0xff]  ;;  %v4450_v12 = vld [vmem:[%s9871_s11 + $0x748] sm:$0xff] }
 0x6a4   : > { %6085 = vmatpush1.bf16.msra.mxu1 %v8456_v34  ;;  %10159 = vst [vmem:[#allocation50_spill] sm:$0xff] %v8582_v52  ;;  %10162 = vst [vmem:[#allocation53_spill] sm:$0xff] %v8603_v11  ;;  %v8612_v25 = vpack.c.bf16 %v4437_v45, %v4429_v42  ;;  %v4446_v55 = vld [vmem:[%s9871_s11 + $0x728] sm:$0xff]  ;;  %v8625_v14 = vpack.c.bf16 %v4450_v12, %v4442_v0  ;;  %v4441_v42 = vld [vmem:[%s9871_s11 + $0x700] sm:$0xff] }
 0x6a5   : > { %6087 = vmatprep.subr.bf16.mxu1 %v8459_v2  ;;  %v4454_v60 = vld [vmem:[%s9871_s11 + $0x768] sm:$0xff]  ;;  %v4449_v45 = vld [vmem:[%s9871_s11 + $0x740] sm:$0xff] }
 0x6a6   : > { %10163 = vst [vmem:[#allocation54_spill] sm:$0xff] %v8612_v25  ;;  %10164 = vst [vmem:[#allocation55_spill] sm:$0xff] %v8625_v14  ;;  %v8636_v6 = vpack.c.bf16 %v4454_v60, %v4446_v55  ;;  %v4445_v0 = vld [vmem:[%s9871_s11 + $0x720] sm:$0xff]  ;;  %5995 = vmatprep.subr.bf16.mxu0 %v8625_v14  ;;  %v4458_v55 = vld [vmem:[%s9871_s11 + $0x788] sm:$0xff] }
 0x6a7   : > { %v4453_v12 = vld [vmem:[%s9871_s11 + $0x760] sm:$0xff]  ;;  %v4466_v60 = vld [vmem:[%s9871_s11 + $0x7c8] sm:$0xff] }
 0x6a8   : > { %6089 = vmatpush1.bf16.msra.mxu1 %v8474_v13  ;;  %10165 = vst [vmem:[#allocation56_spill] sm:$0xff] %v8636_v6 }
 0x6a9   : > { %6091 = vmatprep.subr.bf16.mxu1 %v8477_v44 }
 0x6ac   : > { %6093 = vmatpush1.bf16.msra.mxu1 %v8492_v9 }
 0x6ad   : > { %6095 = vmatprep.subr.bf16.mxu1 %v8495_v20 }
 0x6b0   : > { %6097 = vmatpush1.bf16.msra.mxu1 %v8510_v16 }
 0x6b1   : > { %6099 = vmatprep.subr.bf16.mxu1 %v8513_v19 }
 0x6b4   : > { %6101 = vmatpush1.bf16.msra.mxu1 %v8528_v35 }
 0x6b5   : > { %6103 = vmatprep.subr.bf16.mxu1 %v8531_v38  ;;  %v8724_v38 = vpop.permute.xlu1 %3089 }
 0x6b8   : > { %6105 = vmatpush1.bf16.msra.mxu1 %v8546_v56  ;;  %v4243_v56 = vld [vmem:[%s9871_s11 + $0xd0] sm:$0xff] }
 0x6b9   : > { %6107 = vmatprep.subr.bf16.mxu1 %v8549_v57  ;;  %v4235_v57 = vld [vmem:[%s9871_s11 + $0x90] sm:$0xff] }
 0x6bc   : > { %6109 = vmatpush1.bf16.msra.mxu1 %v8564_v53 }
 0x6bd   : > { %6111 = vmatprep.subr.bf16.mxu1 %v8567_v17  ;;  %v3095_v17 = vpop.permute.xlu0 %3094 }
 0x6c0   : > { %6113 = vmatpush1.bf16.msra.mxu1 %v8582_v52 }
 0x6c1   : > { %6115 = vmatprep.subr.bf16.mxu1 %v8585_v22 }
 0x6c4   : > { %6117 = vmatpush1.bf16.msra.mxu1 %v8600_v37 }
 0x6c5   : > { %6119 = vmatprep.subr.bf16.mxu1 %v8603_v11  ;;  %v8647_v11 = vpack.c.bf16 %v4453_v12, %v4445_v0  ;;  %v4470_v0 = vld [vmem:[%s9871_s11 + $0x7e8] sm:$0xff]  ;;  %v4457_v12 = vld [vmem:[%s9871_s11 + $0x780] sm:$0xff] }
 0x6c7   : > { %10167 = vst [vmem:[#allocation58_spill] sm:$0xff] %v8647_v11 }
 0x6c8   : > { %6121 = vmatpush1.bf16.msra.mxu1 %v8612_v25  ;;  %v8638_v25 = vpack.c.bf16 %v4449_v45, %v4441_v42  ;;  %v4462_v42 = vld [vmem:[%s9871_s11 + $0x7a8] sm:$0xff]  ;;  %v8661_v45 = vpack.c.bf16 %v4466_v60, %v4458_v55  ;;  %v4461_v55 = vld [vmem:[%s9871_s11 + $0x7a0] sm:$0xff] }
 0x6c9   : > { %6123 = vmatprep.subr.bf16.mxu1 %v8636_v6  ;;  %v4465_v6 = vld [vmem:[%s9871_s11 + $0x7c0] sm:$0xff]  ;;  %v8672_v37 = vpack.c.bf16 %v4470_v0, %v4462_v42  ;;  %v4228_v42 = vld [vmem:[%s9871_s11 + $0x58] sm:$0xff] }
 0x6ca   : > { %10166 = vst [vmem:[#allocation57_spill] sm:$0xff] %v8638_v25  ;;  %5997 = vmatpush1.bf16.msra.mxu0 %v8638_v25  ;;  %10168 = vst [vmem:[#allocation59_spill] sm:$0xff] %v8661_v45  ;;  %v8674_v22 = vpack.c.bf16 %v4465_v6, %v4457_v12  ;;  %v4469_v60 = vld [vmem:[%s9871_s11 + $0x7e0] sm:$0xff]  ;;  %v4220_v6 = vld [vmem:[%s9871_s11 + $0x18] sm:$0xff] }
 0x6cb   : > { %10169 = vst [vmem:[#allocation60_spill] sm:$0xff] %v8672_v37  ;;  %5999 = vmatprep.subr.bf16.mxu0 %v8661_v45  ;;  %v8694_v0 = vpack.c.bf16 %v4228_v42, %v4220_v6  ;;  %v4236_v6 = vld [vmem:[%s9871_s11 + $0x98] sm:$0xff] }
 0x6cc   : > { %6125 = vmatpush1.bf16.msra.mxu1 %v8647_v11  ;;  %v8683_v11 = vpack.c.bf16 %v4469_v60, %v4461_v55  ;;  %v4219_v60 = vld [vmem:[%s9871_s11 + $0x10] sm:$0xff]  ;;  %v4244_v42 = vld [vmem:[%s9871_s11 + $0xd8] sm:$0xff] }
 0x6cd   : > { %6127 = vmatprep.subr.bf16.mxu1 %v8672_v37  ;;  %10171 = vst [vmem:[#allocation62_spill] sm:$0xff] %v8694_v0  ;;  %v4227_v37 = vld [vmem:[%s9871_s11 + $0x50] sm:$0xff] }
 0x6ce   : > { %10170 = vst [vmem:[#allocation61_spill] sm:$0xff] %v8683_v11  ;;  %6001 = vmatpush1.bf16.msra.mxu0 %v8674_v22 }
 0x6cf   : > { %6003 = vmatprep.subr.bf16.mxu0 %v8694_v0  ;;  %v8714_v0 = vpack.c.bf16 %v4227_v37, %v4219_v60  ;;  %v8730_v37 = vpack.c.bf16 %v4244_v42, %v4236_v6  ;;  %v8747_v6 = vpack.c.bf16 %v4243_v56, %v4235_v57  ;;  %v4268_v56 = vld [vmem:[%s9871_s11 + $0x198] sm:$0xff] }
 0x6d0   : > { %6129 = vmatpush1.bf16.msra.mxu1 %v8683_v11  ;;  %v4276_v57 = vld [vmem:[%s9871_s11 + $0x1d8] sm:$0xff] }
 0x6d1   : > { %6195 = vmatprep.subr.bf16.mxu1 %v7875_v27  ;;  %10172 = vst [vmem:[#allocation63_spill] sm:$0xff] %v8714_v0  ;;  %10174 = vst [vmem:[#allocation65_spill] sm:$0xff] %v8730_v37 }
 0x6d2   : > { %10176 = vst [vmem:[#allocation67_spill] sm:$0xff] %v8747_v6 }
 0x766   : > { %v8698_v12 = vpop.f32.mrb[8].mxu1 }
 0x767   : > { %v4188_v55 = vpop.f32.mrb[9].mxu1 }
 0x76a   : > { %v4192_v52 = vpop.f32.mrb[10].mxu1 }
 0x76b   : > { %v4194_v11 = vpop.f32.mrb[11].mxu1  ;;  %v8716_v53 = vadd.f32 %v4192_v52, %v3095_v17  ;;  %v4260_v52 = vld [vmem:[%s9871_s11 + $0x158] sm:$0xff] }
 0x76c   : > { %v8712_v27 = vadd.f32 %v4194_v11, %v3095_v17  ;;  %v4252_v17 = vld [vmem:[%s9871_s11 + $0x118] sm:$0xff]  ;;  %v8739_v11 = vadd.f32 %v4188_v55, %v8724_v38  ;;  %v4251_v55 = vld [vmem:[%s9871_s11 + $0x110] sm:$0xff] }
 0x76d   : > { %v8751_v42 = vpack.c.bf16 %v4260_v52, %v4252_v17 }
 0x76e   : > { %v8726_v35 = vpop.f32.mrb[12].mxu1  ;;  %4537 = vmatprep.mubr.f32.mxu0 %v8712_v27  ;;  %4679 = vmatprep.mubr.f32.mxu1 %v8712_v27 }
 0x76f   : > { %10173 = vst [vmem:[#allocation64_spill] sm:$0xff] %v8726_v35  ;;  %v8741_v60 = vpop.f32.mrb[13].mxu1  ;;  %4538 = vmatmul.mubr.f32.vlgmr.msra.gmra.mrb[4].mxu0 %v8716_v53  ;;  %4680 = vmatmul.mubr.f32.vlgmr.msra.gmra.mrb[16].mxu1 %v8716_v53  ;;  %10177 = vst [vmem:[#allocation68_spill] sm:$0xff] %v8751_v42  ;;  %v4259_v35 = vld [vmem:[%s9871_s11 + $0x150] sm:$0xff] }
 0x770   : > { %10175 = vst [vmem:[#allocation66_spill] sm:$0xff] %v8741_v60  ;;  %6005 = vmatpush1.bf16.msra.mxu0 %v8714_v0  ;;  %6197 = vmatpush1.bf16.msra.mxu1 %v7883_v31  ;;  %v8773_v52 = vpack.c.bf16 %v4259_v35, %v4251_v55  ;;  %v4292_v35 = vld [vmem:[%s9871_s11 + $0x258] sm:$0xff] }
 0x771   : > { %4608 = vmatprep.mubr.f32.mxu0 %v8712_v27  ;;  %4845 = vmatprep.mubr.f32.mxu1 %v8739_v11 }
 0x772   : > { %v8759_v60 = vpop.f32.mrb[14].mxu1  ;;  %6007 = vmatprep.subr.bf16.mxu0 %v8730_v37  ;;  %6199 = vmatprep.subr.bf16.mxu1 %v7898_v40  ;;  %10180 = vst [vmem:[#allocation71_spill] sm:$0xff] %v8773_v52  ;;  %v4267_v40 = vld [vmem:[%s9871_s11 + $0x190] sm:$0xff] }
 0x773   : > { %10178 = vst [vmem:[#allocation69_spill] sm:$0xff] %v8759_v60  ;;  %v8769_v17 = vpop.f32.mrb[15].mxu1  ;;  %v8777_v60 = vpack.c.bf16 %v4276_v57, %v4268_v56  ;;  %v4283_v57 = vld [vmem:[%s9871_s11 + $0x210] sm:$0xff] }
 0x774   : > { %10179 = vst [vmem:[#allocation70_spill] sm:$0xff] %v8769_v17  ;;  %6009 = vmatpush1.bf16.msra.mxu0 %v8747_v6  ;;  %6201 = vmatpush1.bf16.msra.mxu1 %v7910_v43  ;;  %v4275_v17 = vld [vmem:[%s9871_s11 + $0x1d0] sm:$0xff]  ;;  %v4284_v43 = vld [vmem:[%s9871_s11 + $0x218] sm:$0xff] }
 0x775   : > { %6011 = vmatprep.subr.bf16.mxu0 %v8751_v42  ;;  %6203 = vmatprep.subr.bf16.mxu1 %v7919_v47  ;;  %10181 = vst [vmem:[#allocation72_spill] sm:$0xff] %v8777_v60  ;;  %v8793_v55 = vpack.c.bf16 %v4275_v17, %v4267_v40  ;;  %v8797_v56 = vpack.c.bf16 %v4292_v35, %v4284_v43  ;;  %v4291_v47 = vld [vmem:[%s9871_s11 + $0x250] sm:$0xff]  ;;  %v4308_v40 = vld [vmem:[%s9871_s11 + $0x2d8] sm:$0xff] }
 0x776   : > { %v8813_v43 = vpack.c.bf16 %v4291_v47, %v4283_v57  ;;  %v4299_v35 = vld [vmem:[%s9871_s11 + $0x290] sm:$0xff]  ;;  %v4324_v47 = vld [vmem:[%s9871_s11 + $0x358] sm:$0xff] }
 0x777   : > { %10182 = vst [vmem:[#allocation73_spill] sm:$0xff] %v8793_v55  ;;  %10183 = vst [vmem:[#allocation74_spill] sm:$0xff] %v8797_v56 }
 0x778   : > { %6013 = vmatpush1.bf16.msra.mxu0 %v8773_v52  ;;  %6205 = vmatpush1.bf16.msra.mxu1 %v7939_v50  ;;  %v4300_v50 = vld [vmem:[%s9871_s11 + $0x298] sm:$0xff]  ;;  %10184 = vst [vmem:[#allocation75_spill] sm:$0xff] %v8813_v43 }
 0x779   : > { %6015 = vmatprep.subr.bf16.mxu0 %v8777_v60  ;;  %6207 = vmatprep.subr.bf16.mxu1 %v7942_v51  ;;  %v8817_v17 = vpack.c.bf16 %v4308_v40, %v4300_v50  ;;  %v4307_v51 = vld [vmem:[%s9871_s11 + $0x2d0] sm:$0xff] }
 0x77a   : > { %v8833_v50 = vpack.c.bf16 %v4307_v51, %v4299_v35  ;;  %v4315_v40 = vld [vmem:[%s9871_s11 + $0x310] sm:$0xff]  ;;  %v4340_v51 = vld [vmem:[%s9871_s11 + $0x3d8] sm:$0xff] }
 0x77b   : > { %10185 = vst [vmem:[#allocation76_spill] sm:$0xff] %v8817_v17 }
 0x77c   : > { %6017 = vmatpush1.bf16.msra.mxu0 %v8793_v55  ;;  %6209 = vmatpush1.bf16.msra.mxu1 %v7964_v58  ;;  %v4316_v58 = vld [vmem:[%s9871_s11 + $0x318] sm:$0xff]  ;;  %10186 = vst [vmem:[#allocation77_spill] sm:$0xff] %v8833_v50 }
 0x77d   : > { %6019 = vmatprep.subr.bf16.mxu0 %v8797_v56  ;;  %6211 = vmatprep.subr.bf16.mxu1 %v7970_v61  ;;  %v8837_v57 = vpack.c.bf16 %v4324_v47, %v4316_v58  ;;  %v4323_v61 = vld [vmem:[%s9871_s11 + $0x350] sm:$0xff] }
 0x77e   : > { %v8853_v58 = vpack.c.bf16 %v4323_v61, %v4315_v40  ;;  %v4331_v47 = vld [vmem:[%s9871_s11 + $0x390] sm:$0xff]  ;;  %v4356_v61 = vld [vmem:[%s9871_s11 + $0x458] sm:$0xff] }
 0x77f   : > { %10187 = vst [vmem:[#allocation78_spill] sm:$0xff] %v8837_v57 }
 0x780   : > { %6021 = vmatpush1.bf16.msra.mxu0 %v8813_v43  ;;  %6213 = vmatpush1.bf16.msra.mxu1 %v7993_v15  ;;  %v4332_v15 = vld [vmem:[%s9871_s11 + $0x398] sm:$0xff]  ;;  %10188 = vst [vmem:[#allocation79_spill] sm:$0xff] %v8853_v58 }
 0x781   : > { %6023 = vmatprep.subr.bf16.mxu0 %v8817_v17  ;;  %6215 = vmatprep.subr.bf16.mxu1 %v7995_v21  ;;  %v8857_v35 = vpack.c.bf16 %v4340_v51, %v4332_v15  ;;  %v4339_v21 = vld [vmem:[%s9871_s11 + $0x3d0] sm:$0xff] }
 0x782   : > { %v8873_v15 = vpack.c.bf16 %v4339_v21, %v4331_v47  ;;  %v4347_v51 = vld [vmem:[%s9871_s11 + $0x410] sm:$0xff]  ;;  %v4372_v21 = vld [vmem:[%s9871_s11 + $0x4d8] sm:$0xff] }
 0x783   : > { %10189 = vst [vmem:[#allocation80_spill] sm:$0xff] %v8857_v35 }
 0x784   : > { %6025 = vmatpush1.bf16.msra.mxu0 %v8833_v50  ;;  %6217 = vmatpush1.bf16.msra.mxu1 %v8022_v32  ;;  %v4348_v32 = vld [vmem:[%s9871_s11 + $0x418] sm:$0xff]  ;;  %10190 = vst [vmem:[#allocation81_spill] sm:$0xff] %v8873_v15 }
 0x785   : > { %6027 = vmatprep.subr.bf16.mxu0 %v8837_v57  ;;  %6219 = vmatprep.subr.bf16.mxu1 %v8025_v33  ;;  %v8877_v40 = vpack.c.bf16 %v4356_v61, %v4348_v32  ;;  %v4355_v33 = vld [vmem:[%s9871_s11 + $0x450] sm:$0xff] }
 0x786   : > { %v8893_v32 = vpack.c.bf16 %v4355_v33, %v4347_v51  ;;  %v4363_v61 = vld [vmem:[%s9871_s11 + $0x490] sm:$0xff]  ;;  %v4388_v33 = vld [vmem:[%s9871_s11 + $0x558] sm:$0xff] }
 0x787   : > { %10191 = vst [vmem:[#allocation82_spill] sm:$0xff] %v8877_v40 }
 0x788   : > { %6029 = vmatpush1.bf16.msra.mxu0 %v8853_v58  ;;  %6221 = vmatpush1.bf16.msra.mxu1 %v8047_v39  ;;  %v4364_v39 = vld [vmem:[%s9871_s11 + $0x498] sm:$0xff]  ;;  %10192 = vst [vmem:[#allocation83_spill] sm:$0xff] %v8893_v32 }
 0x789   : > { %6031 = vmatprep.subr.bf16.mxu0 %v8857_v35  ;;  %6223 = vmatprep.subr.bf16.mxu1 %v8050_v41  ;;  %v8897_v47 = vpack.c.bf16 %v4372_v21, %v4364_v39  ;;  %v4371_v41 = vld [vmem:[%s9871_s11 + $0x4d0] sm:$0xff] }
 0x78a   : > { %v8913_v39 = vpack.c.bf16 %v4371_v41, %v4363_v61  ;;  %v4379_v21 = vld [vmem:[%s9871_s11 + $0x510] sm:$0xff]  ;;  %v4404_v41 = vld [vmem:[%s9871_s11 + $0x5d8] sm:$0xff] }
 0x78b   : > { %10193 = vst [vmem:[#allocation84_spill] sm:$0xff] %v8897_v47 }
 0x78c   : > { %6033 = vmatpush1.bf16.msra.mxu0 %v8873_v15  ;;  %6225 = vmatpush1.bf16.msra.mxu1 %v8076_v1  ;;  %v4380_v1 = vld [vmem:[%s9871_s11 + $0x518] sm:$0xff]  ;;  %10194 = vst [vmem:[#allocation85_spill] sm:$0xff] %v8913_v39 }
 0x78d   : > { %6035 = vmatprep.subr.bf16.mxu0 %v8877_v40  ;;  %6227 = vmatprep.subr.bf16.mxu1 %v8083_v49  ;;  %v8917_v51 = vpack.c.bf16 %v4388_v33, %v4380_v1  ;;  %v4387_v49 = vld [vmem:[%s9871_s11 + $0x550] sm:$0xff] }
 0x78e   : > { %v8933_v1 = vpack.c.bf16 %v4387_v49, %v4379_v21  ;;  %v4395_v33 = vld [vmem:[%s9871_s11 + $0x590] sm:$0xff]  ;;  %v4420_v49 = vld [vmem:[%s9871_s11 + $0x658] sm:$0xff] }
 0x78f   : > { %10195 = vst [vmem:[#allocation86_spill] sm:$0xff] %v8917_v51 }
 0x790   : > { %6037 = vmatpush1.bf16.msra.mxu0 %v8893_v32  ;;  %6229 = vmatpush1.bf16.msra.mxu1 %v8105_v62  ;;  %v4396_v62 = vld [vmem:[%s9871_s11 + $0x598] sm:$0xff]  ;;  %10196 = vst [vmem:[#allocation87_spill] sm:$0xff] %v8933_v1 }
 0x791   : > { %6039 = vmatprep.subr.bf16.mxu0 %v8897_v47  ;;  %6231 = vmatprep.subr.bf16.mxu1 %v8108_v63  ;;  %v8937_v61 = vpack.c.bf16 %v4404_v41, %v4396_v62  ;;  %v4403_v63 = vld [vmem:[%s9871_s11 + $0x5d0] sm:$0xff] }
 0x792   : > { %v8953_v62 = vpack.c.bf16 %v4403_v63, %v4395_v33  ;;  %v4411_v41 = vld [vmem:[%s9871_s11 + $0x610] sm:$0xff]  ;;  %v4436_v63 = vld [vmem:[%s9871_s11 + $0x6d8] sm:$0xff] }
 0x793   : > { %10197 = vst [vmem:[#allocation88_spill] sm:$0xff] %v8937_v61 }
 0x794   : > { %6041 = vmatpush1.bf16.msra.mxu0 %v8913_v39  ;;  %6233 = vmatpush1.bf16.msra.mxu1 %v8135_v24  ;;  %v4412_v24 = vld [vmem:[%s9871_s11 + $0x618] sm:$0xff]  ;;  %10198 = vst [vmem:[#allocation89_spill] sm:$0xff] %v8953_v62 }
 0x795   : > { %6043 = vmatprep.subr.bf16.mxu0 %v8917_v51  ;;  %6235 = vmatprep.subr.bf16.mxu1 %v8138_v26  ;;  %v8957_v21 = vpack.c.bf16 %v4420_v49, %v4412_v24  ;;  %v4419_v26 = vld [vmem:[%s9871_s11 + $0x650] sm:$0xff] }
 0x796   : > { %v8973_v24 = vpack.c.bf16 %v4419_v26, %v4411_v41  ;;  %v4427_v49 = vld [vmem:[%s9871_s11 + $0x690] sm:$0xff]  ;;  %v4452_v26 = vld [vmem:[%s9871_s11 + $0x758] sm:$0xff] }
 0x797   : > { %10199 = vst [vmem:[#allocation90_spill] sm:$0xff] %v8957_v21 }
 0x798   : > { %6045 = vmatpush1.bf16.msra.mxu0 %v8933_v1  ;;  %6237 = vmatpush1.bf16.msra.mxu1 %v8158_v36  ;;  %v4428_v36 = vld [vmem:[%s9871_s11 + $0x698] sm:$0xff]  ;;  %10200 = vst [vmem:[#allocation91_spill] sm:$0xff] %v8973_v24 }
 0x799   : > { %6047 = vmatprep.subr.bf16.mxu0 %v8937_v61  ;;  %6239 = vmatprep.subr.bf16.mxu1 %v8161_v10  ;;  %v8977_v33 = vpack.c.bf16 %v4436_v63, %v4428_v36  ;;  %v4435_v10 = vld [vmem:[%s9871_s11 + $0x6d0] sm:$0xff] }
 0x79a   : > { %v8993_v36 = vpack.c.bf16 %v4435_v10, %v4427_v49  ;;  %v4443_v63 = vld [vmem:[%s9871_s11 + $0x710] sm:$0xff]  ;;  %v4468_v10 = vld [vmem:[%s9871_s11 + $0x7d8] sm:$0xff] }
 0x79c   : > { %6049 = vmatpush1.bf16.msra.mxu0 %v8953_v62  ;;  %6241 = vmatpush1.bf16.msra.mxu1 %v8192_v23  ;;  %v4444_v23 = vld [vmem:[%s9871_s11 + $0x718] sm:$0xff]  ;;  %10201 = vst [vmem:[#allocation92_spill] sm:$0xff] %v8993_v36 }
 0x79d   : > { %6051 = vmatprep.subr.bf16.mxu0 %v8957_v21  ;;  %6243 = vmatprep.subr.bf16.mxu1 %v8199_v54  ;;  %v8997_v41 = vpack.c.bf16 %v4452_v26, %v4444_v23  ;;  %v4451_v54 = vld [vmem:[%s9871_s11 + $0x750] sm:$0xff] }
 0x79e   : > { %v9013_v23 = vpack.c.bf16 %v4451_v54, %v4443_v63  ;;  %v4459_v26 = vld [vmem:[%s9871_s11 + $0x790] sm:$0xff]  ;;  %v4232_v54 = vld [vmem:[%s9871_s11 + $0x78] sm:$0xff] }
 0x7a0   : > { %6053 = vmatpush1.bf16.msra.mxu0 %v8973_v24  ;;  %6245 = vmatpush1.bf16.msra.mxu1 %v8222_v59  ;;  %v4460_v59 = vld [vmem:[%s9871_s11 + $0x798] sm:$0xff] }
 0x7a1   : > { %6055 = vmatprep.subr.bf16.mxu0 %v8977_v33  ;;  %6247 = vmatprep.subr.bf16.mxu1 %v8225_v8  ;;  %v9017_v49 = vpack.c.bf16 %v4468_v10, %v4460_v59  ;;  %v4467_v8 = vld [vmem:[%s9871_s11 + $0x7d0] sm:$0xff] }
 0x7a2   : > { %v9033_v59 = vpack.c.bf16 %v4467_v8, %v4459_v26  ;;  %v4223_v10 = vld [vmem:[%s9871_s11 + $0x30] sm:$0xff]  ;;  %v4248_v8 = vld [vmem:[%s9871_s11 + $0xf8] sm:$0xff]  ;;  %v9057_v26 = vadd.f32 %v8698_v12, %v8724_v38 }
 0x7a3   : > { %v4264_v38 = vld [vmem:[%s9871_s11 + $0x178] sm:$0xff] }
 0x7a4   : > { %6057 = vmatpush1.bf16.msra.mxu0 %v8993_v36  ;;  %6249 = vmatpush1.bf16.msra.mxu1 %v8239_v28  ;;  %v4224_v28 = vld [vmem:[%s9871_s11 + $0x38] sm:$0xff]  ;;  %10202 = vst [vmem:[#allocation93_spill] sm:$0xff] %v9033_v59 }
 0x7a5   : > { %6059 = vmatprep.subr.bf16.mxu0 %v8997_v41  ;;  %6251 = vmatprep.subr.bf16.mxu1 %v8625_v14  ;;  %v9037_v63 = vpack.c.bf16 %v4232_v54, %v4224_v28  ;;  %v4231_v14 = vld [vmem:[%s9871_s11 + $0x70] sm:$0xff] }
 0x7a6   : > { %v9053_v28 = vpack.c.bf16 %v4231_v14, %v4223_v10  ;;  %v4239_v54 = vld [vmem:[%s9871_s11 + $0xb0] sm:$0xff]  ;;  %v4256_v14 = vld [vmem:[%s9871_s11 + $0x138] sm:$0xff] }
 0x7a7   : > { %10203 = vst [vmem:[#allocation94_spill] sm:$0xff] %v9037_v63  ;;  %v4255_v10 = vld [vmem:[%s9871_s11 + $0x130] sm:$0xff] }
 0x7a8   : > { %6061 = vmatpush1.bf16.msra.mxu0 %v9013_v23  ;;  %6253 = vmatpush1.bf16.msra.mxu1 %v8638_v25  ;;  %v4240_v25 = vld [vmem:[%s9871_s11 + $0xb8] sm:$0xff] }
 0x7a9   : > { %6063 = vmatprep.subr.bf16.mxu0 %v9017_v49  ;;  %6255 = vmatprep.subr.bf16.mxu1 %v8661_v45  ;;  %v9067_v45 = vpack.c.bf16 %v4248_v8, %v4240_v25  ;;  %v9083_v25 = vpack.c.bf16 %v4264_v38, %v4256_v14  ;;  %v4263_v8 = vld [vmem:[%s9871_s11 + $0x170] sm:$0xff] }
 0x7aa   : > { %v4271_v38 = vld [vmem:[%s9871_s11 + $0x1b0] sm:$0xff] }
 0x7ab   : > { %10205 = vst [vmem:[#allocation96_spill] sm:$0xff] %v9083_v25 }
 0x7ac   : > { %6065 = vmatpush1.bf16.msra.mxu0 %v9033_v59  ;;  %6257 = vmatpush1.bf16.msra.mxu1 %v8674_v22  ;;  %v4247_v59 = vld [vmem:[%s9871_s11 + $0xf0] sm:$0xff] }
 0x7ad   : > { %6131 = vmatprep.subr.bf16.mxu0 %v9037_v63  ;;  %6323 = vmatprep.subr.bf16.mxu1 %v8334_v7  ;;  %v9079_v12 = vpack.c.bf16 %v4247_v59, %v4239_v54  ;;  %v4280_v59 = vld [vmem:[%s9871_s11 + $0x1f8] sm:$0xff]  ;;  %v9100_v54 = vpack.c.bf16 %v4263_v8, %v4255_v10 }
 0x7ae   : > { %v4288_v10 = vld [vmem:[%s9871_s11 + $0x238] sm:$0xff] }
 0x7af   : > { %4609 = vmatmul.mubr.f32.vlgmr.msra.gmra.mrb[6].mxu0 %v8716_v53  ;;  %4846 = vmatmul.mubr.f32.vlgmr.msra.gmra.mrb[18].mxu1 %v9057_v26  ;;  %10204 = vst [vmem:[#allocation95_spill] sm:$0xff] %v9079_v12  ;;  %10206 = vst [vmem:[#allocation97_spill] sm:$0xff] %v9100_v54  ;;  %v4296_v8 = vld [vmem:[%s9871_s11 + $0x278] sm:$0xff] }
 0x7b0   : > { %6133 = vmatpush1.bf16.msra.mxu0 %v9053_v28  ;;  %4750 = vmatprep.mubr.f32.mxu0 %v8712_v27  ;;  %v4272_v27 = vld [vmem:[%s9871_s11 + $0x1b8] sm:$0xff] }
 0x7b1   : > { %6325 = vmatpush1.bf16.msra.mxu1 %v8369_v29  ;;  %4987 = vmatprep.mubr.f32.mxu1 %v8739_v11  ;;  %v9104_v14 = vpack.c.bf16 %v4280_v59, %v4272_v27  ;;  %v9124_v59 = vpack.c.bf16 %v4296_v8, %v4288_v10 }
 0x7b2   : > { %6135 = vmatprep.subr.bf16.mxu0 %v9067_v45  ;;  %6327 = vmatprep.subr.bf16.mxu1 %v8371_v30  ;;  %v4279_v30 = vld [vmem:[%s9871_s11 + $0x1f0] sm:$0xff] }
 0x7b3   : > { %10207 = vst [vmem:[#allocation98_spill] sm:$0xff] %v9104_v14  ;;  %v9120_v27 = vpack.c.bf16 %v4279_v30, %v4271_v38  ;;  %10209 = vst [vmem:[#allocation100_spill] sm:$0xff] %v9124_v59  ;;  %v4304_v30 = vld [vmem:[%s9871_s11 + $0x2b8] sm:$0xff] }
 0x7b4   : > { %6137 = vmatpush1.bf16.msra.mxu0 %v9079_v12  ;;  %v4312_v38 = vld [vmem:[%s9871_s11 + $0x2f8] sm:$0xff] }
 0x7b5   : > { %6329 = vmatpush1.bf16.msra.mxu1 %v8391_v3  ;;  %6139 = vmatprep.subr.bf16.mxu0 %v9083_v25  ;;  %10208 = vst [vmem:[#allocation99_spill] sm:$0xff] %v9120_v27  ;;  %v4295_v25 = vld [vmem:[%s9871_s11 + $0x270] sm:$0xff]  ;;  %v9144_v8 = vpack.c.bf16 %v4312_v38, %v4304_v30 }
 0x7b6   : > { %6331 = vmatprep.subr.bf16.mxu1 %v8394_v18  ;;  %v4287_v18 = vld [vmem:[%s9871_s11 + $0x230] sm:$0xff] }
 0x7b7   : > { %v9140_v10 = vpack.c.bf16 %v4295_v25, %v4287_v18  ;;  %10211 = vst [vmem:[#allocation102_spill] sm:$0xff] %v9144_v8  ;;  %v4320_v18 = vld [vmem:[%s9871_s11 + $0x338] sm:$0xff] }
 0x7b8   : > { %6141 = vmatpush1.bf16.msra.mxu0 %v9100_v54  ;;  %v4328_v25 = vld [vmem:[%s9871_s11 + $0x378] sm:$0xff] }
 0x7b9   : > { %6333 = vmatpush1.bf16.msra.mxu1 %v8414_v5  ;;  %6143 = vmatprep.subr.bf16.mxu0 %v9104_v14  ;;  %10210 = vst [vmem:[#allocation101_spill] sm:$0xff] %v9140_v10  ;;  %v4311_v14 = vld [vmem:[%s9871_s11 + $0x2f0] sm:$0xff]  ;;  %v9164_v38 = vpack.c.bf16 %v4328_v25, %v4320_v18 }
 0x7ba   : > { %6335 = vmatprep.subr.bf16.mxu1 %v8417_v4  ;;  %v4303_v4 = vld [vmem:[%s9871_s11 + $0x2b0] sm:$0xff] }
 0x7bb   : > { %v9160_v30 = vpack.c.bf16 %v4311_v14, %v4303_v4  ;;  %10213 = vst [vmem:[#allocation104_spill] sm:$0xff] %v9164_v38  ;;  %v4336_v4 = vld [vmem:[%s9871_s11 + $0x3b8] sm:$0xff] }
 0x7bc   : > { %6145 = vmatpush1.bf16.msra.mxu0 %v9120_v27  ;;  %v4344_v14 = vld [vmem:[%s9871_s11 + $0x3f8] sm:$0xff] }
 0x7bd   : > { %6337 = vmatpush1.bf16.msra.mxu1 %v8437_v46  ;;  %6147 = vmatprep.subr.bf16.mxu0 %v9124_v59  ;;  %10212 = vst [vmem:[#allocation103_spill] sm:$0xff] %v9160_v30  ;;  %v4327_v59 = vld [vmem:[%s9871_s11 + $0x370] sm:$0xff]  ;;  %v9184_v25 = vpack.c.bf16 %v4344_v14, %v4336_v4 }
 0x7be   : > { %6339 = vmatprep.subr.bf16.mxu1 %v8440_v48  ;;  %v4319_v48 = vld [vmem:[%s9871_s11 + $0x330] sm:$0xff] }
 0x7bf   : > { %v9180_v18 = vpack.c.bf16 %v4327_v59, %v4319_v48  ;;  %10215 = vst [vmem:[#allocation106_spill] sm:$0xff] %v9184_v25  ;;  %v4352_v48 = vld [vmem:[%s9871_s11 + $0x438] sm:$0xff] }
 0x7c0   : > { %6149 = vmatpush1.bf16.msra.mxu0 %v9140_v10  ;;  %v4360_v59 = vld [vmem:[%s9871_s11 + $0x478] sm:$0xff] }
 0x7c1   : > { %6341 = vmatpush1.bf16.msra.mxu1 %v8456_v34  ;;  %6151 = vmatprep.subr.bf16.mxu0 %v9144_v8  ;;  %10214 = vst [vmem:[#allocation105_spill] sm:$0xff] %v9180_v18  ;;  %v4343_v8 = vld [vmem:[%s9871_s11 + $0x3f0] sm:$0xff]  ;;  %v9204_v14 = vpack.c.bf16 %v4360_v59, %v4352_v48 }
 0x7c2   : > { %6343 = vmatprep.subr.bf16.mxu1 %v8459_v2  ;;  %v4335_v2 = vld [vmem:[%s9871_s11 + $0x3b0] sm:$0xff] }
 0x7c3   : > { %v9200_v4 = vpack.c.bf16 %v4343_v8, %v4335_v2  ;;  %10217 = vst [vmem:[#allocation108_spill] sm:$0xff] %v9204_v14  ;;  %v4368_v2 = vld [vmem:[%s9871_s11 + $0x4b8] sm:$0xff] }
 0x7c4   : > { %6153 = vmatpush1.bf16.msra.mxu0 %v9160_v30  ;;  %v4376_v8 = vld [vmem:[%s9871_s11 + $0x4f8] sm:$0xff] }
 0x7c5   : > { %6345 = vmatpush1.bf16.msra.mxu1 %v8474_v13  ;;  %6155 = vmatprep.subr.bf16.mxu0 %v9164_v38  ;;  %10216 = vst [vmem:[#allocation107_spill] sm:$0xff] %v9200_v4  ;;  %v4359_v38 = vld [vmem:[%s9871_s11 + $0x470] sm:$0xff]  ;;  %v9224_v59 = vpack.c.bf16 %v4376_v8, %v4368_v2 }
 0x7c6   : > { %6347 = vmatprep.subr.bf16.mxu1 %v8477_v44  ;;  %v4351_v44 = vld [vmem:[%s9871_s11 + $0x430] sm:$0xff] }
 0x7c7   : > { %v9220_v48 = vpack.c.bf16 %v4359_v38, %v4351_v44  ;;  %10219 = vst [vmem:[#allocation110_spill] sm:$0xff] %v9224_v59  ;;  %v4384_v44 = vld [vmem:[%s9871_s11 + $0x538] sm:$0xff]  ;;  %v10221_v8 = vld [vmem:[#allocation44_spill] sm:$0xff] }
 0x7c8   : > { %6157 = vmatpush1.bf16.msra.mxu0 %v9180_v18  ;;  %v4392_v38 = vld [vmem:[%s9871_s11 + $0x578] sm:$0xff] }
 0x7c9   : > { %6349 = vmatpush1.bf16.msra.mxu1 %v8492_v9  ;;  %6159 = vmatprep.subr.bf16.mxu0 %v9184_v25  ;;  %10218 = vst [vmem:[#allocation109_spill] sm:$0xff] %v9220_v48  ;;  %v4375_v25 = vld [vmem:[%s9871_s11 + $0x4f0] sm:$0xff] }
 0x7ca   : > { %6351 = vmatprep.subr.bf16.mxu1 %v8495_v20  ;;  %v4367_v20 = vld [vmem:[%s9871_s11 + $0x4b0] sm:$0xff] }
 0x7cb   : > { %v9240_v2 = vpack.c.bf16 %v4375_v25, %v4367_v20  ;;  %v4400_v20 = vld [vmem:[%s9871_s11 + $0x5b8] sm:$0xff] }
 0x7cc   : > { %6161 = vmatpush1.bf16.msra.mxu0 %v9200_v4  ;;  %v10223_v4 = vld [vmem:[#allocation45_spill] sm:$0xff] }
 0x7cd   : > { %6353 = vmatpush1.bf16.msra.mxu1 %v8510_v16  ;;  %6163 = vmatprep.subr.bf16.mxu0 %v9204_v14  ;;  %10220 = vst [vmem:[#allocation111_spill] sm:$0xff] %v9240_v2  ;;  %v9244_v14 = vpack.c.bf16 %v4392_v38, %v4384_v44  ;;  %v4391_v16 = vld [vmem:[%s9871_s11 + $0x570] sm:$0xff]  ;;  %v4408_v25 = vld [vmem:[%s9871_s11 + $0x5f8] sm:$0xff]  ;;  %v10225_v38 = vld [vmem:[#allocation46_spill] sm:$0xff] }
 0x7ce   : > { %6355 = vmatprep.subr.bf16.mxu1 %v8513_v19  ;;  %v4383_v19 = vld [vmem:[%s9871_s11 + $0x530] sm:$0xff] }
 0x7cf   : > { %10222 = vst [vmem:[#allocation112_spill] sm:$0xff] %v9244_v14  ;;  %v9260_v44 = vpack.c.bf16 %v4391_v16, %v4383_v19  ;;  %v4416_v16 = vld [vmem:[%s9871_s11 + $0x638] sm:$0xff] }
 0x7d0   : > { %6165 = vmatpush1.bf16.msra.mxu0 %v9220_v48  ;;  %v10227_v48 = vld [vmem:[#allocation47_spill] sm:$0xff]  ;;  %v4424_v19 = vld [vmem:[%s9871_s11 + $0x678] sm:$0xff] }
 0x7d1   : > { %6357 = vmatpush1.bf16.msra.mxu1 %v10221_v8  ;;  %6167 = vmatprep.subr.bf16.mxu0 %v9224_v59  ;;  %10224 = vst [vmem:[#allocation113_spill] sm:$0xff] %v9260_v44  ;;  %v9264_v59 = vpack.c.bf16 %v4408_v25, %v4400_v20  ;;  %v4407_v8 = vld [vmem:[%s9871_s11 + $0x5f0] sm:$0xff] }
 0x7d2   : > { %6359 = vmatprep.subr.bf16.mxu1 %v10223_v4  ;;  %v4399_v4 = vld [vmem:[%s9871_s11 + $0x5b0] sm:$0xff] }
 0x7d3   : > { %10226 = vst [vmem:[#allocation114_spill] sm:$0xff] %v9264_v59  ;;  %v9280_v20 = vpack.c.bf16 %v4407_v8, %v4399_v4  ;;  %v10229_v25 = vld [vmem:[#allocation48_spill] sm:$0xff]  ;;  %v4432_v4 = vld [vmem:[%s9871_s11 + $0x6b8] sm:$0xff] }
 0x7d4   : > { %6169 = vmatpush1.bf16.msra.mxu0 %v9240_v2  ;;  %v10231_v2 = vld [vmem:[#allocation49_spill] sm:$0xff] }
 0x7d5   : > { %6361 = vmatpush1.bf16.msra.mxu1 %v10225_v38  ;;  %6171 = vmatprep.subr.bf16.mxu0 %v9244_v14  ;;  %10228 = vst [vmem:[#allocation115_spill] sm:$0xff] %v9280_v20  ;;  %v9284_v14 = vpack.c.bf16 %v4424_v19, %v4416_v16  ;;  %v4423_v38 = vld [vmem:[%s9871_s11 + $0x670] sm:$0xff]  ;;  %v4440_v8 = vld [vmem:[%s9871_s11 + $0x6f8] sm:$0xff]  ;;  %v10233_v19 = vld [vmem:[#allocation50_spill] sm:$0xff] }
 0x7d6   : > { %6363 = vmatprep.subr.bf16.mxu1 %v10227_v48  ;;  %v4415_v48 = vld [vmem:[%s9871_s11 + $0x630] sm:$0xff] }
 0x7d7   : > { %10230 = vst [vmem:[#allocation116_spill] sm:$0xff] %v9284_v14  ;;  %v9300_v16 = vpack.c.bf16 %v4423_v38, %v4415_v48  ;;  %v4448_v48 = vld [vmem:[%s9871_s11 + $0x738] sm:$0xff] }
 0x7d8   : > { %6173 = vmatpush1.bf16.msra.mxu0 %v9260_v44  ;;  %v10235_v44 = vld [vmem:[#allocation51_spill] sm:$0xff]  ;;  %v4456_v38 = vld [vmem:[%s9871_s11 + $0x778] sm:$0xff] }
 0x7d9   : > { %6365 = vmatpush1.bf16.msra.mxu1 %v10229_v25  ;;  %6175 = vmatprep.subr.bf16.mxu0 %v9264_v59  ;;  %10232 = vst [vmem:[#allocation117_spill] sm:$0xff] %v9300_v16  ;;  %v9304_v59 = vpack.c.bf16 %v4440_v8, %v4432_v4  ;;  %v4439_v25 = vld [vmem:[%s9871_s11 + $0x6f0] sm:$0xff] }
 0x7da   : > { %6367 = vmatprep.subr.bf16.mxu1 %v10231_v2  ;;  %v4431_v2 = vld [vmem:[%s9871_s11 + $0x6b0] sm:$0xff] }
 0x7db   : > { %10234 = vst [vmem:[#allocation118_spill] sm:$0xff] %v9304_v59  ;;  %v9320_v4 = vpack.c.bf16 %v4439_v25, %v4431_v2  ;;  %v10237_v8 = vld [vmem:[#allocation52_spill] sm:$0xff]  ;;  %v4464_v2 = vld [vmem:[%s9871_s11 + $0x7b8] sm:$0xff] }
 0x7dc   : > { %6177 = vmatpush1.bf16.msra.mxu0 %v9280_v20  ;;  %v10239_v20 = vld [vmem:[#allocation53_spill] sm:$0xff] }
 0x7dd   : > { %6369 = vmatpush1.bf16.msra.mxu1 %v10233_v19  ;;  %6179 = vmatprep.subr.bf16.mxu0 %v9284_v14  ;;  %10236 = vst [vmem:[#allocation119_spill] sm:$0xff] %v9320_v4  ;;  %v9324_v14 = vpack.c.bf16 %v4456_v38, %v4448_v48  ;;  %v4455_v19 = vld [vmem:[%s9871_s11 + $0x770] sm:$0xff]  ;;  %v4472_v25 = vld [vmem:[%s9871_s11 + $0x7f8] sm:$0xff]  ;;  %v10241_v38 = vld [vmem:[#allocation54_spill] sm:$0xff] }
 0x7de   : > { %6371 = vmatprep.subr.bf16.mxu1 %v10235_v44  ;;  %v4447_v44 = vld [vmem:[%s9871_s11 + $0x730] sm:$0xff] }
 0x7df   : > { %10238 = vst [vmem:[#allocation120_spill] sm:$0xff] %v9324_v14  ;;  %v9340_v48 = vpack.c.bf16 %v4455_v19, %v4447_v44  ;;  %v10245_v19 = vld [vmem:[#allocation58_spill] sm:$0xff] }
 0x7e0   : > { %6181 = vmatpush1.bf16.msra.mxu0 %v9300_v16  ;;  %v10243_v16 = vld [vmem:[#allocation56_spill] sm:$0xff] }
 0x7e1   : > { %6373 = vmatpush1.bf16.msra.mxu1 %v10237_v8  ;;  %6183 = vmatprep.subr.bf16.mxu0 %v9304_v59  ;;  %10240 = vst [vmem:[#allocation121_spill] sm:$0xff] %v9340_v48  ;;  %v9344_v59 = vpack.c.bf16 %v4472_v25, %v4464_v2  ;;  %v4471_v8 = vld [vmem:[%s9871_s11 + $0x7f0] sm:$0xff]  ;;  %v10247_v25 = vld [vmem:[#allocation61_spill] sm:$0xff] }
 0x7e2   : > { %6375 = vmatprep.subr.bf16.mxu1 %v10239_v20  ;;  %v4463_v20 = vld [vmem:[%s9871_s11 + $0x7b0] sm:$0xff] }
 0x7e3   : > { %10242 = vst [vmem:[#allocation122_spill] sm:$0xff] %v9344_v59  ;;  %v9354_v44 = vpack.c.bf16 %v4471_v8, %v4463_v20  ;;  %v10246_v2 = vld [vmem:[#allocation60_spill] sm:$0xff]  ;;  %v10250_v20 = vld [vmem:[#allocation66_spill] sm:$0xff] }
 0x7e4   : > { %6185 = vmatpush1.bf16.msra.mxu0 %v9320_v4  ;;  %v9363_v4 = vpop.permute.xlu0 %3099 }
 0x7e5   : > { %6377 = vmatpush1.bf16.msra.mxu1 %v10241_v38  ;;  %6187 = vmatprep.subr.bf16.mxu0 %v9324_v14  ;;  %10244 = vst [vmem:[#allocation123_spill] sm:$0xff] %v9354_v44  ;;  %v10248_v14 = vld [vmem:[#allocation62_spill] sm:$0xff]  ;;  %v10249_v38 = vld [vmem:[#allocation3_spill] sm:$0xff]  ;;  %v9368_v8 = vadd.f32 %v10250_v20, %v9363_v4 }
 0x7e6   : > { %6379 = vmatprep.subr.bf16.mxu1 %v10243_v16  ;;  %v10253_v20 = vld [vmem:[#allocation7_spill] sm:$0xff] }
 0x7e8   : > { %6189 = vmatpush1.bf16.msra.mxu0 %v9340_v48 }
 0x7e9   : > { %6381 = vmatpush1.bf16.msra.mxu1 %v10245_v19  ;;  %6191 = vmatprep.subr.bf16.mxu0 %v9344_v59 }
 0x7ea   : > { %6383 = vmatprep.subr.bf16.mxu1 %v10246_v2 }
 0x7ec   : > { %6193 = vmatpush1.bf16.msra.mxu0 %v9354_v44 }
 0x7ed   : > { %6385 = vmatpush1.bf16.msra.mxu1 %v10247_v25  ;;  %6259 = vmatprep.subr.bf16.mxu0 %v10248_v14 }
 0x7ee   : > { %6451 = vmatprep.subr.bf16.mxu1 %v10249_v38  ;;  %v10251_v38 = vld [vmem:[#allocation5_spill] sm:$0xff] }
 0x7ef   : > { %4751 = vmatmul.mubr.f32.vlgmr.msra.gmra.mrb[8].mxu0 %v8716_v53  ;;  %v10252_v53 = vld [vmem:[#allocation6_spill] sm:$0xff] }
 0x7f0   : > { %4988 = vmatmul.mubr.f32.vlgmr.msra.gmra.mrb[20].mxu1 %v9057_v26  ;;  %6261 = vmatpush1.bf16.msra.mxu0 %v8714_v0  ;;  %v10254_v0 = vld [vmem:[#allocation8_spill] sm:$0xff] }
 0x7f1   : > { %4916 = vmatprep.mubr.f32.mxu0 %v8739_v11  ;;  %6453 = vmatpush1.bf16.msra.mxu1 %v7883_v31  ;;  %v10255_v31 = vld [vmem:[#allocation9_spill] sm:$0xff] }
 0x7f2   : > { %5129 = vmatprep.mubr.f32.mxu1 %v9368_v8  ;;  %6263 = vmatprep.subr.bf16.mxu0 %v8730_v37  ;;  %v10256_v37 = vld [vmem:[#allocation10_spill] sm:$0xff] }
 0x7f3   : > { %6455 = vmatprep.subr.bf16.mxu1 %v10251_v38 }
 0x7f4   : > { %6265 = vmatpush1.bf16.msra.mxu0 %v8747_v6  ;;  %v10257_v6 = vld [vmem:[#allocation11_spill] sm:$0xff] }
 0x7f5   : > { %6457 = vmatpush1.bf16.msra.mxu1 %v10252_v53  ;;  %6267 = vmatprep.subr.bf16.mxu0 %v8751_v42  ;;  %v10258_v42 = vld [vmem:[#allocation12_spill] sm:$0xff] }
 0x7f6   : > { %6459 = vmatprep.subr.bf16.mxu1 %v10253_v20 }
 0x7f8   : > { %6269 = vmatpush1.bf16.msra.mxu0 %v8773_v52  ;;  %v10259_v52 = vld [vmem:[#allocation13_spill] sm:$0xff] }
 0x7f9   : > { %6461 = vmatpush1.bf16.msra.mxu1 %v10254_v0  ;;  %6271 = vmatprep.subr.bf16.mxu0 %v8777_v60  ;;  %v10260_v60 = vld [vmem:[#allocation14_spill] sm:$0xff] }
 0x7fa   : > { %6463 = vmatprep.subr.bf16.mxu1 %v10255_v31 }
 0x7fc   : > { %6273 = vmatpush1.bf16.msra.mxu0 %v8793_v55  ;;  %v10261_v55 = vld [vmem:[#allocation15_spill] sm:$0xff] }
 0x7fd   : > { %6465 = vmatpush1.bf16.msra.mxu1 %v10256_v37  ;;  %6275 = vmatprep.subr.bf16.mxu0 %v8797_v56  ;;  %v10262_v56 = vld [vmem:[#allocation16_spill] sm:$0xff] }
 0x7fe   : > { %6467 = vmatprep.subr.bf16.mxu1 %v10257_v6 }
 0x800   : > { %6277 = vmatpush1.bf16.msra.mxu0 %v8813_v43  ;;  %v10263_v43 = vld [vmem:[#allocation17_spill] sm:$0xff] }
 0x801   : > { %6469 = vmatpush1.bf16.msra.mxu1 %v10258_v42  ;;  %6279 = vmatprep.subr.bf16.mxu0 %v8817_v17  ;;  %v10264_v17 = vld [vmem:[#allocation18_spill] sm:$0xff] }
 0x802   : > { %6471 = vmatprep.subr.bf16.mxu1 %v10259_v52 }
 0x804   : > { %6281 = vmatpush1.bf16.msra.mxu0 %v8833_v50  ;;  %v10265_v50 = vld [vmem:[#allocation19_spill] sm:$0xff] }
 0x805   : > { %6473 = vmatpush1.bf16.msra.mxu1 %v10260_v60  ;;  %6283 = vmatprep.subr.bf16.mxu0 %v8837_v57  ;;  %v10266_v57 = vld [vmem:[#allocation20_spill] sm:$0xff] }
 0x806   : > { %6475 = vmatprep.subr.bf16.mxu1 %v10261_v55 }
 0x808   : > { %6285 = vmatpush1.bf16.msra.mxu0 %v8853_v58  ;;  %v10267_v58 = vld [vmem:[#allocation21_spill] sm:$0xff] }
 0x809   : > { %6477 = vmatpush1.bf16.msra.mxu1 %v10262_v56  ;;  %6287 = vmatprep.subr.bf16.mxu0 %v8857_v35  ;;  %v10268_v35 = vld [vmem:[#allocation22_spill] sm:$0xff] }
 0x80a   : > { %6479 = vmatprep.subr.bf16.mxu1 %v10263_v43 }
 0x80c   : > { %6289 = vmatpush1.bf16.msra.mxu0 %v8873_v15  ;;  %v10269_v15 = vld [vmem:[#allocation23_spill] sm:$0xff] }
 0x80d   : > { %6481 = vmatpush1.bf16.msra.mxu1 %v10264_v17  ;;  %6291 = vmatprep.subr.bf16.mxu0 %v8877_v40  ;;  %v10270_v40 = vld [vmem:[#allocation24_spill] sm:$0xff] }
 0x80e   : > { %6483 = vmatprep.subr.bf16.mxu1 %v10265_v50 }
 0x810   : > { %6293 = vmatpush1.bf16.msra.mxu0 %v8893_v32  ;;  %v10271_v32 = vld [vmem:[#allocation25_spill] sm:$0xff] }
 0x811   : > { %6485 = vmatpush1.bf16.msra.mxu1 %v10266_v57  ;;  %6295 = vmatprep.subr.bf16.mxu0 %v8897_v47  ;;  %v10272_v47 = vld [vmem:[#allocation26_spill] sm:$0xff] }
 0x812   : > { %6487 = vmatprep.subr.bf16.mxu1 %v10267_v58 }
 0x814   : > { %6297 = vmatpush1.bf16.msra.mxu0 %v8913_v39  ;;  %v10273_v39 = vld [vmem:[#allocation27_spill] sm:$0xff] }
 0x815   : > { %6489 = vmatpush1.bf16.msra.mxu1 %v10268_v35  ;;  %6299 = vmatprep.subr.bf16.mxu0 %v8917_v51  ;;  %v10274_v51 = vld [vmem:[#allocation28_spill] sm:$0xff] }
 0x816   : > { %6491 = vmatprep.subr.bf16.mxu1 %v10269_v15 }
 0x818   : > { %6301 = vmatpush1.bf16.msra.mxu0 %v8933_v1  ;;  %v10275_v1 = vld [vmem:[#allocation29_spill] sm:$0xff] }
 0x819   : > { %6493 = vmatpush1.bf16.msra.mxu1 %v10270_v40  ;;  %6303 = vmatprep.subr.bf16.mxu0 %v8937_v61  ;;  %v10276_v61 = vld [vmem:[#allocation30_spill] sm:$0xff] }
 0x81a   : > { %6495 = vmatprep.subr.bf16.mxu1 %v10271_v32 }
 0x81c   : > { %6305 = vmatpush1.bf16.msra.mxu0 %v8953_v62  ;;  %v10277_v62 = vld [vmem:[#allocation55_spill] sm:$0xff] }
 0x81d   : > { %6497 = vmatpush1.bf16.msra.mxu1 %v10272_v47  ;;  %6307 = vmatprep.subr.bf16.mxu0 %v8957_v21  ;;  %v10278_v21 = vld [vmem:[#allocation57_spill] sm:$0xff] }
 0x81e   : > { %6499 = vmatprep.subr.bf16.mxu1 %v10273_v39 }
 0x820   : > { %6309 = vmatpush1.bf16.msra.mxu0 %v8973_v24  ;;  %v10279_v24 = vld [vmem:[#allocation59_spill] sm:$0xff] }
 0x821   : > { %6501 = vmatpush1.bf16.msra.mxu1 %v10274_v51  ;;  %6311 = vmatprep.subr.bf16.mxu0 %v8977_v33  ;;  %v10280_v51 = vld [vmem:[#allocation93_spill] sm:$0xff] }
 0x822   : > { %6503 = vmatprep.subr.bf16.mxu1 %v10275_v1 }
 0x824   : > { %6313 = vmatpush1.bf16.msra.mxu0 %v8993_v36 }
 0x825   : > { %6505 = vmatpush1.bf16.msra.mxu1 %v10276_v61  ;;  %6315 = vmatprep.subr.bf16.mxu0 %v8997_v41  ;;  %v10281_v61 = vld [vmem:[#allocation64_spill] sm:$0xff] }
 0x826   : > { %6507 = vmatprep.subr.bf16.mxu1 %v10277_v62  ;;  %v9438_v36 = vadd.f32 %v10281_v61, %v9363_v4  ;;  %v10283_v61 = vld [vmem:[#allocation96_spill] sm:$0xff]  ;;  %v10284_v4 = vld [vmem:[#allocation33_spill] sm:$0xff] }
 0x828   : > { %6317 = vmatpush1.bf16.msra.mxu0 %v9013_v23 }
 0x829   : > { %6509 = vmatpush1.bf16.msra.mxu1 %v10278_v21  ;;  %6319 = vmatprep.subr.bf16.mxu0 %v9017_v49 }
 0x82a   : > { %6511 = vmatprep.subr.bf16.mxu1 %v10279_v24 }
 0x82c   : > { %6321 = vmatpush1.bf16.msra.mxu0 %v10280_v51 }
 0x82d   : > { %6513 = vmatpush1.bf16.msra.mxu1 %v8674_v22  ;;  %6387 = vmatprep.subr.bf16.mxu0 %v9037_v63  ;;  %v10282_v63 = vld [vmem:[#allocation32_spill] sm:$0xff] }
 0x82e   : > { %6579 = vmatprep.subr.bf16.mxu1 %v8334_v7 }
 0x82f   : > { %4917 = vmatmul.mubr.f32.vlgmr.msra.gmra.mrb[10].mxu0 %v9057_v26 }
 0x830   : > { %5130 = vmatmul.mubr.f32.vlgmr.msra.gmra.mrb[22].mxu1 %v9438_v36  ;;  %6389 = vmatpush1.bf16.msra.mxu0 %v9053_v28 }
 0x831   : > { %5058 = vmatprep.mubr.f32.mxu0 %v8739_v11  ;;  %6581 = vmatpush1.bf16.msra.mxu1 %v8369_v29  ;;  %v10285_v11 = vld [vmem:[#allocation98_spill] sm:$0xff]  ;;  %v10286_v29 = vld [vmem:[#allocation35_spill] sm:$0xff] }
 0x832   : > { %5271 = vmatprep.mubr.f32.mxu1 %v9368_v8  ;;  %6391 = vmatprep.subr.bf16.mxu0 %v9067_v45 }
 0x833   : > { %6583 = vmatprep.subr.bf16.mxu1 %v10282_v63  ;;  %v10287_v63 = vld [vmem:[#allocation100_spill] sm:$0xff] }
 0x834   : > { %6393 = vmatpush1.bf16.msra.mxu0 %v9079_v12  ;;  %v10288_v12 = vld [vmem:[#allocation36_spill] sm:$0xff] }
 0x835   : > { %6585 = vmatpush1.bf16.msra.mxu1 %v8391_v3  ;;  %6395 = vmatprep.subr.bf16.mxu0 %v10283_v61  ;;  %v10290_v61 = vld [vmem:[#allocation37_spill] sm:$0xff] }
 0x836   : > { %6587 = vmatprep.subr.bf16.mxu1 %v10284_v4  ;;  %v10289_v4 = vld [vmem:[#allocation102_spill] sm:$0xff] }
 0x838   : > { %6397 = vmatpush1.bf16.msra.mxu0 %v9100_v54 }
 0x839   : > { %6589 = vmatpush1.bf16.msra.mxu1 %v8414_v5  ;;  %6399 = vmatprep.subr.bf16.mxu0 %v10285_v11 }
 0x83a   : > { %6591 = vmatprep.subr.bf16.mxu1 %v10286_v29 }
 0x83c   : > { %6401 = vmatpush1.bf16.msra.mxu0 %v9120_v27 }
 0x83d   : > { %6593 = vmatpush1.bf16.msra.mxu1 %v8437_v46  ;;  %6403 = vmatprep.subr.bf16.mxu0 %v10287_v63 }
 0x83e   : > { %6595 = vmatprep.subr.bf16.mxu1 %v10288_v12  ;;  %v10291_v12 = vld [vmem:[#allocation104_spill] sm:$0xff] }
 0x840   : > { %6405 = vmatpush1.bf16.msra.mxu0 %v9140_v10  ;;  %v10292_v10 = vld [vmem:[#allocation39_spill] sm:$0xff] }
 0x841   : > { %6597 = vmatpush1.bf16.msra.mxu1 %v8456_v34  ;;  %6407 = vmatprep.subr.bf16.mxu0 %v10289_v4 }
 0x842   : > { %v4539_v54 = vpop.f32.mrb[4].mxu0  ;;  %v4681_v5 = vpop.f32.mrb[16].mxu1  ;;  %6599 = vmatprep.subr.bf16.mxu1 %v10290_v61  ;;  %v10294_v61 = vld [vmem:[#allocation41_spill] sm:$0xff] }
 0x843   : > { %4757 = vrot.lane.b32.xlu0 %v4539_v54, %s7120_s27  ;;  %v4541_v29 = vpop.f32.mrb[5].mxu0  ;;  %v4683_v27 = vpop.f32.mrb[17].mxu1  ;;  %v10293_v54 = vld [vmem:[#allocation106_spill] sm:$0xff] }
 0x844   : > { %6409 = vmatpush1.bf16.msra.mxu0 %v9160_v30  ;;  %4759 = vrot.lane.b32.xlu1 %v4541_v29, %s7120_s27  ;;  %v10295_v30 = vld [vmem:[#allocation107_spill] sm:$0xff]  ;;  %v10296_v29 = vld [vmem:[#allocation42_spill] sm:$0xff] }
 0x845   : > { %6601 = vmatpush1.bf16.msra.mxu1 %v8474_v13  ;;  %6411 = vmatprep.subr.bf16.mxu0 %v10291_v12  ;;  %v10297_v13 = vld [vmem:[#allocation108_spill] sm:$0xff]  ;;  %v10298_v12 = vld [vmem:[#allocation43_spill] sm:$0xff] }
 0x846   : > { %6603 = vmatprep.subr.bf16.mxu1 %v10292_v10  ;;  %v10299_v10 = vld [vmem:[#allocation109_spill] sm:$0xff] }
 0x847   : > { %4765 = vrot.lane.b32.xlu0 %v4681_v5, %s7120_s27  ;;  %v10300_v5 = vld [vmem:[#allocation44_spill] sm:$0xff] }
 0x848   : > { %6413 = vmatpush1.bf16.msra.mxu0 %v9180_v18  ;;  %4767 = vrot.lane.b32.xlu1 %v4683_v27, %s7120_s27  ;;  %v10301_v18 = vld [vmem:[#allocation110_spill] sm:$0xff]  ;;  %v10302_v27 = vld [vmem:[#allocation45_spill] sm:$0xff] }
 0x849   : > { %6605 = vmatpush1.bf16.msra.mxu1 %v8492_v9  ;;  %6415 = vmatprep.subr.bf16.mxu0 %v10293_v54  ;;  %v10303_v9 = vld [vmem:[#allocation111_spill] sm:$0xff]  ;;  %v10304_v54 = vld [vmem:[#allocation46_spill] sm:$0xff] }
 0x84a   : > { %6607 = vmatprep.subr.bf16.mxu1 %v10294_v61  ;;  %v10305_v61 = vld [vmem:[#allocation112_spill] sm:$0xff] }
 0x84c   : > { %6417 = vmatpush1.bf16.msra.mxu0 %v10295_v30  ;;  %v10306_v30 = vld [vmem:[#allocation47_spill] sm:$0xff] }
 0x84d   : > { %6609 = vmatpush1.bf16.msra.mxu1 %v10296_v29  ;;  %6419 = vmatprep.subr.bf16.mxu0 %v10297_v13  ;;  %v10307_v29 = vld [vmem:[#allocation113_spill] sm:$0xff]  ;;  %v10308_v13 = vld [vmem:[#allocation48_spill] sm:$0xff] }
 0x84e   : > { %6611 = vmatprep.subr.bf16.mxu1 %v10298_v12  ;;  %v10309_v12 = vld [vmem:[#allocation114_spill] sm:$0xff] }
 0x850   : > { %6421 = vmatpush1.bf16.msra.mxu0 %v10299_v10  ;;  %v10310_v10 = vld [vmem:[#allocation49_spill] sm:$0xff] }
 0x851   : > { %6613 = vmatpush1.bf16.msra.mxu1 %v10300_v5  ;;  %6423 = vmatprep.subr.bf16.mxu0 %v10301_v18  ;;  %v10311_v5 = vld [vmem:[#allocation115_spill] sm:$0xff]  ;;  %v10312_v18 = vld [vmem:[#allocation50_spill] sm:$0xff] }
 0x852   : > { %6615 = vmatprep.subr.bf16.mxu1 %v10302_v27  ;;  %v10313_v27 = vld [vmem:[#allocation116_spill] sm:$0xff] }
 0x854   : > { %6425 = vmatpush1.bf16.msra.mxu0 %v10303_v9  ;;  %v10314_v9 = vld [vmem:[#allocation51_spill] sm:$0xff] }
 0x855   : > { %6617 = vmatpush1.bf16.msra.mxu1 %v10304_v54  ;;  %6427 = vmatprep.subr.bf16.mxu0 %v10305_v61  ;;  %v10315_v54 = vld [vmem:[#allocation117_spill] sm:$0xff]  ;;  %v10316_v61 = vld [vmem:[#allocation52_spill] sm:$0xff] }
 0x856   : > { %6619 = vmatprep.subr.bf16.mxu1 %v10306_v30  ;;  %v10317_v30 = vld [vmem:[#allocation118_spill] sm:$0xff] }
 0x858   : > { %6429 = vmatpush1.bf16.msra.mxu0 %v10307_v29  ;;  %v10318_v29 = vld [vmem:[#allocation53_spill] sm:$0xff] }
 0x859   : > { %6621 = vmatpush1.bf16.msra.mxu1 %v10308_v13  ;;  %6431 = vmatprep.subr.bf16.mxu0 %v10309_v12  ;;  %v10319_v13 = vld [vmem:[#allocation119_spill] sm:$0xff]  ;;  %v10320_v12 = vld [vmem:[#allocation54_spill] sm:$0xff] }
 0x85a   : > { %6623 = vmatprep.subr.bf16.mxu1 %v10310_v10  ;;  %v10321_v10 = vld [vmem:[#allocation120_spill] sm:$0xff] }
 0x85c   : > { %6433 = vmatpush1.bf16.msra.mxu0 %v10311_v5 }
 0x85d   : > { %6625 = vmatpush1.bf16.msra.mxu1 %v10312_v18  ;;  %6435 = vmatprep.subr.bf16.mxu0 %v10313_v27 }
 0x85e   : > { %6627 = vmatprep.subr.bf16.mxu1 %v10314_v9 }
 0x860   : > { %6437 = vmatpush1.bf16.msra.mxu0 %v10315_v54 }
 0x861   : > { %6629 = vmatpush1.bf16.msra.mxu1 %v10316_v61  ;;  %6439 = vmatprep.subr.bf16.mxu0 %v10317_v30 }
 0x862   : > { %6631 = vmatprep.subr.bf16.mxu1 %v10318_v29 }
 0x864   : > { %6441 = vmatpush1.bf16.msra.mxu0 %v10319_v13  ;;  %v10322_v13 = vld [vmem:[#allocation3_spill] sm:$0xff] }
 0x865   : > { %6633 = vmatpush1.bf16.msra.mxu1 %v10320_v12  ;;  %6443 = vmatprep.subr.bf16.mxu0 %v10321_v10  ;;  %v9513_v12 = vpop.permute.xlu1 %3104 }
 0x866   : > { %6635 = vmatprep.subr.bf16.mxu1 %v10243_v16 }
 0x868   : > { %6445 = vmatpush1.bf16.msra.mxu0 %v9340_v48  ;;  %v10323_v48 = vld [vmem:[#allocation70_spill] sm:$0xff] }
 0x869   : > { %6637 = vmatpush1.bf16.msra.mxu1 %v10245_v19  ;;  %6447 = vmatprep.subr.bf16.mxu0 %v9344_v59  ;;  %v9518_v16 = vadd.f32 %v10323_v48, %v9513_v12  ;;  %v10324_v59 = vld [vmem:[#allocation63_spill] sm:$0xff] }
 0x86a   : > { %6639 = vmatprep.subr.bf16.mxu1 %v10246_v2  ;;  %v10329_v48 = vld [vmem:[#allocation71_spill] sm:$0xff] }
 0x86c   : > { %6449 = vmatpush1.bf16.msra.mxu0 %v9354_v44  ;;  %v10325_v44 = vld [vmem:[#allocation4_spill] sm:$0xff] }
 0x86d   : > { %6641 = vmatpush1.bf16.msra.mxu1 %v10247_v25  ;;  %6515 = vmatprep.subr.bf16.mxu0 %v10248_v14  ;;  %v10326_v14 = vld [vmem:[#allocation65_spill] sm:$0xff] }
 0x86e   : > { %6707 = vmatprep.subr.bf16.mxu1 %v10322_v13  ;;  %v10327_v13 = vld [vmem:[#allocation67_spill] sm:$0xff] }
 0x86f   : > { %5059 = vmatmul.mubr.f32.vlgmr.msra.gmra.mrb[12].mxu0 %v9057_v26  ;;  %v10328_v26 = vld [vmem:[#allocation68_spill] sm:$0xff] }
 0x870   : > { %5272 = vmatmul.mubr.f32.vlgmr.msra.gmra.mrb[24].mxu1 %v9438_v36  ;;  %6517 = vmatpush1.bf16.msra.mxu0 %v10324_v59  ;;  %v10330_v59 = vld [vmem:[#allocation72_spill] sm:$0xff] }
 0x871   : > { %5200 = vmatprep.mubr.f32.mxu0 %v9368_v8  ;;  %6709 = vmatpush1.bf16.msra.mxu1 %v10325_v44  ;;  %v10331_v44 = vld [vmem:[#allocation73_spill] sm:$0xff] }
 0x872   : > { %5446 = vmatprep.mubr.f32.mxu1 %v9518_v16  ;;  %6519 = vmatprep.subr.bf16.mxu0 %v10326_v14 }
 0x873   : > { %6711 = vmatprep.subr.bf16.mxu1 %v10251_v38  ;;  %v10332_v38 = vld [vmem:[#allocation74_spill] sm:$0xff] }
 0x874   : > { %6521 = vmatpush1.bf16.msra.mxu0 %v10327_v13 }
 0x875   : > { %6713 = vmatpush1.bf16.msra.mxu1 %v10252_v53  ;;  %6523 = vmatprep.subr.bf16.mxu0 %v10328_v26  ;;  %v10333_v53 = vld [vmem:[#allocation75_spill] sm:$0xff] }
 0x876   : > { %6715 = vmatprep.subr.bf16.mxu1 %v10253_v20  ;;  %v10334_v20 = vld [vmem:[#allocation76_spill] sm:$0xff] }
 0x878   : > { %6525 = vmatpush1.bf16.msra.mxu0 %v10329_v48 }
 0x879   : > { %6717 = vmatpush1.bf16.msra.mxu1 %v10254_v0  ;;  %6527 = vmatprep.subr.bf16.mxu0 %v10330_v59 }
 0x87a   : > { %6719 = vmatprep.subr.bf16.mxu1 %v10255_v31 }
 0x87c   : > { %6529 = vmatpush1.bf16.msra.mxu0 %v10331_v44 }
 0x87d   : > { %6721 = vmatpush1.bf16.msra.mxu1 %v10256_v37  ;;  %6531 = vmatprep.subr.bf16.mxu0 %v10332_v38  ;;  %v10337_v37 = vld [vmem:[#allocation77_spill] sm:$0xff] }
 0x87e   : > { %6723 = vmatprep.subr.bf16.mxu1 %v10257_v6  ;;  %v10338_v6 = vld [vmem:[#allocation78_spill] sm:$0xff] }
 0x880   : > { %6533 = vmatpush1.bf16.msra.mxu0 %v10333_v53 }
 0x881   : > { %6725 = vmatpush1.bf16.msra.mxu1 %v10258_v42  ;;  %6535 = vmatprep.subr.bf16.mxu0 %v10334_v20  ;;  %v10339_v42 = vld [vmem:[#allocation79_spill] sm:$0xff] }
 0x882   : > { %v4610_v48 = vpop.f32.mrb[6].mxu0  ;;  %v9542_v0 = vpop.f32.mrb[18].mxu1  ;;  %6727 = vmatprep.subr.bf16.mxu1 %v10259_v52  ;;  %v10340_v52 = vld [vmem:[#allocation80_spill] sm:$0xff] }
 0x883   : > { %10335 = vst [vmem:[#allocation58_spill] sm:$0xff] %v9542_v0  ;;  %v4612_v31 = vpop.f32.mrb[7].mxu0  ;;  %4761 = vrot.lane.b32.xlu0 %v4610_v48, %s7120_s27  ;;  %v9546_v44 = vpop.f32.mrb[19].mxu1  ;;  %v10341_v48 = vld [vmem:[#allocation81_spill] sm:$0xff] }
 0x884   : > { %10336 = vst [vmem:[#allocation60_spill] sm:$0xff] %v9546_v44  ;;  %6537 = vmatpush1.bf16.msra.mxu0 %v10337_v37  ;;  %4763 = vrot.lane.b32.xlu1 %v4612_v31, %s7120_s27  ;;  %v10342_v44 = vld [vmem:[#allocation82_spill] sm:$0xff]  ;;  %v10352_v31 = vld [vmem:[#allocation28_spill] sm:$0xff]  ;;  %v10377_v0 = vld [vmem:[#allocation105_spill] sm:$0xff] }
 0x885   : > { %6729 = vmatpush1.bf16.msra.mxu1 %v10260_v60  ;;  %6539 = vmatprep.subr.bf16.mxu0 %v10338_v6  ;;  %v10343_v60 = vld [vmem:[#allocation83_spill] sm:$0xff] }
 0x886   : > { %6731 = vmatprep.subr.bf16.mxu1 %v10261_v55  ;;  %v10344_v55 = vld [vmem:[#allocation84_spill] sm:$0xff] }
 0x888   : > { %6541 = vmatpush1.bf16.msra.mxu0 %v10339_v42 }
 0x889   : > { %6733 = vmatpush1.bf16.msra.mxu1 %v10262_v56  ;;  %6543 = vmatprep.subr.bf16.mxu0 %v10340_v52  ;;  %v10345_v56 = vld [vmem:[#allocation85_spill] sm:$0xff] }
 0x88a   : > { %6735 = vmatprep.subr.bf16.mxu1 %v10263_v43  ;;  %v10346_v43 = vld [vmem:[#allocation86_spill] sm:$0xff] }
 0x88c   : > { %6545 = vmatpush1.bf16.msra.mxu0 %v10341_v48 }
 0x88d   : > { %6737 = vmatpush1.bf16.msra.mxu1 %v10264_v17  ;;  %6547 = vmatprep.subr.bf16.mxu0 %v10342_v44  ;;  %v10347_v17 = vld [vmem:[#allocation87_spill] sm:$0xff] }
 0x88e   : > { %6739 = vmatprep.subr.bf16.mxu1 %v10265_v50  ;;  %v10348_v50 = vld [vmem:[#allocation88_spill] sm:$0xff] }
 0x890   : > { %6549 = vmatpush1.bf16.msra.mxu0 %v10343_v60 }
 0x891   : > { %6741 = vmatpush1.bf16.msra.mxu1 %v10266_v57  ;;  %6551 = vmatprep.subr.bf16.mxu0 %v10344_v55  ;;  %v10349_v57 = vld [vmem:[#allocation89_spill] sm:$0xff] }
 0x892   : > { %6743 = vmatprep.subr.bf16.mxu1 %v10267_v58  ;;  %v10350_v58 = vld [vmem:[#allocation90_spill] sm:$0xff] }
 0x894   : > { %6553 = vmatpush1.bf16.msra.mxu0 %v10345_v56 }
 0x895   : > { %6745 = vmatpush1.bf16.msra.mxu1 %v10268_v35  ;;  %6555 = vmatprep.subr.bf16.mxu0 %v10346_v43  ;;  %v10351_v35 = vld [vmem:[#allocation91_spill] sm:$0xff] }
 0x896   : > { %6747 = vmatprep.subr.bf16.mxu1 %v10269_v15  ;;  %v10353_v15 = vld [vmem:[#allocation92_spill] sm:$0xff] }
 0x898   : > { %6557 = vmatpush1.bf16.msra.mxu0 %v10347_v17 }
 0x899   : > { %6749 = vmatpush1.bf16.msra.mxu1 %v10270_v40  ;;  %6559 = vmatprep.subr.bf16.mxu0 %v10348_v50  ;;  %v10354_v40 = vld [vmem:[#allocation30_spill] sm:$0xff] }
 0x89a   : > { %6751 = vmatprep.subr.bf16.mxu1 %v10271_v32  ;;  %v10355_v32 = vld [vmem:[#allocation94_spill] sm:$0xff] }
 0x89c   : > { %6561 = vmatpush1.bf16.msra.mxu0 %v10349_v57 }
 0x89d   : > { %6753 = vmatpush1.bf16.msra.mxu1 %v10272_v47  ;;  %6563 = vmatprep.subr.bf16.mxu0 %v10350_v58  ;;  %v10356_v47 = vld [vmem:[#allocation69_spill] sm:$0xff] }
 0x89e   : > { %6755 = vmatprep.subr.bf16.mxu1 %v10273_v39  ;;  %v9594_v39 = vadd.f32 %v10356_v47, %v9513_v12  ;;  %v10363_v12 = vld [vmem:[#allocation34_spill] sm:$0xff]  ;;  %v10366_v47 = vld [vmem:[#allocation99_spill] sm:$0xff] }
 0x8a0   : > { %6565 = vmatpush1.bf16.msra.mxu0 %v10351_v35 }
 0x8a1   : > { %6757 = vmatpush1.bf16.msra.mxu1 %v10352_v31  ;;  %6567 = vmatprep.subr.bf16.mxu0 %v8977_v33 }
 0x8a2   : > { %6759 = vmatprep.subr.bf16.mxu1 %v10275_v1  ;;  %v10357_v1 = vld [vmem:[#allocation31_spill] sm:$0xff] }
 0x8a4   : > { %6569 = vmatpush1.bf16.msra.mxu0 %v10353_v15 }
 0x8a5   : > { %6761 = vmatpush1.bf16.msra.mxu1 %v10354_v40  ;;  %6571 = vmatprep.subr.bf16.mxu0 %v8997_v41 }
 0x8a6   : > { %6763 = vmatprep.subr.bf16.mxu1 %v10277_v62  ;;  %v10359_v62 = vld [vmem:[#allocation95_spill] sm:$0xff] }
 0x8a8   : > { %6573 = vmatpush1.bf16.msra.mxu0 %v9013_v23 }
 0x8a9   : > { %6765 = vmatpush1.bf16.msra.mxu1 %v10278_v21  ;;  %6575 = vmatprep.subr.bf16.mxu0 %v9017_v49  ;;  %v10361_v21 = vld [vmem:[#allocation33_spill] sm:$0xff] }
 0x8aa   : > { %6767 = vmatprep.subr.bf16.mxu1 %v10279_v24  ;;  %v10362_v24 = vld [vmem:[#allocation97_spill] sm:$0xff] }
 0x8ac   : > { %6577 = vmatpush1.bf16.msra.mxu0 %v10280_v51 }
 0x8ad   : > { %6769 = vmatpush1.bf16.msra.mxu1 %v8674_v22  ;;  %6643 = vmatprep.subr.bf16.mxu0 %v10355_v32  ;;  %v10358_v22 = vld [vmem:[#allocation32_spill] sm:$0xff] }
 0x8ae   : > { %6835 = vmatprep.subr.bf16.mxu1 %v8334_v7  ;;  %v10360_v7 = vld [vmem:[#allocation96_spill] sm:$0xff] }
 0x8af   : > { %5201 = vmatmul.mubr.f32.vlgmr.msra.gmra.mrb[14].mxu0 %v9438_v36 }
 0x8b0   : > { %5447 = vmatmul.mubr.f32.vlgmr.msra.gmra.mrb[26].mxu1 %v9594_v39  ;;  %6645 = vmatpush1.bf16.msra.mxu0 %v9053_v28 }
 0x8b1   : > { %5342 = vmatprep.mubr.f32.mxu0 %v9368_v8  ;;  %6837 = vmatpush1.bf16.msra.mxu1 %v10357_v1  ;;  %v10364_v8 = vld [vmem:[#allocation35_spill] sm:$0xff]  ;;  %v10368_v1 = vld [vmem:[#allocation101_spill] sm:$0xff] }
 0x8b2   : > { %5588 = vmatprep.mubr.f32.mxu1 %v9518_v16  ;;  %6647 = vmatprep.subr.bf16.mxu0 %v9067_v45 }
 0x8b3   : > { %6839 = vmatprep.subr.bf16.mxu1 %v10358_v22 }
 0x8b4   : > { %6649 = vmatpush1.bf16.msra.mxu0 %v10359_v62 }
 0x8b5   : > { %6841 = vmatpush1.bf16.msra.mxu1 %v8391_v3  ;;  %6651 = vmatprep.subr.bf16.mxu0 %v10360_v7  ;;  %v9613_v31 = vpop.permute.xlu0 %4757  ;;  %v10367_v3 = vld [vmem:[#allocation36_spill] sm:$0xff]  ;;  %v10381_v7 = vld [vmem:[#allocation107_spill] sm:$0xff] }
 0x8b6   : > { %6843 = vmatprep.subr.bf16.mxu1 %v10361_v21  ;;  %10365 = vst [vmem:[#allocation61_spill] sm:$0xff] %v9613_v31  ;;  %v9615_v40 = vpop.permute.xlu1 %4759  ;;  %v10379_v31 = vld [vmem:[#allocation106_spill] sm:$0xff] }
 0x8b8   : > { %6653 = vmatpush1.bf16.msra.mxu0 %v10362_v24  ;;  %v10376_v24 = vld [vmem:[#allocation39_spill] sm:$0xff] }
 0x8b9   : > { %6845 = vmatpush1.bf16.msra.mxu1 %v10363_v12  ;;  %6655 = vmatprep.subr.bf16.mxu0 %v10285_v11  ;;  %v9622_v22 = vpop.permute.xlu0 %4765  ;;  %v10372_v11 = vld [vmem:[#allocation103_spill] sm:$0xff] }
 0x8ba   : > { %6847 = vmatprep.subr.bf16.mxu1 %v10364_v8  ;;  %v9624_v21 = vpop.permute.xlu1 %4767  ;;  %v10370_v8 = vld [vmem:[#allocation37_spill] sm:$0xff] }
 0x8bb   : > { %10369 = vst [vmem:[#allocation66_spill] sm:$0xff] %v9624_v21 }
 0x8bc   : > { %6657 = vmatpush1.bf16.msra.mxu0 %v10366_v47 }
 0x8bd   : > { %6849 = vmatpush1.bf16.msra.mxu1 %v8437_v46  ;;  %6659 = vmatprep.subr.bf16.mxu0 %v10287_v63 }
 0x8be   : > { %6851 = vmatprep.subr.bf16.mxu1 %v10367_v3  ;;  %v10371_v3 = vld [vmem:[#allocation2_spill] sm:$0xff] }
 0x8bf   : > { %vm5365_vm1 = vcmp.lt.s32.totalorder %v10371_v3, 32  ;;  %vm5682_vm2 = vcmp.lt.s32.totalorder %v10371_v3, 33 }
 0x8c0   : > { %6661 = vmatpush1.bf16.msra.mxu0 %v10368_v1  ;;  %v4775_v1 = vsel %vm791_vm3, %v9622_v22, %v9624_v21  ;;  %v10380_v21 = vld [vmem:[#allocation41_spill] sm:$0xff] }
 0x8c1   : > { %6853 = vmatpush1.bf16.msra.mxu1 %v8456_v34  ;;  %6663 = vmatprep.subr.bf16.mxu0 %v10289_v4  ;;  %v10374_v4 = vld [vmem:[#allocation38_spill] sm:$0xff] }
 0x8c2   : > { %v4752_v12 = vpop.f32.mrb[8].mxu0  ;;  %6855 = vmatprep.subr.bf16.mxu1 %v10370_v8  ;;  %v10375_v8 = vld [vmem:[#allocation104_spill] sm:$0xff] }
 0x8c3   : > { %v9629_v47 = vpop.f32.mrb[20].mxu1  ;;  %v4754_v46 = vpop.f32.mrb[9].mxu0  ;;  %4769 = vrot.lane.b32.xlu0 %v4752_v12, %s7120_s27  ;;  %v10378_v12 = vld [vmem:[#allocation40_spill] sm:$0xff] }
 0x8c4   : > { %v4991_v63 = vpop.f32.mrb[21].mxu1  ;;  %6665 = vmatpush1.bf16.msra.mxu0 %v10372_v11  ;;  %4771 = vrot.lane.b32.xlu1 %v4754_v46, %s7120_s27  ;;  %v10382_v11 = vld [vmem:[#allocation42_spill] sm:$0xff]  ;;  %v10386_v46 = vld [vmem:[#allocation44_spill] sm:$0xff]  ;;  %s7129_s27 = smov 32  }
 0x8c5   : > { %v9638_v34 = vadd.f32 %v4991_v63, %v4775_v1  ;;  %6857 = vmatpush1.bf16.msra.mxu1 %v10374_v4  ;;  %6667 = vmatprep.subr.bf16.mxu0 %v10375_v8  ;;  %v10383_v63 = vld [vmem:[#allocation108_spill] sm:$0xff]  ;;  %v10384_v1 = vld [vmem:[#allocation43_spill] sm:$0xff]  ;;  %v10385_v4 = vld [vmem:[#allocation109_spill] sm:$0xff] }
 0x8c6   : > { %6859 = vmatprep.subr.bf16.mxu1 %v10376_v24  ;;  %v10387_v24 = vld [vmem:[#allocation110_spill] sm:$0xff] }
 0x8c7   : > { %10373 = vst [vmem:[#allocation5_spill] sm:$0xff] %v9638_v34  ;;  %v10388_v34 = vld [vmem:[#allocation45_spill] sm:$0xff] }
 0x8c8   : > { %6669 = vmatpush1.bf16.msra.mxu0 %v10377_v0 }
 0x8c9   : > { %6861 = vmatpush1.bf16.msra.mxu1 %v10378_v12  ;;  %6671 = vmatprep.subr.bf16.mxu0 %v10379_v31  ;;  %v10389_v12 = vld [vmem:[#allocation111_spill] sm:$0xff]  ;;  %v10390_v31 = vld [vmem:[#allocation46_spill] sm:$0xff] }
 0x8ca   : > { %6863 = vmatprep.subr.bf16.mxu1 %v10380_v21  ;;  %v10391_v21 = vld [vmem:[#allocation112_spill] sm:$0xff] }
 0x8cc   : > { %6673 = vmatpush1.bf16.msra.mxu0 %v10381_v7  ;;  %v10392_v7 = vld [vmem:[#allocation47_spill] sm:$0xff] }
 0x8cd   : > { %6865 = vmatpush1.bf16.msra.mxu1 %v10382_v11  ;;  %6675 = vmatprep.subr.bf16.mxu0 %v10383_v63  ;;  %v10393_v11 = vld [vmem:[#allocation113_spill] sm:$0xff]  ;;  %v10394_v63 = vld [vmem:[#allocation48_spill] sm:$0xff] }
 0x8ce   : > { %6867 = vmatprep.subr.bf16.mxu1 %v10384_v1  ;;  %v10395_v1 = vld [vmem:[#allocation114_spill] sm:$0xff] }
 0x8d0   : > { %6677 = vmatpush1.bf16.msra.mxu0 %v10385_v4  ;;  %v10396_v4 = vld [vmem:[#allocation49_spill] sm:$0xff] }
 0x8d1   : > { %6869 = vmatpush1.bf16.msra.mxu1 %v10386_v46  ;;  %6679 = vmatprep.subr.bf16.mxu0 %v10387_v24 }
 0x8d2   : > { %6871 = vmatprep.subr.bf16.mxu1 %v10388_v34  ;;  %v10399_v34 = vld [vmem:[#allocation56_spill] sm:$0xff] }
 0x8d4   : > { %6681 = vmatpush1.bf16.msra.mxu0 %v10389_v12 }
 0x8d5   : > { %6873 = vmatpush1.bf16.msra.mxu1 %v10390_v31  ;;  %6683 = vmatprep.subr.bf16.mxu0 %v10391_v21  ;;  %v10398_v31 = vld [vmem:[#allocation54_spill] sm:$0xff] }
 0x8d6   : > { %6875 = vmatprep.subr.bf16.mxu1 %v10392_v7  ;;  %v10397_v7 = vld [vmem:[#allocation119_spill] sm:$0xff] }
 0x8d8   : > { %6685 = vmatpush1.bf16.msra.mxu0 %v10393_v11 }
 0x8d9   : > { %6877 = vmatpush1.bf16.msra.mxu1 %v10394_v63  ;;  %6687 = vmatprep.subr.bf16.mxu0 %v10395_v1  ;;  %v10404_v63 = vld [vmem:[#allocation63_spill] sm:$0xff] }
 0x8da   : > { %6879 = vmatprep.subr.bf16.mxu1 %v10396_v4 }
 0x8dc   : > { %6689 = vmatpush1.bf16.msra.mxu0 %v10311_v5 }
 0x8dd   : > { %6881 = vmatpush1.bf16.msra.mxu1 %v10312_v18  ;;  %6691 = vmatprep.subr.bf16.mxu0 %v10313_v27  ;;  %v10400_v18 = vld [vmem:[#allocation121_spill] sm:$0xff] }
 0x8de   : > { %6883 = vmatprep.subr.bf16.mxu1 %v10314_v9  ;;  %v10401_v9 = vld [vmem:[#allocation122_spill] sm:$0xff] }
 0x8e0   : > { %6693 = vmatpush1.bf16.msra.mxu0 %v10315_v54 }
 0x8e1   : > { %6885 = vmatpush1.bf16.msra.mxu1 %v10316_v61  ;;  %6695 = vmatprep.subr.bf16.mxu0 %v10317_v30  ;;  %v10402_v61 = vld [vmem:[#allocation123_spill] sm:$0xff] }
 0x8e2   : > { %6887 = vmatprep.subr.bf16.mxu1 %v10318_v29  ;;  %v10403_v29 = vld [vmem:[#allocation62_spill] sm:$0xff] }
 0x8e4   : > { %6697 = vmatpush1.bf16.msra.mxu0 %v10397_v7 }
 0x8e5   : > { %6889 = vmatpush1.bf16.msra.mxu1 %v10398_v31  ;;  %6699 = vmatprep.subr.bf16.mxu0 %v10321_v10 }
 0x8e6   : > { %6891 = vmatprep.subr.bf16.mxu1 %v10399_v34 }
 0x8e8   : > { %6701 = vmatpush1.bf16.msra.mxu0 %v10400_v18 }
 0x8e9   : > { %6893 = vmatpush1.bf16.msra.mxu1 %v10245_v19  ;;  %6703 = vmatprep.subr.bf16.mxu0 %v10401_v9 }
 0x8ea   : > { %6895 = vmatprep.subr.bf16.mxu1 %v10246_v2 }
 0x8ec   : > { %6705 = vmatpush1.bf16.msra.mxu0 %v10402_v61 }
 0x8ed   : > { %6897 = vmatpush1.bf16.msra.mxu1 %v10247_v25  ;;  %6771 = vmatprep.subr.bf16.mxu0 %v10403_v29 }
 0x8ef   : > { %5343 = vmatmul.mubr.f32.vlgmr.msra.gmra.mrb[16].mxu0 %v9438_v36 }
 0x8f0   : > { %5589 = vmatmul.mubr.f32.vlgmr.msra.gmra.mrb[28].mxu1 %v9594_v39  ;;  %6773 = vmatpush1.bf16.msra.mxu0 %v10404_v63 }
 0x8f1   : > { %5517 = vmatprep.mubr.f32.mxu0 %v9518_v16  ;;  %6775 = vmatprep.subr.bf16.mxu0 %v10326_v14  ;;  %v10405_v14 = vld [vmem:[#allocation71_spill] sm:$0xff] }
 0x8f4   : > { %6777 = vmatpush1.bf16.msra.mxu0 %v10327_v13  ;;  %v10406_v13 = vld [vmem:[#allocation73_spill] sm:$0xff] }
 0x8f5   : > { %v4762_v19 = vpop.permute.xlu0 %4761  ;;  %6779 = vmatprep.subr.bf16.mxu0 %v10328_v26 }
 0x8f6   : > { %v4764_v2 = vpop.permute.xlu1 %4763  ;;  %v4778_v25 = vsel %vm791_vm3, %v9615_v40, %v4762_v19 }
 0x8f7   : > { %v4776_v36 = vsel %vm791_vm3, %v4764_v2, %v9622_v22  ;;  %v4777_v4 = vsel %vm791_vm3, %v4762_v19, %v4764_v2 }
 0x8f8   : > { %v9698_v46 = vadd.f32 %v9629_v47, %v4776_v36  ;;  %6781 = vmatpush1.bf16.msra.mxu0 %v10405_v14 }
 0x8f9   : > { %6783 = vmatprep.subr.bf16.mxu0 %v10330_v59  ;;  %v10408_v59 = vld [vmem:[#allocation61_spill] sm:$0xff] }
 0x8fc   : > { %6785 = vmatpush1.bf16.msra.mxu0 %v10406_v13 }
 0x8fd   : > { %6787 = vmatprep.subr.bf16.mxu0 %v10332_v38 }
 0x900   : > { %6789 = vmatpush1.bf16.msra.mxu0 %v10333_v53  ;;  %v10413_v53 = vld [vmem:[#allocation100_spill] sm:$0xff] }
 0x901   : > { %6791 = vmatprep.subr.bf16.mxu0 %v10334_v20  ;;  %v10414_v20 = vld [vmem:[#allocation101_spill] sm:$0xff] }
 0x902   : > { %v4918_v26 = vpop.f32.mrb[10].mxu0 }
 0x903   : > { %v9706_v22 = vadd.f32 %v4918_v26, %v4778_v25  ;;  %v5131_v31 = vpop.f32.mrb[22].mxu1  ;;  %v4920_v34 = vpop.f32.mrb[11].mxu0  ;;  %v10423_v25 = vld [vmem:[#allocation60_spill] sm:$0xff] }
 0x904   : > { %v9708_v29 = vadd.f32 %v4920_v34, %v4777_v4  ;;  %5349 = vrot.lane.b32.xlu0 %v5131_v31, %s7129_s27  ;;  %v5133_v47 = vpop.f32.mrb[23].mxu1  ;;  %6793 = vmatpush1.bf16.msra.mxu0 %v10337_v37  ;;  %v10415_v37 = vld [vmem:[#allocation102_spill] sm:$0xff] }
 0x905   : > { %5351 = vrot.lane.b32.xlu1 %v5133_v47, %s7129_s27  ;;  %6795 = vmatprep.subr.bf16.mxu0 %v10338_v6  ;;  %v10416_v6 = vld [vmem:[#allocation66_spill] sm:$0xff] }
 0x908   : > { %6797 = vmatpush1.bf16.msra.mxu0 %v10339_v42 }
 0x909   : > { %6799 = vmatprep.subr.bf16.mxu0 %v10340_v52 }
 0x90c   : > { %6801 = vmatpush1.bf16.msra.mxu0 %v10341_v48 }
 0x90d   : > { %6803 = vmatprep.subr.bf16.mxu0 %v10342_v44  ;;  %v10409_v44 = vld [vmem:[#allocation58_spill] sm:$0xff] }
 0x910   : > { %6805 = vmatpush1.bf16.msra.mxu0 %v10343_v60 }
 0x911   : > { %6807 = vmatprep.subr.bf16.mxu0 %v10344_v55 }
 0x914   : > { %6809 = vmatpush1.bf16.msra.mxu0 %v10345_v56 }
 0x915   : > { %6811 = vmatprep.subr.bf16.mxu0 %v10346_v43 }
 0x918   : > { %6813 = vmatpush1.bf16.msra.mxu0 %v10347_v17  ;;  %v10417_v17 = vld [vmem:[#allocation103_spill] sm:$0xff] }
 0x919   : > { %6815 = vmatprep.subr.bf16.mxu0 %v10348_v50  ;;  %v10418_v50 = vld [vmem:[#allocation106_spill] sm:$0xff] }
 0x91c   : > { %6817 = vmatpush1.bf16.msra.mxu0 %v10349_v57  ;;  %v10419_v57 = vld [vmem:[#allocation107_spill] sm:$0xff] }
 0x91d   : > { %6819 = vmatprep.subr.bf16.mxu0 %v10350_v58  ;;  %v10420_v58 = vld [vmem:[#allocation108_spill] sm:$0xff] }
 0x920   : > { %6821 = vmatpush1.bf16.msra.mxu0 %v10351_v35  ;;  %v10421_v35 = vld [vmem:[#allocation109_spill] sm:$0xff] }
 0x921   : > { %6823 = vmatprep.subr.bf16.mxu0 %v8977_v33 }
 0x924   : > { %6825 = vmatpush1.bf16.msra.mxu0 %v10353_v15 }
 0x925   : > { %6827 = vmatprep.subr.bf16.mxu0 %v8997_v41  ;;  %v10407_v41 = vld [vmem:[#allocation96_spill] sm:$0xff] }
 0x928   : > { %6829 = vmatpush1.bf16.msra.mxu0 %v9013_v23 }
 0x929   : > { %6831 = vmatprep.subr.bf16.mxu0 %v9017_v49 }
 0x92c   : > { %6833 = vmatpush1.bf16.msra.mxu0 %v10280_v51 }
 0x92d   : > { %6899 = vmatprep.subr.bf16.mxu0 %v10355_v32 }
 0x92f   : > { %5518 = vmatmul.mubr.f32.vlgmr.msra.gmra.mrb[18].mxu0 %v9594_v39 }
 0x930   : > { %6901 = vmatpush1.bf16.msra.mxu0 %v9053_v28  ;;  %5659 = vmatprep.mubr.f32.mxu0 %v9518_v16  ;;  %v10410_v28 = vld [vmem:[#allocation97_spill] sm:$0xff]  ;;  %v10411_v16 = vld [vmem:[#allocation98_spill] sm:$0xff] }
 0x931   : > { %6903 = vmatprep.subr.bf16.mxu0 %v9067_v45  ;;  %v10412_v45 = vld [vmem:[#allocation99_spill] sm:$0xff] }
 0x934   : > { %6905 = vmatpush1.bf16.msra.mxu0 %v10359_v62  ;;  %v10422_v62 = vld [vmem:[#allocation5_spill] sm:$0xff] }
 0x935   : > { %v4770_v33 = vpop.permute.xlu0 %4769  ;;  %6907 = vmatprep.subr.bf16.mxu0 %v10407_v41 }
 0x936   : > { %v4772_v23 = vpop.permute.xlu1 %4771  ;;  %v4774_v42 = vsel %vm791_vm3, %v10416_v6, %v4770_v33 }
 0x937   : > { %v4780_v51 = vsel %vm791_vm3, %v4772_v23, %v10408_v59  ;;  %v4773_v49 = vsel %vm791_vm3, %v4770_v33, %v4772_v23 }
 0x938   : > { %v9746_v38 = vadd.f32 %v10409_v44, %v4780_v51  ;;  %6909 = vmatpush1.bf16.msra.mxu0 %v10410_v28 }
 0x939   : > { %6911 = vmatprep.subr.bf16.mxu0 %v10411_v16 }
 0x93c   : > { %6913 = vmatpush1.bf16.msra.mxu0 %v10412_v45 }
 0x93d   : > { %6915 = vmatprep.subr.bf16.mxu0 %v10413_v53 }
 0x940   : > { %6917 = vmatpush1.bf16.msra.mxu0 %v10414_v20 }
 0x941   : > { %6919 = vmatprep.subr.bf16.mxu0 %v10415_v37 }
 0x942   : > { %v5060_v52 = vpop.f32.mrb[12].mxu0 }
 0x943   : > { %v9757_v48 = vadd.f32 %v5060_v52, %v4774_v42  ;;  %v5273_v60 = vpop.f32.mrb[24].mxu1  ;;  %v5062_v55 = vpop.f32.mrb[13].mxu0 }
 0x944   : > { %v9759_v56 = vadd.f32 %v5062_v55, %v4773_v49  ;;  %5357 = vrot.lane.b32.xlu0 %v5273_v60, %s7129_s27  ;;  %v5275_v43 = vpop.f32.mrb[25].mxu1  ;;  %6921 = vmatpush1.bf16.msra.mxu0 %v10417_v17 }
 0x945   : > { %5359 = vrot.lane.b32.xlu1 %v5275_v43, %s7129_s27  ;;  %6923 = vmatprep.subr.bf16.mxu0 %v10375_v8 }
 0x948   : > { %6925 = vmatpush1.bf16.msra.mxu0 %v10377_v0 }
 0x949   : > { %6927 = vmatprep.subr.bf16.mxu0 %v10418_v50 }
 0x94c   : > { %6929 = vmatpush1.bf16.msra.mxu0 %v10419_v57 }
 0x94d   : > { %6931 = vmatprep.subr.bf16.mxu0 %v10420_v58 }
 0x950   : > { %6933 = vmatpush1.bf16.msra.mxu0 %v10421_v35 }
 0x951   : > { %6935 = vmatprep.subr.bf16.mxu0 %v10387_v24 }
 0x954   : > { %6937 = vmatpush1.bf16.msra.mxu0 %v10389_v12 }
 0x955   : > { %6939 = vmatprep.subr.bf16.mxu0 %v10391_v21 }
 0x958   : > { %6941 = vmatpush1.bf16.msra.mxu0 %v10393_v11 }
 0x959   : > { %6943 = vmatprep.subr.bf16.mxu0 %v10395_v1  ;;  %v4779_v1 = vsel %vm791_vm3, %v10408_v59, %v9615_v40 }
 0x95a   : > { %v4850_v36 = vadd.f32 %v10423_v25, %v4779_v1 }
 0x95c   : > { %6945 = vmatpush1.bf16.msra.mxu0 %v10311_v5 }
 0x95d   : > { %6947 = vmatprep.subr.bf16.mxu0 %v10313_v27 }
 0x960   : > { %6949 = vmatpush1.bf16.msra.mxu0 %v10315_v54 }
 0x961   : > { %6951 = vmatprep.subr.bf16.mxu0 %v10317_v30 }
 0x964   : > { %6953 = vmatpush1.bf16.msra.mxu0 %v10397_v7 }
 0x965   : > { %6955 = vmatprep.subr.bf16.mxu0 %v10321_v10 }
 0x968   : > { %6957 = vmatpush1.bf16.msra.mxu0 %v10400_v18 }
 0x969   : > { %6959 = vmatprep.subr.bf16.mxu0 %v10401_v9 }
 0x96c   : > { %6961 = vmatpush1.bf16.msra.mxu0 %v10402_v61 }
 0x96f   : > { %5660 = vmatmul.mubr.f32.vlgmr.msra.gmra.mrb[20].mxu0 %v9594_v39 }
 0x976   : > { %v5350_v10 = vpop.permute.xlu0 %5349 }
 0x977   : > { %v5352_v30 = vpop.permute.xlu1 %5351 }
 0x978   : > { %v5372_v61 = vsel %vm5365_vm1, %v5350_v10, %v5352_v30 }
 0x979   : > { %v5375_v13 = vadd.f32 %v5372_v61, %v4850_v36 }
 0x982   : > { %v5202_v0 = vpop.f32.mrb[14].mxu0 }
 0x983   : > { %v5448_v5 = vpop.f32.mrb[26].mxu1  ;;  %v5204_v15 = vpop.f32.mrb[15].mxu0  ;;  %5353 = vrot.lane.b32.xlu0 %v5202_v0, %s7129_s27 }
 0x984   : > { %v5450_v54 = vpop.f32.mrb[27].mxu1  ;;  %5355 = vrot.lane.b32.xlu1 %v5204_v15, %s7129_s27 }
 0x987   : > { %5666 = vrot.lane.b32.xlu0 %v5448_v5, %s7130_s24 }
 0x988   : > { %5668 = vrot.lane.b32.xlu1 %v5450_v54, %s7130_s24 }
 0x9b6   : > { %v5358_v27 = vpop.permute.xlu0 %5357 }
 0x9b7   : > { %v5360_v32 = vpop.permute.xlu1 %5359 }
 0x9b8   : > { %v5368_v39 = vsel %vm5365_vm1, %v5358_v27, %v5360_v32 }
 0x9b9   : > { %v5379_v8 = vadd.f32 %v5368_v39, %v10422_v62 }
 0x9c2   : > { %v5344_v24 = vpop.f32.mrb[16].mxu0 }
 0x9c3   : > { %v5590_v12 = vpop.f32.mrb[28].mxu1  ;;  %v5346_v21 = vpop.f32.mrb[17].mxu0  ;;  %5361 = vrot.lane.b32.xlu0 %v5344_v24, %s7129_s27 }
 0x9c4   : > { %v5592_v11 = vpop.f32.mrb[29].mxu1  ;;  %5363 = vrot.lane.b32.xlu1 %v5346_v21, %s7129_s27 }
 0x9c7   : > { %5674 = vrot.lane.b32.xlu0 %v5590_v12, %s7130_s24 }
 0x9c8   : > { %5676 = vrot.lane.b32.xlu1 %v5592_v11, %s7130_s24 }
 0x9f5   : > { %v5354_v7 = vpop.permute.xlu0 %5353 }
 0x9f6   : > { %v5371_v18 = vsel %vm5365_vm1, %v5352_v30, %v5354_v7  ;;  %v5356_v9 = vpop.permute.xlu1 %5355 }
 0x9f7   : > { %v5376_v63 = vadd.f32 %v5371_v18, %v9706_v22  ;;  %v5369_v19 = vsel %vm5365_vm1, %v5356_v9, %v5358_v27  ;;  %v5370_v2 = vsel %vm5365_vm1, %v5354_v7, %v5356_v9 }
 0x9f8   : > { %v5377_v40 = vadd.f32 %v5370_v2, %v9708_v29  ;;  %v5378_v4 = vadd.f32 %v5369_v19, %v9698_v46 }
 0x9f9   : > { %v5667_v14 = vpop.permute.xlu0 %5666 }
 0x9fa   : > { %v5669_v26 = vpop.permute.xlu1 %5668 }
 0x9fb   : > { %v5689_v22 = vsel %vm5682_vm2, %v5667_v14, %v5669_v26 }
 0x9fc   : > { %v5692_v31 = vadd.f32 %v5689_v22, %v5375_v13 }
 0x9fe   : > { %5700 = vst [vmem:[%s9818_s17 + $0x8] sm:$0xff] %v5692_v31 }
 0xa02   : > { %v5519_v34 = vpop.f32.mrb[18].mxu0 }
 0xa03   : > { %v5521_v46 = vpop.f32.mrb[19].mxu0  ;;  %5670 = vrot.lane.b32.xlu0 %v5519_v34, %s7130_s24 }
 0xa04   : > { %5672 = vrot.lane.b32.xlu1 %v5521_v46, %s7130_s24 }
 0xa35   : > { %v5362_v29 = vpop.permute.xlu0 %5361 }
 0xa36   : > { %v5367_v47 = vsel %vm5365_vm1, %v5360_v32, %v5362_v29  ;;  %v5364_v33 = vpop.permute.xlu1 %5363 }
 0xa37   : > { %v5380_v41 = vadd.f32 %v5367_v47, %v9757_v48  ;;  %v5366_v23 = vsel %vm5365_vm1, %v5362_v29, %v5364_v33  ;;  %v5373_v59 = vsel %vm5365_vm1, %v5364_v33, %v5350_v10 }
 0xa38   : > { %v5374_v51 = vadd.f32 %v5373_v59, %v9746_v38  ;;  %v5381_v49 = vadd.f32 %v5366_v23, %v9759_v56 }
 0xa39   : > { %v5675_v44 = vpop.permute.xlu0 %5674 }
 0xa3a   : > { %v5677_v28 = vpop.permute.xlu1 %5676 }
 0xa3b   : > { %v5685_v16 = vsel %vm5682_vm2, %v5675_v44, %v5677_v28 }
 0xa3c   : > { %v5696_v45 = vadd.f32 %v5685_v16, %v5379_v8 }
 0xa3e   : > { %5704 = vst [vmem:[%s9818_s17 + $0x28] sm:$0xff] %v5696_v45 }
 0xa42   : > { %v5661_v53 = vpop.f32.mrb[20].mxu0 }
 0xa43   : > { %v5663_v20 = vpop.f32.mrb[21].mxu0  ;;  %5678 = vrot.lane.b32.xlu0 %v5661_v53, %s7130_s24 }
 0xa44   : > { %5680 = vrot.lane.b32.xlu1 %v5663_v20, %s7130_s24 }
 0xa75   : > { %v5671_v37 = vpop.permute.xlu0 %5670 }
 0xa76   : > { %v5688_v38 = vsel %vm5682_vm2, %v5669_v26, %v5671_v37  ;;  %v5673_v6 = vpop.permute.xlu1 %5672 }
 0xa77   : > { %v5693_v42 = vadd.f32 %v5688_v38, %v5376_v63  ;;  %v5686_v52 = vsel %vm5682_vm2, %v5673_v6, %v5675_v44  ;;  %v5687_v48 = vsel %vm5682_vm2, %v5671_v37, %v5673_v6 }
 0xa78   : > { %v5694_v60 = vadd.f32 %v5687_v48, %v5377_v40  ;;  %v5695_v55 = vadd.f32 %v5686_v52, %v5378_v4 }
 0xa79   : > { %5701 = vst [vmem:[%s9818_s17 + $0x10] sm:$0xff] %v5693_v42 }
 0xa7a   : > { %5702 = vst [vmem:[%s9818_s17 + $0x18] sm:$0xff] %v5694_v60  ;;  %5703 = vst [vmem:[%s9818_s17 + $0x20] sm:$0xff] %v5695_v55 }
 0xab5   : > { %v5679_v56 = vpop.permute.xlu0 %5678 }
 0xab6   : > { %v5684_v43 = vsel %vm5682_vm2, %v5677_v28, %v5679_v56  ;;  %v5681_v17 = vpop.permute.xlu1 %5680 }
 0xab7   : > { %v5697_v50 = vadd.f32 %v5684_v43, %v5380_v41  ;;  %v5683_v57 = vsel %vm5682_vm2, %v5679_v56, %v5681_v17  ;;  %v5690_v58 = vsel %vm5682_vm2, %v5681_v17, %v5667_v14 }
 0xab8   : > { %v5691_v35 = vadd.f32 %v5690_v58, %v5374_v51  ;;  %v5698_v0 = vadd.f32 %v5683_v57, %v5381_v49 }
 0xab9   : > { %5705 = vst [vmem:[%s9818_s17 + $0x30] sm:$0xff] %v5697_v50 }
 0xaba   : > { %5699 = vst [vmem:[%s9818_s17] sm:$0xff] %v5691_v35  ;;  %5706 = vst [vmem:[%s9818_s17 + $0x38] sm:$0xff] %v5698_v0 }
 0xabb PF: > { %s22_s21 = sadd.s32 1, %s7117_s21  }
 0xabc   : > { %p19_p4 = scmp.ge.s32.totalorder %s22_s21, 4  }
 0xabe   :  { %21 = sbr.rel (!%p19_p4) target bundleno = 1 (0x1), region = 98 }

</bundles_post_ra>
